<compile_context>
chip_gen: v5e
topology: v5e:2x2
jax: 0.10.0
libtpu: 0.0.40
codegen_flags: <defaults>
</compile_context>

<pallas_src>
import jax
import jax.numpy as jnp
import numpy as np
from jax.experimental import pallas as pl
from jax.experimental.pallas import tpu as pltpu


# ---------------------------------------------------------------------------
# Fused kernel.
#   off_ref   : (RR, 3, TILE)        offsets per sub-pixel phase, q lane-dense
#   w1b_ref   : (256, 4)             [w1.T | b1]
#   w2t_ref   : (KOUT_p, 256)        w2.T packed per-o in F_p row blocks
#   b2_ref    : (KOUT_p, 1)          b2 packed the same way
#   patch_ref : (B, F_p, TILE)       LR-resolution im2col patches
#   out_ref   : (RR, BO_pad, TILE)   BO_pad = round8(B*outC)
# ---------------------------------------------------------------------------
def _mum_fused_kernel(off_ref, w1b_ref, w2t_ref, b2_ref, patch_ref, out_ref):
    # Grid-invariant operands: load once, reuse across all phases.
    w1b = w1b_ref[...]                         # (256, 4)
    w2t = w2t_ref[...]                         # (KOUT_p, 256)
    b2 = b2_ref[...]                           # (KOUT_p, 1)

    RR = off_ref.shape[0]
    B = patch_ref.shape[0]
    Fp = patch_ref.shape[1]
    BO_pad = out_ref.shape[1]
    O = w2t.shape[0] // Fp

    # Patch tile: read once per grid step and reused across all r*r phases and
    # all O output channels — this is the r^2 (and O-fold) data reuse that
    # replaces the old HR-resolution im2col HBM round-trip.
    patches = [patch_ref[b] for b in range(B)]  # each (Fp, TILE)

    for s in range(RR):
        off = off_ref[s]                        # (3, TILE)

        # Layer 1: three VPU broadcast-FMAs + bias column (a K=3 MXU
        # contraction would waste >97% of the array).
        h = (w1b[:, 0:1] * off[0:1, :]
             + w1b[:, 1:2] * off[1:2, :]
             + w1b[:, 2:3] * off[2:3, :]
             + w1b[:, 3:4])                     # (256, TILE)
        h = jnp.maximum(h, 0.0)

        # Layer 2: (KOUT_p, 256) @ (256, TILE) on the MXU, f32 accumulate.
        wflat = jnp.dot(w2t, h, preferred_element_type=jnp.float32) + b2

        # Per-pixel contraction over Fp (VPU multiply + sublane reduce).
        # Fp is a multiple of 8, so every per-o slice of wflat and every
        # patches[b] slab is sublane-aligned (no relayout copies); pb is
        # reused across all O channels (o is the inner loop).
        rows = []
        for b in range(B):
            pb = patches[b]                     # (Fp, TILE)
            for o in range(O):
                wo = wflat[o * Fp:(o + 1) * Fp, :]          # aligned view
                rows.append(jnp.sum(pb * wo, axis=0, keepdims=True))
        while len(rows) < BO_pad:               # pad to full sublanes
            rows.append(jnp.zeros_like(rows[0]))

        # One full (BO_pad, TILE) store per phase: unmasked, lane-dense.
        out_ref[s] = jnp.concatenate(rows, axis=0)


# ---------------------------------------------------------------------------
# VMEM-budget-aware lane-tile chooser.
# ---------------------------------------------------------------------------
def _vmem_bytes(tile, B, Fp, RR, BO_pad, KOUT_p):
    streamed = (B * Fp + RR * 3 + RR * BO_pad) * tile * 4          # per-step blocks
    invariant = (256 * 128 + KOUT_p * 256 + KOUT_p * 128) * 4      # lane-padded weights
    interm = (256 + KOUT_p + Fp) * tile * 4                        # h, wflat, products
    return 2 * streamed + 2 * invariant + interm                   # x2: double buffers


def _choose_tile(Q, B, Fp, RR, BO_pad, KOUT_p, budget=24 * 2**20):
    # Largest lane tile (multiple of 128) that fits the VMEM budget while
    # keeping >= 8 grid steps (pipeline overlap + both v7x TCs busy); fall
    # back to >= 2 steps, then to a single 128-lane tile for tiny inputs.
    cands = (4096, 2048, 1024, 512, 256, 128)
    for min_steps in (8, 2, 1):
        for cand in cands:
            if Q >= min_steps * cand and _vmem_bytes(cand, B, Fp, RR, BO_pad,
                                                     KOUT_p) <= budget:
                return cand
    return 128


# ---------------------------------------------------------------------------
# Host wrapper.
# ---------------------------------------------------------------------------
def mum_forward(F_LR, offset_vector, r, HR_size, params, k, inC, outC):
    B, C, h, w = F_LR.shape
    assert C == inC
    HR_H, HR_W = HR_size
    # Standard meta-upscale setting (the phase decomposition relies on it).
    assert HR_H == h * r and HR_W == w * r
    Q = h * w                          # LR pixels (lane axis inside the kernel)
    RR = r * r                         # sub-pixel phases
    pad = (k - 1) // 2
    F = inC * k * k
    Fp = ((F + 7) // 8) * 8            # sublane-aligned per-channel block
    O = outC
    KOUT_p = O * Fp
    BO = B * O
    BO_pad = ((BO + 7) // 8) * 8

    f32 = jnp.float32
    F_LR = F_LR.astype(f32)
    offset_vector = offset_vector.astype(f32)

    # --- LR-resolution im2col (k^2 static slices, NO r^2 upsample here): (B, Fp, Q)
    F_pad_arr = jnp.pad(F_LR, ((0, 0), (0, 0), (pad, pad), (pad, pad)))
    slabs = []
    for ki in range(k):
        for kj in range(k):
            slabs.append(F_pad_arr[:, :, ki:ki + h, kj:kj + w])     # (B,C,h,w)
    patches = jnp.stack(slabs, axis=2).reshape(B, F, Q)             # f = c*k*k + ki*k + kj
    if Fp != F:
        patches = jnp.pad(patches, ((0, 0), (0, Fp - F), (0, 0)))

    # --- Offsets regrouped by sub-pixel phase: (RR, 3, Q)
    off = offset_vector.reshape(h, r, w, r, 3)
    off = jnp.transpose(off, (1, 3, 4, 0, 2)).reshape(RR, 3, Q)

    # --- Parameters: fold b1 into w1 (4th column); pack w2/b2 in per-output-
    #     channel blocks of Fp rows so in-kernel slices are sublane-aligned.
    w1 = params["w1"].astype(f32)                                   # (3, 256)
    b1 = params["b1"].astype(f32)                                   # (256,)
    w2 = params["w2"].astype(f32)                                   # (256, KOUT)
    b2 = params["b2"].astype(f32)                                   # (KOUT,)
    w1b = jnp.concatenate([w1.T, b1[:, None]], axis=1)              # (256, 4)
    w2t = w2.T.reshape(O, F, 256)
    w2t = jnp.pad(w2t, ((0, 0), (0, Fp - F), (0, 0))).reshape(KOUT_p, 256)
    b2c = jnp.pad(b2.reshape(O, F), ((0, 0), (0, Fp - F))).reshape(KOUT_p, 1)

    # --- Lane tiling of the LR-pixel axis
    tile = _choose_tile(Q, B, Fp, RR, BO_pad, KOUT_p)
    Qp = ((Q + tile - 1) // tile) * tile
    if Qp != Q:
        off = jnp.pad(off, ((0, 0), (0, 0), (0, Qp - Q)))
        patches = jnp.pad(patches, ((0, 0), (0, 0), (0, Qp - Q)))
    grid = (Qp // tile,)
    vmem_est = _vmem_bytes(tile, B, Fp, RR, BO_pad, KOUT_p)

    res = pl.pallas_call(
        _mum_fused_kernel,
        out_shape=jax.ShapeDtypeStruct((RR, BO_pad, Qp), f32),
        grid_spec=pltpu.PrefetchScalarGridSpec(
            num_scalar_prefetch=0,
            grid=grid,
            in_specs=[
                pl.BlockSpec((RR, 3, tile), lambda i: (0, 0, i)),
                pl.BlockSpec((256, 4), lambda i: (0, 0)),
                pl.BlockSpec((KOUT_p, 256), lambda i: (0, 0)),
                pl.BlockSpec((KOUT_p, 1), lambda i: (0, 0)),
                pl.BlockSpec((B, Fp, tile), lambda i: (0, 0, i)),
            ],
            out_specs=pl.BlockSpec((RR, BO_pad, tile), lambda i: (0, 0, i)),
        ),
        compiler_params=pltpu.CompilerParams(
            dimension_semantics=("parallel",),   # lane tiles are independent
            vmem_limit_bytes=int(min(48 * 2**20, max(32 * 2**20, 2 * vmem_est))),
        ),
    )(off, w1b, w2t, b2c, patches)

    # --- Un-phase: (RR, BO_pad, Qp) -> (B, outC, HR_H, HR_W)
    res = res[:, :BO, :Q].reshape(r, r, B, O, h, w)
    res = jnp.transpose(res, (2, 3, 4, 0, 5, 1)).reshape(B, O, HR_H, HR_W)
    return res


# ---------------------------------------------------------------------------
# Pure-JAX reference mirroring the PyTorch module (independent formulation).
# ---------------------------------------------------------------------------
def mum_reference(F_LR, offset_vector, r, HR_size, params, k, inC, outC):
    B = F_LR.shape[0]
    HR_H, HR_W = HR_size
    P = HR_H * HR_W
    pad = (k - 1) // 2
    pH = jax.lax.Precision.HIGHEST

    hid = jnp.maximum(jnp.dot(offset_vector, params["w1"], precision=pH)
                      + params["b1"], 0.0)
    w_flat = jnp.dot(hid, params["w2"], precision=pH) + params["b2"]
    pw = w_flat.reshape(P, outC, inC, k, k)

    F_pad = jnp.pad(F_LR, ((0, 0), (0, 0), (pad, pad), (pad, pad)))
    ii = jnp.arange(HR_H) // r
    jj = jnp.arange(HR_W) // r
    kk = jnp.arange(k)
    rows = ii[:, None, None, None] + kk[None, None, :, None]    # (HR_H,1,k,1)
    cols = jj[None, :, None, None] + kk[None, None, None, :]    # (1,HR_W,1,k)
    patches = F_pad[:, :, rows, cols]                            # (B,C,HR_H,HR_W,k,k)
    patches = patches.reshape(B, inC, P, k, k)
    res = jnp.einsum('bcpuv,pocuv->bop', patches, pw, precision=pH)
    return res.reshape(B, outC, HR_H, HR_W)


# ---------------------------------------------------------------------------
if __name__ == "__main__":
    k, inC, outC = 3, 4, 4
    B, h, w = 2, 16, 16
    r = 2
    HR_size = (h * r, w * r)                 # (32, 32) -> P = 1024
    P = HR_size[0] * HR_size[1]
    KOUT = k * k * inC * outC                # 144

    key = jax.random.PRNGKey(0)
    k1, k2, k3, k4, k5, k6 = jax.random.split(key, 6)
    params = {
        "w1": jax.random.normal(k1, (3, 256), jnp.float32) * 0.1,
        "b1": jax.random.normal(k2, (256,), jnp.float32) * 0.01,
        "w2": jax.random.normal(k3, (256, KOUT), jnp.float32) * 0.05,
        "b2": jax.random.normal(k4, (KOUT,), jnp.float32) * 0.01,
    }
    F_LR = jax.random.normal(k5, (B, inC, h, w), jnp.float32)
    offset_vector = jax.random.normal(k6, (P, 3), jnp.float32)

    out = mum_forward(F_LR, offset_vector, r, HR_size, params, k, inC, outC)
    out = jax.block_until_ready(out)

    ref = mum_reference(F_LR, offset_vector, r, HR_size, params, k, inC, outC)
    np.testing.assert_allclose(np.asarray(out), np.asarray(ref),
                               rtol=2e-3, atol=2e-3)
    print("KERNEL_OK")
</pallas_src>

<mosaic_0001>
module attributes {stable_mosaic.version = 11 : i64} {
  func.func @_mum_fused_kernel(%arg0: i32, %arg1: memref<4x3x128xf32, #tpu.memory_space<vmem>>, %arg2: memref<256x4xf32, #tpu.memory_space<vmem>>, %arg3: memref<160x256xf32, #tpu.memory_space<vmem>>, %arg4: memref<160x1xf32, #tpu.memory_space<vmem>>, %arg5: memref<2x40x128xf32, #tpu.memory_space<vmem>>, %arg6: memref<4x8x128xf32, #tpu.memory_space<vmem>>) attributes {dimension_semantics = [#tpu.dimension_semantics<parallel>], iteration_bounds = array<i64: 2>, scalar_prefetch = 0 : i64, scratch_operands = 0 : i64, tpu.core_type = #tpu.core_type<tc>, window_params = [{transform_indices = @transform_0, window_bounds = array<i64: 4, 3, 128>}, {pipeline_mode = #tpu.pipeline_mode<synchronous>, transform_indices = @transform_1, window_bounds = array<i64: 256, 4>}, {pipeline_mode = #tpu.pipeline_mode<synchronous>, transform_indices = @transform_2, window_bounds = array<i64: 160, 256>}, {pipeline_mode = #tpu.pipeline_mode<synchronous>, transform_indices = @transform_3, window_bounds = array<i64: 160, 1>}, {transform_indices = @transform_4, window_bounds = array<i64: 2, 40, 128>}, {transform_indices = @transform_5, window_bounds = array<i64: 4, 8, 128>}]} {
    %c0 = arith.constant 0 : index
    %c0_0 = arith.constant 0 : index
    %0 = vector.load %arg2[%c0, %c0_0] : memref<256x4xf32, #tpu.memory_space<vmem>>, vector<256x4xf32>
    %c0_1 = arith.constant 0 : index
    %c0_2 = arith.constant 0 : index
    %1 = vector.load %arg3[%c0_1, %c0_2] : memref<160x256xf32, #tpu.memory_space<vmem>>, vector<160x256xf32>
    %c0_3 = arith.constant 0 : index
    %c0_4 = arith.constant 0 : index
    %2 = vector.load %arg4[%c0_3, %c0_4] : memref<160x1xf32, #tpu.memory_space<vmem>>, vector<160x1xf32>
    %c0_5 = arith.constant 0 : index
    %c0_6 = arith.constant 0 : index
    %c0_7 = arith.constant 0 : index
    %3 = vector.load %arg5[%c0_5, %c0_6, %c0_7] : memref<2x40x128xf32, #tpu.memory_space<vmem>>, vector<1x40x128xf32>
    %4 = vector.shape_cast %3 : vector<1x40x128xf32> to vector<40x128xf32>
    %c1 = arith.constant 1 : index
    %c0_8 = arith.constant 0 : index
    %c0_9 = arith.constant 0 : index
    %5 = vector.load %arg5[%c1, %c0_8, %c0_9] : memref<2x40x128xf32, #tpu.memory_space<vmem>>, vector<1x40x128xf32>
    %6 = vector.shape_cast %5 : vector<1x40x128xf32> to vector<40x128xf32>
    %c0_10 = arith.constant 0 : index
    %c0_11 = arith.constant 0 : index
    %c0_12 = arith.constant 0 : index
    %7 = vector.load %arg1[%c0_10, %c0_11, %c0_12] : memref<4x3x128xf32, #tpu.memory_space<vmem>>, vector<1x3x128xf32>
    %8 = vector.shape_cast %7 : vector<1x3x128xf32> to vector<3x128xf32>
    %9 = vector.extract_strided_slice %0 {offsets = [0, 0], sizes = [256, 1], strides = [1, 1]} : vector<256x4xf32> to vector<256x1xf32>
    %10 = vector.extract_strided_slice %8 {offsets = [0, 0], sizes = [1, 128], strides = [1, 1]} : vector<3x128xf32> to vector<1x128xf32>
    %11 = vector.broadcast %9 : vector<256x1xf32> to vector<256x128xf32>
    %12 = vector.broadcast %10 : vector<1x128xf32> to vector<256x128xf32>
    %13 = arith.mulf %11, %12 : vector<256x128xf32>
    %14 = vector.extract_strided_slice %0 {offsets = [0, 1], sizes = [256, 1], strides = [1, 1]} : vector<256x4xf32> to vector<256x1xf32>
    %15 = vector.extract_strided_slice %8 {offsets = [1, 0], sizes = [1, 128], strides = [1, 1]} : vector<3x128xf32> to vector<1x128xf32>
    %16 = vector.broadcast %14 : vector<256x1xf32> to vector<256x128xf32>
    %17 = vector.broadcast %15 : vector<1x128xf32> to vector<256x128xf32>
    %18 = arith.mulf %16, %17 : vector<256x128xf32>
    %19 = arith.addf %13, %18 : vector<256x128xf32>
    %20 = vector.extract_strided_slice %0 {offsets = [0, 2], sizes = [256, 1], strides = [1, 1]} : vector<256x4xf32> to vector<256x1xf32>
    %21 = vector.extract_strided_slice %8 {offsets = [2, 0], sizes = [1, 128], strides = [1, 1]} : vector<3x128xf32> to vector<1x128xf32>
    %22 = vector.broadcast %20 : vector<256x1xf32> to vector<256x128xf32>
    %23 = vector.broadcast %21 : vector<1x128xf32> to vector<256x128xf32>
    %24 = arith.mulf %22, %23 : vector<256x128xf32>
    %25 = arith.addf %19, %24 : vector<256x128xf32>
    %26 = vector.extract_strided_slice %0 {offsets = [0, 3], sizes = [256, 1], strides = [1, 1]} : vector<256x4xf32> to vector<256x1xf32>
    %27 = vector.broadcast %26 : vector<256x1xf32> to vector<256x128xf32>
    %28 = arith.addf %25, %27 : vector<256x128xf32>
    %cst = arith.constant 0.000000e+00 : f32
    %29 = vector.broadcast %cst : f32 to vector<256x128xf32>
    %30 = arith.maximumf %28, %29 : vector<256x128xf32>
    %cst_13 = arith.constant dense<0.000000e+00> : vector<160x128xf32>
    %31 = tpu.matmul %1, %30, %cst_13 {dimension_numbers = #tpu.dot_dimension_numbers<[1], [0], [0], [1], [0, 0, 1, 1], [], []>} : vector<160x256xf32>, vector<256x128xf32>, vector<160x128xf32> -> vector<160x128xf32>
    %32 = vector.broadcast %2 : vector<160x1xf32> to vector<160x128xf32>
    %33 = arith.addf %31, %32 : vector<160x128xf32>
    %34 = vector.extract_strided_slice %33 {offsets = [0, 0], sizes = [40, 128], strides = [1, 1]} : vector<160x128xf32> to vector<40x128xf32>
    %35 = arith.mulf %4, %34 : vector<40x128xf32>
    %cst_14 = arith.constant dense<0.000000e+00> : vector<128xf32>
    %36 = vector.multi_reduction <add>, %35, %cst_14 [0] : vector<40x128xf32> to vector<128xf32>
    %37 = vector.shape_cast %36 : vector<128xf32> to vector<1x128xf32>
    %38 = vector.extract_strided_slice %33 {offsets = [40, 0], sizes = [40, 128], strides = [1, 1]} : vector<160x128xf32> to vector<40x128xf32>
    %39 = arith.mulf %4, %38 : vector<40x128xf32>
    %cst_15 = arith.constant dense<0.000000e+00> : vector<128xf32>
    %40 = vector.multi_reduction <add>, %39, %cst_15 [0] : vector<40x128xf32> to vector<128xf32>
    %41 = vector.shape_cast %40 : vector<128xf32> to vector<1x128xf32>
    %42 = vector.extract_strided_slice %33 {offsets = [80, 0], sizes = [40, 128], strides = [1, 1]} : vector<160x128xf32> to vector<40x128xf32>
    %43 = arith.mulf %4, %42 : vector<40x128xf32>
    %cst_16 = arith.constant dense<0.000000e+00> : vector<128xf32>
    %44 = vector.multi_reduction <add>, %43, %cst_16 [0] : vector<40x128xf32> to vector<128xf32>
    %45 = vector.shape_cast %44 : vector<128xf32> to vector<1x128xf32>
    %46 = vector.extract_strided_slice %33 {offsets = [120, 0], sizes = [40, 128], strides = [1, 1]} : vector<160x128xf32> to vector<40x128xf32>
    %47 = arith.mulf %4, %46 : vector<40x128xf32>
    %cst_17 = arith.constant dense<0.000000e+00> : vector<128xf32>
    %48 = vector.multi_reduction <add>, %47, %cst_17 [0] : vector<40x128xf32> to vector<128xf32>
    %49 = vector.shape_cast %48 : vector<128xf32> to vector<1x128xf32>
    %50 = vector.extract_strided_slice %33 {offsets = [0, 0], sizes = [40, 128], strides = [1, 1]} : vector<160x128xf32> to vector<40x128xf32>
    %51 = arith.mulf %6, %50 : vector<40x128xf32>
    %cst_18 = arith.constant dense<0.000000e+00> : vector<128xf32>
    %52 = vector.multi_reduction <add>, %51, %cst_18 [0] : vector<40x128xf32> to vector<128xf32>
    %53 = vector.shape_cast %52 : vector<128xf32> to vector<1x128xf32>
    %54 = vector.extract_strided_slice %33 {offsets = [40, 0], sizes = [40, 128], strides = [1, 1]} : vector<160x128xf32> to vector<40x128xf32>
    %55 = arith.mulf %6, %54 : vector<40x128xf32>
    %cst_19 = arith.constant dense<0.000000e+00> : vector<128xf32>
    %56 = vector.multi_reduction <add>, %55, %cst_19 [0] : vector<40x128xf32> to vector<128xf32>
    %57 = vector.shape_cast %56 : vector<128xf32> to vector<1x128xf32>
    %58 = vector.extract_strided_slice %33 {offsets = [80, 0], sizes = [40, 128], strides = [1, 1]} : vector<160x128xf32> to vector<40x128xf32>
    %59 = arith.mulf %6, %58 : vector<40x128xf32>
    %cst_20 = arith.constant dense<0.000000e+00> : vector<128xf32>
    %60 = vector.multi_reduction <add>, %59, %cst_20 [0] : vector<40x128xf32> to vector<128xf32>
    %61 = vector.shape_cast %60 : vector<128xf32> to vector<1x128xf32>
    %62 = vector.extract_strided_slice %33 {offsets = [120, 0], sizes = [40, 128], strides = [1, 1]} : vector<160x128xf32> to vector<40x128xf32>
    %63 = arith.mulf %6, %62 : vector<40x128xf32>
    %cst_21 = arith.constant dense<0.000000e+00> : vector<128xf32>
    %64 = vector.multi_reduction <add>, %63, %cst_21 [0] : vector<40x128xf32> to vector<128xf32>
    %65 = vector.shape_cast %64 : vector<128xf32> to vector<1x128xf32>
    %66 = tpu.concatenate %37, %41, %45, %49, %53, %57, %61, %65 in 0 : vector<1x128xf32>, vector<1x128xf32>, vector<1x128xf32>, vector<1x128xf32>, vector<1x128xf32>, vector<1x128xf32>, vector<1x128xf32>, vector<1x128xf32> -> vector<8x128xf32>
    %c0_22 = arith.constant 0 : index
    %c0_23 = arith.constant 0 : index
    %c0_24 = arith.constant 0 : index
    %67 = vector.load %arg6[%c0_22, %c0_23, %c0_24] : memref<4x8x128xf32, #tpu.memory_space<vmem>>, vector<1x8x128xf32>
    %68 = vector.shape_cast %67 : vector<1x8x128xf32> to vector<8x128xf32>
    %69 = vector.shape_cast %66 : vector<8x128xf32> to vector<1x8x128xf32>
    tpu.vector_store %arg6[%c0_22, %c0_23, %c0_24], %69 {strides = array<i32>} : memref<4x8x128xf32, #tpu.memory_space<vmem>>, vector<1x8x128xf32>,
    %c1_25 = arith.constant 1 : index
    %c0_26 = arith.constant 0 : index
    %c0_27 = arith.constant 0 : index
    %70 = vector.load %arg1[%c1_25, %c0_26, %c0_27] : memref<4x3x128xf32, #tpu.memory_space<vmem>>, vector<1x3x128xf32>
    %71 = vector.shape_cast %70 : vector<1x3x128xf32> to vector<3x128xf32>
    %72 = vector.extract_strided_slice %0 {offsets = [0, 0], sizes = [256, 1], strides = [1, 1]} : vector<256x4xf32> to vector<256x1xf32>
    %73 = vector.extract_strided_slice %71 {offsets = [0, 0], sizes = [1, 128], strides = [1, 1]} : vector<3x128xf32> to vector<1x128xf32>
    %74 = vector.broadcast %72 : vector<256x1xf32> to vector<256x128xf32>
    %75 = vector.broadcast %73 : vector<1x128xf32> to vector<256x128xf32>
    %76 = arith.mulf %74, %75 : vector<256x128xf32>
    %77 = vector.extract_strided_slice %0 {offsets = [0, 1], sizes = [256, 1], strides = [1, 1]} : vector<256x4xf32> to vector<256x1xf32>
    %78 = vector.extract_strided_slice %71 {offsets = [1, 0], sizes = [1, 128], strides = [1, 1]} : vector<3x128xf32> to vector<1x128xf32>
    %79 = vector.broadcast %77 : vector<256x1xf32> to vector<256x128xf32>
    %80 = vector.broadcast %78 : vector<1x128xf32> to vector<256x128xf32>
    %81 = arith.mulf %79, %80 : vector<256x128xf32>
    %82 = arith.addf %76, %81 : vector<256x128xf32>
    %83 = vector.extract_strided_slice %0 {offsets = [0, 2], sizes = [256, 1], strides = [1, 1]} : vector<256x4xf32> to vector<256x1xf32>
    %84 = vector.extract_strided_slice %71 {offsets = [2, 0], sizes = [1, 128], strides = [1, 1]} : vector<3x128xf32> to vector<1x128xf32>
    %85 = vector.broadcast %83 : vector<256x1xf32> to vector<256x128xf32>
    %86 = vector.broadcast %84 : vector<1x128xf32> to vector<256x128xf32>
    %87 = arith.mulf %85, %86 : vector<256x128xf32>
    %88 = arith.addf %82, %87 : vector<256x128xf32>
    %89 = vector.extract_strided_slice %0 {offsets = [0, 3], sizes = [256, 1], strides = [1, 1]} : vector<256x4xf32> to vector<256x1xf32>
    %90 = vector.broadcast %89 : vector<256x1xf32> to vector<256x128xf32>
    %91 = arith.addf %88, %90 : vector<256x128xf32>
    %cst_28 = arith.constant 0.000000e+00 : f32
    %92 = vector.broadcast %cst_28 : f32 to vector<256x128xf32>
    %93 = arith.maximumf %91, %92 : vector<256x128xf32>
    %cst_29 = arith.constant dense<0.000000e+00> : vector<160x128xf32>
    %94 = tpu.matmul %1, %93, %cst_29 {dimension_numbers = #tpu.dot_dimension_numbers<[1], [0], [0], [1], [0, 0, 1, 1], [], []>} : vector<160x256xf32>, vector<256x128xf32>, vector<160x128xf32> -> vector<160x128xf32>
    %95 = vector.broadcast %2 : vector<160x1xf32> to vector<160x128xf32>
    %96 = arith.addf %94, %95 : vector<160x128xf32>
    %97 = vector.extract_strided_slice %96 {offsets = [0, 0], sizes = [40, 128], strides = [1, 1]} : vector<160x128xf32> to vector<40x128xf32>
    %98 = arith.mulf %4, %97 : vector<40x128xf32>
    %cst_30 = arith.constant dense<0.000000e+00> : vector<128xf32>
    %99 = vector.multi_reduction <add>, %98, %cst_30 [0] : vector<40x128xf32> to vector<128xf32>
    %100 = vector.shape_cast %99 : vector<128xf32> to vector<1x128xf32>
    %101 = vector.extract_strided_slice %96 {offsets = [40, 0], sizes = [40, 128], strides = [1, 1]} : vector<160x128xf32> to vector<40x128xf32>
    %102 = arith.mulf %4, %101 : vector<40x128xf32>
    %cst_31 = arith.constant dense<0.000000e+00> : vector<128xf32>
    %103 = vector.multi_reduction <add>, %102, %cst_31 [0] : vector<40x128xf32> to vector<128xf32>
    %104 = vector.shape_cast %103 : vector<128xf32> to vector<1x128xf32>
    %105 = vector.extract_strided_slice %96 {offsets = [80, 0], sizes = [40, 128], strides = [1, 1]} : vector<160x128xf32> to vector<40x128xf32>
    %106 = arith.mulf %4, %105 : vector<40x128xf32>
    %cst_32 = arith.constant dense<0.000000e+00> : vector<128xf32>
    %107 = vector.multi_reduction <add>, %106, %cst_32 [0] : vector<40x128xf32> to vector<128xf32>
    %108 = vector.shape_cast %107 : vector<128xf32> to vector<1x128xf32>
    %109 = vector.extract_strided_slice %96 {offsets = [120, 0], sizes = [40, 128], strides = [1, 1]} : vector<160x128xf32> to vector<40x128xf32>
    %110 = arith.mulf %4, %109 : vector<40x128xf32>
    %cst_33 = arith.constant dense<0.000000e+00> : vector<128xf32>
    %111 = vector.multi_reduction <add>, %110, %cst_33 [0] : vector<40x128xf32> to vector<128xf32>
    %112 = vector.shape_cast %111 : vector<128xf32> to vector<1x128xf32>
    %113 = vector.extract_strided_slice %96 {offsets = [0, 0], sizes = [40, 128], strides = [1, 1]} : vector<160x128xf32> to vector<40x128xf32>
    %114 = arith.mulf %6, %113 : vector<40x128xf32>
    %cst_34 = arith.constant dense<0.000000e+00> : vector<128xf32>
    %115 = vector.multi_reduction <add>, %114, %cst_34 [0] : vector<40x128xf32> to vector<128xf32>
    %116 = vector.shape_cast %115 : vector<128xf32> to vector<1x128xf32>
    %117 = vector.extract_strided_slice %96 {offsets = [40, 0], sizes = [40, 128], strides = [1, 1]} : vector<160x128xf32> to vector<40x128xf32>
    %118 = arith.mulf %6, %117 : vector<40x128xf32>
    %cst_35 = arith.constant dense<0.000000e+00> : vector<128xf32>
    %119 = vector.multi_reduction <add>, %118, %cst_35 [0] : vector<40x128xf32> to vector<128xf32>
    %120 = vector.shape_cast %119 : vector<128xf32> to vector<1x128xf32>
    %121 = vector.extract_strided_slice %96 {offsets = [80, 0], sizes = [40, 128], strides = [1, 1]} : vector<160x128xf32> to vector<40x128xf32>
    %122 = arith.mulf %6, %121 : vector<40x128xf32>
    %cst_36 = arith.constant dense<0.000000e+00> : vector<128xf32>
    %123 = vector.multi_reduction <add>, %122, %cst_36 [0] : vector<40x128xf32> to vector<128xf32>
    %124 = vector.shape_cast %123 : vector<128xf32> to vector<1x128xf32>
    %125 = vector.extract_strided_slice %96 {offsets = [120, 0], sizes = [40, 128], strides = [1, 1]} : vector<160x128xf32> to vector<40x128xf32>
    %126 = arith.mulf %6, %125 : vector<40x128xf32>
    %cst_37 = arith.constant dense<0.000000e+00> : vector<128xf32>
    %127 = vector.multi_reduction <add>, %126, %cst_37 [0] : vector<40x128xf32> to vector<128xf32>
    %128 = vector.shape_cast %127 : vector<128xf32> to vector<1x128xf32>
    %129 = tpu.concatenate %100, %104, %108, %112, %116, %120, %124, %128 in 0 : vector<1x128xf32>, vector<1x128xf32>, vector<1x128xf32>, vector<1x128xf32>, vector<1x128xf32>, vector<1x128xf32>, vector<1x128xf32>, vector<1x128xf32> -> vector<8x128xf32>
    %c1_38 = arith.constant 1 : index
    %c0_39 = arith.constant 0 : index
    %c0_40 = arith.constant 0 : index
    %130 = vector.load %arg6[%c1_38, %c0_39, %c0_40] : memref<4x8x128xf32, #tpu.memory_space<vmem>>, vector<1x8x128xf32>
    %131 = vector.shape_cast %130 : vector<1x8x128xf32> to vector<8x128xf32>
    %132 = vector.shape_cast %129 : vector<8x128xf32> to vector<1x8x128xf32>
    tpu.vector_store %arg6[%c1_38, %c0_39, %c0_40], %132 {strides = array<i32>} : memref<4x8x128xf32, #tpu.memory_space<vmem>>, vector<1x8x128xf32>,
    %c2 = arith.constant 2 : index
    %c0_41 = arith.constant 0 : index
    %c0_42 = arith.constant 0 : index
    %133 = vector.load %arg1[%c2, %c0_41, %c0_42] : memref<4x3x128xf32, #tpu.memory_space<vmem>>, vector<1x3x128xf32>
    %134 = vector.shape_cast %133 : vector<1x3x128xf32> to vector<3x128xf32>
    %135 = vector.extract_strided_slice %0 {offsets = [0, 0], sizes = [256, 1], strides = [1, 1]} : vector<256x4xf32> to vector<256x1xf32>
    %136 = vector.extract_strided_slice %134 {offsets = [0, 0], sizes = [1, 128], strides = [1, 1]} : vector<3x128xf32> to vector<1x128xf32>
    %137 = vector.broadcast %135 : vector<256x1xf32> to vector<256x128xf32>
    %138 = vector.broadcast %136 : vector<1x128xf32> to vector<256x128xf32>
    %139 = arith.mulf %137, %138 : vector<256x128xf32>
    %140 = vector.extract_strided_slice %0 {offsets = [0, 1], sizes = [256, 1], strides = [1, 1]} : vector<256x4xf32> to vector<256x1xf32>
    %141 = vector.extract_strided_slice %134 {offsets = [1, 0], sizes = [1, 128], strides = [1, 1]} : vector<3x128xf32> to vector<1x128xf32>
    %142 = vector.broadcast %140 : vector<256x1xf32> to vector<256x128xf32>
    %143 = vector.broadcast %141 : vector<1x128xf32> to vector<256x128xf32>
    %144 = arith.mulf %142, %143 : vector<256x128xf32>
    %145 = arith.addf %139, %144 : vector<256x128xf32>
    %146 = vector.extract_strided_slice %0 {offsets = [0, 2], sizes = [256, 1], strides = [1, 1]} : vector<256x4xf32> to vector<256x1xf32>
    %147 = vector.extract_strided_slice %134 {offsets = [2, 0], sizes = [1, 128], strides = [1, 1]} : vector<3x128xf32> to vector<1x128xf32>
    %148 = vector.broadcast %146 : vector<256x1xf32> to vector<256x128xf32>
    %149 = vector.broadcast %147 : vector<1x128xf32> to vector<256x128xf32>
    %150 = arith.mulf %148, %149 : vector<256x128xf32>
    %151 = arith.addf %145, %150 : vector<256x128xf32>
    %152 = vector.extract_strided_slice %0 {offsets = [0, 3], sizes = [256, 1], strides = [1, 1]} : vector<256x4xf32> to vector<256x1xf32>
    %153 = vector.broadcast %152 : vector<256x1xf32> to vector<256x128xf32>
    %154 = arith.addf %151, %153 : vector<256x128xf32>
    %cst_43 = arith.constant 0.000000e+00 : f32
    %155 = vector.broadcast %cst_43 : f32 to vector<256x128xf32>
    %156 = arith.maximumf %154, %155 : vector<256x128xf32>
    %cst_44 = arith.constant dense<0.000000e+00> : vector<160x128xf32>
    %157 = tpu.matmul %1, %156, %cst_44 {dimension_numbers = #tpu.dot_dimension_numbers<[1], [0], [0], [1], [0, 0, 1, 1], [], []>} : vector<160x256xf32>, vector<256x128xf32>, vector<160x128xf32> -> vector<160x128xf32>
    %158 = vector.broadcast %2 : vector<160x1xf32> to vector<160x128xf32>
    %159 = arith.addf %157, %158 : vector<160x128xf32>
    %160 = vector.extract_strided_slice %159 {offsets = [0, 0], sizes = [40, 128], strides = [1, 1]} : vector<160x128xf32> to vector<40x128xf32>
    %161 = arith.mulf %4, %160 : vector<40x128xf32>
    %cst_45 = arith.constant dense<0.000000e+00> : vector<128xf32>
    %162 = vector.multi_reduction <add>, %161, %cst_45 [0] : vector<40x128xf32> to vector<128xf32>
    %163 = vector.shape_cast %162 : vector<128xf32> to vector<1x128xf32>
    %164 = vector.extract_strided_slice %159 {offsets = [40, 0], sizes = [40, 128], strides = [1, 1]} : vector<160x128xf32> to vector<40x128xf32>
    %165 = arith.mulf %4, %164 : vector<40x128xf32>
    %cst_46 = arith.constant dense<0.000000e+00> : vector<128xf32>
    %166 = vector.multi_reduction <add>, %165, %cst_46 [0] : vector<40x128xf32> to vector<128xf32>
    %167 = vector.shape_cast %166 : vector<128xf32> to vector<1x128xf32>
    %168 = vector.extract_strided_slice %159 {offsets = [80, 0], sizes = [40, 128], strides = [1, 1]} : vector<160x128xf32> to vector<40x128xf32>
    %169 = arith.mulf %4, %168 : vector<40x128xf32>
    %cst_47 = arith.constant dense<0.000000e+00> : vector<128xf32>
    %170 = vector.multi_reduction <add>, %169, %cst_47 [0] : vector<40x128xf32> to vector<128xf32>
    %171 = vector.shape_cast %170 : vector<128xf32> to vector<1x128xf32>
    %172 = vector.extract_strided_slice %159 {offsets = [120, 0], sizes = [40, 128], strides = [1, 1]} : vector<160x128xf32> to vector<40x128xf32>
    %173 = arith.mulf %4, %172 : vector<40x128xf32>
    %cst_48 = arith.constant dense<0.000000e+00> : vector<128xf32>
    %174 = vector.multi_reduction <add>, %173, %cst_48 [0] : vector<40x128xf32> to vector<128xf32>
    %175 = vector.shape_cast %174 : vector<128xf32> to vector<1x128xf32>
    %176 = vector.extract_strided_slice %159 {offsets = [0, 0], sizes = [40, 128], strides = [1, 1]} : vector<160x128xf32> to vector<40x128xf32>
    %177 = arith.mulf %6, %176 : vector<40x128xf32>
    %cst_49 = arith.constant dense<0.000000e+00> : vector<128xf32>
    %178 = vector.multi_reduction <add>, %177, %cst_49 [0] : vector<40x128xf32> to vector<128xf32>
    %179 = vector.shape_cast %178 : vector<128xf32> to vector<1x128xf32>
    %180 = vector.extract_strided_slice %159 {offsets = [40, 0], sizes = [40, 128], strides = [1, 1]} : vector<160x128xf32> to vector<40x128xf32>
    %181 = arith.mulf %6, %180 : vector<40x128xf32>
    %cst_50 = arith.constant dense<0.000000e+00> : vector<128xf32>
    %182 = vector.multi_reduction <add>, %181, %cst_50 [0] : vector<40x128xf32> to vector<128xf32>
    %183 = vector.shape_cast %182 : vector<128xf32> to vector<1x128xf32>
    %184 = vector.extract_strided_slice %159 {offsets = [80, 0], sizes = [40, 128], strides = [1, 1]} : vector<160x128xf32> to vector<40x128xf32>
    %185 = arith.mulf %6, %184 : vector<40x128xf32>
    %cst_51 = arith.constant dense<0.000000e+00> : vector<128xf32>
    %186 = vector.multi_reduction <add>, %185, %cst_51 [0] : vector<40x128xf32> to vector<128xf32>
    %187 = vector.shape_cast %186 : vector<128xf32> to vector<1x128xf32>
    %188 = vector.extract_strided_slice %159 {offsets = [120, 0], sizes = [40, 128], strides = [1, 1]} : vector<160x128xf32> to vector<40x128xf32>
    %189 = arith.mulf %6, %188 : vector<40x128xf32>
    %cst_52 = arith.constant dense<0.000000e+00> : vector<128xf32>
    %190 = vector.multi_reduction <add>, %189, %cst_52 [0] : vector<40x128xf32> to vector<128xf32>
    %191 = vector.shape_cast %190 : vector<128xf32> to vector<1x128xf32>
    %192 = tpu.concatenate %163, %167, %171, %175, %179, %183, %187, %191 in 0 : vector<1x128xf32>, vector<1x128xf32>, vector<1x128xf32>, vector<1x128xf32>, vector<1x128xf32>, vector<1x128xf32>, vector<1x128xf32>, vector<1x128xf32> -> vector<8x128xf32>
    %c2_53 = arith.constant 2 : index
    %c0_54 = arith.constant 0 : index
    %c0_55 = arith.constant 0 : index
    %193 = vector.load %arg6[%c2_53, %c0_54, %c0_55] : memref<4x8x128xf32, #tpu.memory_space<vmem>>, vector<1x8x128xf32>
    %194 = vector.shape_cast %193 : vector<1x8x128xf32> to vector<8x128xf32>
    %195 = vector.shape_cast %192 : vector<8x128xf32> to vector<1x8x128xf32>
    tpu.vector_store %arg6[%c2_53, %c0_54, %c0_55], %195 {strides = array<i32>} : memref<4x8x128xf32, #tpu.memory_space<vmem>>, vector<1x8x128xf32>,
    %c3 = arith.constant 3 : index
    %c0_56 = arith.constant 0 : index
    %c0_57 = arith.constant 0 : index
    %196 = vector.load %arg1[%c3, %c0_56, %c0_57] : memref<4x3x128xf32, #tpu.memory_space<vmem>>, vector<1x3x128xf32>
    %197 = vector.shape_cast %196 : vector<1x3x128xf32> to vector<3x128xf32>
    %198 = vector.extract_strided_slice %0 {offsets = [0, 0], sizes = [256, 1], strides = [1, 1]} : vector<256x4xf32> to vector<256x1xf32>
    %199 = vector.extract_strided_slice %197 {offsets = [0, 0], sizes = [1, 128], strides = [1, 1]} : vector<3x128xf32> to vector<1x128xf32>
    %200 = vector.broadcast %198 : vector<256x1xf32> to vector<256x128xf32>
    %201 = vector.broadcast %199 : vector<1x128xf32> to vector<256x128xf32>
    %202 = arith.mulf %200, %201 : vector<256x128xf32>
    %203 = vector.extract_strided_slice %0 {offsets = [0, 1], sizes = [256, 1], strides = [1, 1]} : vector<256x4xf32> to vector<256x1xf32>
    %204 = vector.extract_strided_slice %197 {offsets = [1, 0], sizes = [1, 128], strides = [1, 1]} : vector<3x128xf32> to vector<1x128xf32>
    %205 = vector.broadcast %203 : vector<256x1xf32> to vector<256x128xf32>
    %206 = vector.broadcast %204 : vector<1x128xf32> to vector<256x128xf32>
    %207 = arith.mulf %205, %206 : vector<256x128xf32>
    %208 = arith.addf %202, %207 : vector<256x128xf32>
    %209 = vector.extract_strided_slice %0 {offsets = [0, 2], sizes = [256, 1], strides = [1, 1]} : vector<256x4xf32> to vector<256x1xf32>
    %210 = vector.extract_strided_slice %197 {offsets = [2, 0], sizes = [1, 128], strides = [1, 1]} : vector<3x128xf32> to vector<1x128xf32>
    %211 = vector.broadcast %209 : vector<256x1xf32> to vector<256x128xf32>
    %212 = vector.broadcast %210 : vector<1x128xf32> to vector<256x128xf32>
    %213 = arith.mulf %211, %212 : vector<256x128xf32>
    %214 = arith.addf %208, %213 : vector<256x128xf32>
    %215 = vector.extract_strided_slice %0 {offsets = [0, 3], sizes = [256, 1], strides = [1, 1]} : vector<256x4xf32> to vector<256x1xf32>
    %216 = vector.broadcast %215 : vector<256x1xf32> to vector<256x128xf32>
    %217 = arith.addf %214, %216 : vector<256x128xf32>
    %cst_58 = arith.constant 0.000000e+00 : f32
    %218 = vector.broadcast %cst_58 : f32 to vector<256x128xf32>
    %219 = arith.maximumf %217, %218 : vector<256x128xf32>
    %cst_59 = arith.constant dense<0.000000e+00> : vector<160x128xf32>
    %220 = tpu.matmul %1, %219, %cst_59 {dimension_numbers = #tpu.dot_dimension_numbers<[1], [0], [0], [1], [0, 0, 1, 1], [], []>} : vector<160x256xf32>, vector<256x128xf32>, vector<160x128xf32> -> vector<160x128xf32>
    %221 = vector.broadcast %2 : vector<160x1xf32> to vector<160x128xf32>
    %222 = arith.addf %220, %221 : vector<160x128xf32>
    %223 = vector.extract_strided_slice %222 {offsets = [0, 0], sizes = [40, 128], strides = [1, 1]} : vector<160x128xf32> to vector<40x128xf32>
    %224 = arith.mulf %4, %223 : vector<40x128xf32>
    %cst_60 = arith.constant dense<0.000000e+00> : vector<128xf32>
    %225 = vector.multi_reduction <add>, %224, %cst_60 [0] : vector<40x128xf32> to vector<128xf32>
    %226 = vector.shape_cast %225 : vector<128xf32> to vector<1x128xf32>
    %227 = vector.extract_strided_slice %222 {offsets = [40, 0], sizes = [40, 128], strides = [1, 1]} : vector<160x128xf32> to vector<40x128xf32>
    %228 = arith.mulf %4, %227 : vector<40x128xf32>
    %cst_61 = arith.constant dense<0.000000e+00> : vector<128xf32>
    %229 = vector.multi_reduction <add>, %228, %cst_61 [0] : vector<40x128xf32> to vector<128xf32>
    %230 = vector.shape_cast %229 : vector<128xf32> to vector<1x128xf32>
    %231 = vector.extract_strided_slice %222 {offsets = [80, 0], sizes = [40, 128], strides = [1, 1]} : vector<160x128xf32> to vector<40x128xf32>
    %232 = arith.mulf %4, %231 : vector<40x128xf32>
    %cst_62 = arith.constant dense<0.000000e+00> : vector<128xf32>
    %233 = vector.multi_reduction <add>, %232, %cst_62 [0] : vector<40x128xf32> to vector<128xf32>
    %234 = vector.shape_cast %233 : vector<128xf32> to vector<1x128xf32>
    %235 = vector.extract_strided_slice %222 {offsets = [120, 0], sizes = [40, 128], strides = [1, 1]} : vector<160x128xf32> to vector<40x128xf32>
    %236 = arith.mulf %4, %235 : vector<40x128xf32>
    %cst_63 = arith.constant dense<0.000000e+00> : vector<128xf32>
    %237 = vector.multi_reduction <add>, %236, %cst_63 [0] : vector<40x128xf32> to vector<128xf32>
    %238 = vector.shape_cast %237 : vector<128xf32> to vector<1x128xf32>
    %239 = vector.extract_strided_slice %222 {offsets = [0, 0], sizes = [40, 128], strides = [1, 1]} : vector<160x128xf32> to vector<40x128xf32>
    %240 = arith.mulf %6, %239 : vector<40x128xf32>
    %cst_64 = arith.constant dense<0.000000e+00> : vector<128xf32>
    %241 = vector.multi_reduction <add>, %240, %cst_64 [0] : vector<40x128xf32> to vector<128xf32>
    %242 = vector.shape_cast %241 : vector<128xf32> to vector<1x128xf32>
    %243 = vector.extract_strided_slice %222 {offsets = [40, 0], sizes = [40, 128], strides = [1, 1]} : vector<160x128xf32> to vector<40x128xf32>
    %244 = arith.mulf %6, %243 : vector<40x128xf32>
    %cst_65 = arith.constant dense<0.000000e+00> : vector<128xf32>
    %245 = vector.multi_reduction <add>, %244, %cst_65 [0] : vector<40x128xf32> to vector<128xf32>
    %246 = vector.shape_cast %245 : vector<128xf32> to vector<1x128xf32>
    %247 = vector.extract_strided_slice %222 {offsets = [80, 0], sizes = [40, 128], strides = [1, 1]} : vector<160x128xf32> to vector<40x128xf32>
    %248 = arith.mulf %6, %247 : vector<40x128xf32>
    %cst_66 = arith.constant dense<0.000000e+00> : vector<128xf32>
    %249 = vector.multi_reduction <add>, %248, %cst_66 [0] : vector<40x128xf32> to vector<128xf32>
    %250 = vector.shape_cast %249 : vector<128xf32> to vector<1x128xf32>
    %251 = vector.extract_strided_slice %222 {offsets = [120, 0], sizes = [40, 128], strides = [1, 1]} : vector<160x128xf32> to vector<40x128xf32>
    %252 = arith.mulf %6, %251 : vector<40x128xf32>
    %cst_67 = arith.constant dense<0.000000e+00> : vector<128xf32>
    %253 = vector.multi_reduction <add>, %252, %cst_67 [0] : vector<40x128xf32> to vector<128xf32>
    %254 = vector.shape_cast %253 : vector<128xf32> to vector<1x128xf32>
    %255 = tpu.concatenate %226, %230, %234, %238, %242, %246, %250, %254 in 0 : vector<1x128xf32>, vector<1x128xf32>, vector<1x128xf32>, vector<1x128xf32>, vector<1x128xf32>, vector<1x128xf32>, vector<1x128xf32>, vector<1x128xf32> -> vector<8x128xf32>
    %c3_68 = arith.constant 3 : index
    %c0_69 = arith.constant 0 : index
    %c0_70 = arith.constant 0 : index
    %256 = vector.load %arg6[%c3_68, %c0_69, %c0_70] : memref<4x8x128xf32, #tpu.memory_space<vmem>>, vector<1x8x128xf32>
    %257 = vector.shape_cast %256 : vector<1x8x128xf32> to vector<8x128xf32>
    %258 = vector.shape_cast %255 : vector<8x128xf32> to vector<1x8x128xf32>
    tpu.vector_store %arg6[%c3_68, %c0_69, %c0_70], %258 {strides = array<i32>} : memref<4x8x128xf32, #tpu.memory_space<vmem>>, vector<1x8x128xf32>,
    return
  }
  func.func @transform_0(%arg0: i32) -> (i32, i32, i32) {
    %c0_i32 = arith.constant 0 : i32
    %c0_i32_0 = arith.constant 0 : i32
    %c0_i32_1 = arith.constant 0 : i32
    return %c0_i32, %c0_i32_0, %arg0 : i32, i32, i32
  }
  func.func @transform_1(%arg0: i32) -> (i32, i32) {
    %c0_i32 = arith.constant 0 : i32
    %c0_i32_0 = arith.constant 0 : i32
    %c0_i32_1 = arith.constant 0 : i32
    return %c0_i32, %c0_i32_0 : i32, i32
  }
  func.func @transform_2(%arg0: i32) -> (i32, i32) {
    %c0_i32 = arith.constant 0 : i32
    %c0_i32_0 = arith.constant 0 : i32
    %c0_i32_1 = arith.constant 0 : i32
    return %c0_i32, %c0_i32_0 : i32, i32
  }
  func.func @transform_3(%arg0: i32) -> (i32, i32) {
    %c0_i32 = arith.constant 0 : i32
    %c0_i32_0 = arith.constant 0 : i32
    %c0_i32_1 = arith.constant 0 : i32
    return %c0_i32, %c0_i32_0 : i32, i32
  }
  func.func @transform_4(%arg0: i32) -> (i32, i32, i32) {
    %c0_i32 = arith.constant 0 : i32
    %c0_i32_0 = arith.constant 0 : i32
    %c0_i32_1 = arith.constant 0 : i32
    return %c0_i32, %c0_i32_0, %arg0 : i32, i32, i32
  }
  func.func @transform_5(%arg0: i32) -> (i32, i32, i32) {
    %c0_i32 = arith.constant 0 : i32
    %c0_i32_0 = arith.constant 0 : i32
    %c0_i32_1 = arith.constant 0 : i32
    return %c0_i32, %c0_i32_0, %arg0 : i32, i32, i32
  }
}

</mosaic_0001>

<bundles_post_ra>
// kernel: tpu_custom_call.1
= control target key start
LH: loop header
LB: loop body
LE: loop exit
PB: predicated region body
PF: predicated region fallthrough
CT: control target
= control target key end

     0   :  { %s6779_s0 = inlined_call_operand.vmem [shape: f32[4,3,256], index: 0, kind: input, shape index: {}]   ;;  %s6780_s1 = inlined_call_operand.vmem [shape: f32[256,4], index: 1, kind: input, shape index: {}]   ;;  %s6781_s2 = inlined_call_operand.vmem [shape: f32[160,256], index: 2, kind: input, shape index: {}]   ;;  %s6782_s3 = inlined_call_operand.vmem [shape: f32[160,1], index: 3, kind: input, shape index: {}]   ;;  %s6783_s4 = inlined_call_operand.hbm [shape: f32[2,40,256], index: 4, kind: input, shape index: {}]   ;;  %s6784_s5 = inlined_call_operand.hbm [shape: f32[4,8,256], index: 5, kind: output, shape index: {}]  }
   0x1   :  { %6898 = sst [smem:[#allocation104_spill]] %s6779_s0 }
   0x2   :  { %10 = vsyncpa [#allocation4], 0 }
   0x3   :  { %12 = vsyncpa [#allocation4 + $0x1], 0 }
   0x4   :  { %13 = vsyncpa [#allocation5], 0 }
   0x5   :  { %15 = vsyncpa [#allocation5 + $0x1], 0  ;;  %s3517_s18 = smov 0   ;;  %s3519_s19 = smov 0  }
   0x6   :  { %s3521_s20 = smov 0   ;;  %s3523_s21 = smov 0  }
   0x7 LB: > { %s3538_s22 = sadd.s32 4294967295, %s3475_s21   ;;  %s3225_s23 = sadd.s32 4294967294, %s3475_s21   ;;  %s3475_s21 = sphi %s3523_s21, %s7288_s21   ;;  %s3471_s20 = sphi %s3521_s20, %s7287_s20   ;;  %s3467_s19 = sphi %s3519_s19, %s7286_s19   ;;  %s3463_s18 = sphi %s3517_s18, %s7285_s18  }
   0x8   : > { %s3542_s24 = sadd.s32 1, %s3475_s21   ;;  %s28_s25 = sadd.s32 1, %s3471_s20 }
   0x9   : > { %s25_s26 = ssub.s32 %s3475_s21, %s3542_s24  ;;  %p35_p0 = scmp.ne.s32.totalorder %s3471_s20, %s3467_s19 }
   0xa   : > { %p26_p1 = scmp.eq.s32.totalorder %s25_s26, 0  ;;  %p36_p2 = scmp.eq.s32.totalorder %s3475_s21, 0 }
   0xb   : > { %p130_p3 = scmp.ne.s32.totalorder %s3467_s19, %s3463_s18  ;;  %p131_p4 = scmp.eq.s32.totalorder %s3538_s22, 0 }
   0xc   : > { %s3554_s27 = scalar_select %p26_p1, %s3471_s20, %s28_s25  }
   0xd   : > { %p3556_p5 = por %p36_p2, %p35_p0  ;;  %p3560_p6 = por %p131_p4, %p130_p3 }
   0xe   : > { %6899 = sst [smem:[#allocation9_spill]] %s3554_s27  ;;  %p154_p7 = scmp.eq.s32.totalorder %s3538_s22, 1 }
   0xf   : > { %p160_p8 = scmp.eq.s32.totalorder %s3225_s23, 1  ;;  %p3227_p11 = scmp.ge.s32.totalorder %s3475_s21, 2 }
  0x10   : > { %p3565_p9 = por %p154_p7, %p35_p0 }
  0x11   : > { %p3569_p10 = por %p160_p8, %p130_p3  ;;  %185 = sbr.rel (%p3227_p11) target bundleno = 53 (0x35), region = 28 }
  0x16   : > { %188 = sbr.rel (!%p3556_p5) target bundleno = 36 (0x24), region = 32  ;;  %s190_s7 = sand.u32 (%p3556_p5), 1, %s3471_s20  }
  0x17   : > { %s3229_s8 = sshll.u32 (%p3556_p5), %s3475_s21, 2  ;;  %s3228_s9 = sshll.u32 (%p3556_p5), %s190_s7, 4 }
  0x18   : > { %s6904_s0 = sld [smem:[#allocation104_spill]] (%p3556_p5)  ;;  %s192_s13 = scalar_lea.vmem (%p3556_p5), [#allocation2], %s3228_s9 }
  0x1e   : > { %s194_s12 = scalar_lea.vmem %s6904_s0, %s3229_s8 }
  0x1f   : > { %v211_v0 = vld [vmem:[%s194_s12] sm:$0xf]  ;;  %v213_v1 = vld [vmem:[%s194_s12 + $0x8] sm:$0xf]  ;;  %v215_v2 = vld [vmem:[%s194_s12 + $0x10] sm:$0xf] }
  0x20   : > { %212 = vst [vmem:[%s192_s13] sm:$0xf] %v211_v0  ;;  %v217_v3 = vld [vmem:[%s194_s12 + $0x18] sm:$0xf] }
  0x21   : > { %214 = vst [vmem:[%s192_s13 + $0x4] sm:$0xf] %v213_v1 }
  0x22   : > { %216 = vst [vmem:[%s192_s13 + $0x8] sm:$0xf] %v215_v2 }
  0x23   : > { %218 = vst [vmem:[%s192_s13 + $0xc] sm:$0xf] %v217_v3 }
  0x24 PF: > { %s251_s14 = sand.u32 1, %s3471_s20   ;;  %s3230_s15 = sshll.u32 %s3475_s21, 3 }
  0x25   : > { %s3249_s16 = smul.u32 80, %s251_s14  ;;  %s259_s25 = scalar_lea.hbm %s6783_s4, %s3230_s15 }
  0x26   : > { %s260_s26 = sshll.u32 %s259_s25, 4  ;;  %s252_s9 = scalar_lea.sflag [#allocation4], %s251_s14  ;;  %s261_s26 = int_to_ptr.hbm [resolvable:$true] %s260_s26 }
  0x27   : > { %s255_s7 = scalar_lea.vmem [#allocation3], %s3249_s16  ;;  %s3381_s10 = sshra.s32 %s261_s26, 4  ;;  %s3382_s10 = int_to_ptr.hbm [resolvable:$true] %s3381_s10 }
  0x28   : > { %s262_s8 = sshll.u32 %s255_s7, 4  ;;  %s3383_s11 = scalar_lea.hbm %s3382_s10, 80  ;;  %s263_s8 = int_to_ptr.vmem [resolvable:$true] %s262_s8 }
  0x29   : > { %p3384_p12 = scmp.ne.s32.totalorder %s3382_s10, %s3383_s11  ;;  %s3387_s0 = scalar_lea.hbm %s6783_s4, 160 }
  0x2a   : > { %p3388_p1 = scmp.lt.s32.totalorder %s3382_s10, %s6783_s4  ;;  %p3389_p2 = scmp.lt.s32.totalorder %s3387_s0, %s3383_s11 }
  0x2b   : > { %p3385_p13 = pnand %p3384_p12, %p3556_p5 }
  0x2c   : > { %p3390_p3 = por %p3389_p2, %p3388_p1 }
  0x2d   : > { %p3386_p0 = pneg %p3385_p13 }
  0x2f   : > { %p3391_p4 = pnand %p3390_p3, %p3386_p0 }
  0x31   : > { %3394 = shalt.err (!%p3391_p4)
}
  0x32   : > { %s3477_s14 = smov 256   ;;  %s3478_s15 = smov 128  }
  0x33   : > { %s3479_s16 = smov 8  }
  0x34   : > { %3251 = dma.hbm_to_vmem [thread:$0]  (%p3556_p5), %s261_s26, 1280, %s263_s8, %s252_s9, %s3477_s14, %s3478_s15, %s3479_s16  }
  0x35 PF: > { %p3231_p7 = scmp.ge.s32.totalorder %s3475_s21, 1  ;;  %p270_p8 = scmp.lt.s32.totalorder %s3475_s21, 3 }
  0x37   : > { %p271_p12 = pnand %p3231_p7, %p270_p8 }
  0x39   : > { %274 = sbr.rel (%p271_p12) target bundleno = 1053 (0x41d), region = 77 }
  0x3e   : > { %s3601_s27 = sand.u32 1, %s3467_s19  }
  0x3f   : > { %s3232_s0 = sshll.u32 %s3601_s27, 4  ;;  %s3250_s23 = smul.u32 80, %s3601_s27 }
  0x40   : > { %s3605_s25 = scalar_lea.vmem [#allocation2], %s3232_s0  ;;  %s284_s28 = scalar_lea.sflag [#allocation4], %s3601_s27 }
  0x41   : > { %s3608_s26 = scalar_lea.vmem [#allocation3], %s3250_s23 }
  0x42   : > { %3454 = dma.done.wait (%p3560_p6), %s284_s28, 1280  }
  0x43   : > { %3456 = vsyncadd (%p3560_p6), %s284_s28, 4294966016  ;;  %v6785_v4 = vmov 0   ;;  %v3620_v5 = vld [vmem:[%s6780_s1 + $0x20] sm:$0xff]  ;;  %v3625_v6 = vld [vmem:[%s6780_s1 + $0x10] sm:$0xff]  ;;  %v6791_v37 = vmov 1   ;;  %v6789_v38 = vmov 3  }
  0x44   : > { %3304 = vset.pattern.permute.xlu2 %v6785_v4  ;;  %3303 = vset.pattern.permute.xlu1 %v6785_v4  ;;  %6905 = vst [vmem:[#allocation10_spill] sm:$0xff] %v3625_v6  ;;  %v3630_v7 = vld [vmem:[%s6780_s1] sm:$0xff]  ;;  %v3638_v8 = vld [vmem:[%s6780_s1 + $0x28] sm:$0xff]  ;;  %v3643_v9 = vld [vmem:[%s6780_s1 + $0x18] sm:$0xff]  ;;  %v6787_v57 = vmov 2   ;;  %vm1568_vm0 = vcmask 1040384  }
  0x45   : > { %3302 = vset.pattern.permute.xlu0 %v6785_v4  ;;  %6906 = vst [vmem:[#allocation11_spill] sm:$0xff] %v3630_v7  ;;  %445 = vperm.xlu2 %3304, %v3620_v5   ;;  %v3648_v10 = vld [vmem:[%s6780_s1 + $0x8] sm:$0xff]  ;;  %v3656_v11 = vld [vmem:[%s6780_s1 + $0x40] sm:$0xff]  ;;  %v3661_v12 = vld [vmem:[%s6780_s1 + $0x38] sm:$0xff]  ;;  %vm1570_vm1 = vcmask 1041408   ;;  %vm1572_vm2 = vcmask 1042432  }
  0x46   : > { %435 = vperm.xlu1 %3303, %v3625_v6   ;;  %425 = vperm.xlu0 %3302, %v3630_v7   ;;  %6907 = vst [vmem:[#allocation12_spill] sm:$0xff] %v3656_v11  ;;  %v3666_v13 = vld [vmem:[%s6780_s1 + $0x30] sm:$0xff]  ;;  %v3674_v14 = vld [vmem:[%s6780_s1 + $0x58] sm:$0xff]  ;;  %v3684_v16 = vld [vmem:[%s6780_s1 + $0x48] sm:$0xff]  ;;  %vm1574_vm3 = vcmask 1043456   ;;  %vm1576_vm4 = vcmask 1044480  }
  0x47   : > { %6908 = vst [vmem:[#allocation13_spill] sm:$0xff] %v3661_v12  ;;  %v3679_v15 = vld [vmem:[%s6780_s1 + $0x50] sm:$0xff]  ;;  %v3697_v18 = vld [vmem:[%s6780_s1 + $0x68] sm:$0xff]  ;;  %v3702_v19 = vld [vmem:[%s6780_s1 + $0x60] sm:$0xff]  ;;  %vm1578_vm5 = vcmask 1045504   ;;  %vm1580_vm6 = vcmask 1046528  }
  0x48   : > { %6909 = vst [vmem:[#allocation14_spill] sm:$0xff] %v3679_v15  ;;  %v3692_v17 = vld [vmem:[%s6780_s1 + $0x70] sm:$0xff]  ;;  %v3710_v20 = vld [vmem:[%s6780_s1 + $0x88] sm:$0xff]  ;;  %v3715_v21 = vld [vmem:[%s6780_s1 + $0x80] sm:$0xff]  ;;  %s3233_s23 = sshll.u32 %s3601_s27, 5  ;;  %s3120_s14 = scalar_lea.sflag [#allocation5], %s3601_s27 }
  0x49   : > { %6910 = vst [vmem:[#allocation15_spill] sm:$0xff] %v3684_v16  ;;  %v3720_v22 = vld [vmem:[%s6780_s1 + $0x78] sm:$0xff]  ;;  %v3728_v23 = vld [vmem:[%s6780_s1 + $0xa0] sm:$0xff]  ;;  %v3738_v25 = vld [vmem:[%s6780_s1 + $0x90] sm:$0xff]  ;;  %s6483_s8 = scalar_lea.vmem [#allocation6], %s3233_s23  ;;  %s3429_s28 = scalar_lea.hbm %s6784_s5, 64 }
  0x4a   : > { %v3733_v24 = vld [vmem:[%s6780_s1 + $0x98] sm:$0xff]  ;;  %v3751_v27 = vld [vmem:[%s6780_s1 + $0xb0] sm:$0xff]  ;;  %v3756_v28 = vld [vmem:[%s6780_s1 + $0xa8] sm:$0xff] }
  0x4b   : > { %v3746_v26 = vld [vmem:[%s6780_s1 + $0xb8] sm:$0xff]  ;;  %6912 = vst [vmem:[#allocation17_spill] sm:$0xff] %v3751_v27  ;;  %v3764_v29 = vld [vmem:[%s6780_s1 + $0xd0] sm:$0xff]  ;;  %v3769_v30 = vld [vmem:[%s6780_s1 + $0xc8] sm:$0xff] }
  0x4c   : > { %6911 = vst [vmem:[#allocation16_spill] sm:$0xff] %v3746_v26  ;;  %v3774_v31 = vld [vmem:[%s6780_s1 + $0xc0] sm:$0xff]  ;;  %v3782_v32 = vld [vmem:[%s6780_s1 + $0xe8] sm:$0xff]  ;;  %v3792_v34 = vld [vmem:[%s6780_s1 + $0xd8] sm:$0xff] }
  0x4d   : > { %450 = vperm.xlu2 %3304, %v3638_v8   ;;  %6913 = vst [vmem:[#allocation18_spill] sm:$0xff] %v3756_v28  ;;  %v3787_v33 = vld [vmem:[%s6780_s1 + $0xe0] sm:$0xff]  ;;  %v3800_v35 = vld [vmem:[%s6780_s1 + $0xf8] sm:$0xff]  ;;  %v3805_v36 = vld [vmem:[%s6780_s1 + $0xf0] sm:$0xff] }
  0x4e   : > { %440 = vperm.xlu1 %3303, %v3643_v9   ;;  %430 = vperm.xlu0 %3302, %v3648_v10   ;;  %6914 = vst [vmem:[#allocation19_spill] sm:$0xff] %v3769_v30  ;;  %v3894_v0 = vld [vmem:[%s3605_s25] sm:$0x7]  ;;  %v3898_v1 = vld [vmem:[%s3605_s25 + $0x4] sm:$0x7] }
  0x4f   : > { %6915 = vst [vmem:[#allocation20_spill] sm:$0xff] %v3792_v34  ;;  %v3901_v2 = vld [vmem:[%s3605_s25 + $0x8] sm:$0x7]  ;;  %v3904_v3 = vperm.slane %v3894_v0, 0 }
  0x55   : > { %465 = vperm.xlu2 %3304, %v3656_v11  }
  0x56   : > { %460 = vperm.xlu1 %3303, %v3661_v12   ;;  %455 = vperm.xlu0 %3302, %v3666_v13  }
  0x5d   : > { %480 = vperm.xlu2 %3304, %v3674_v14  }
  0x5e   : > { %475 = vperm.xlu1 %3303, %v3679_v15   ;;  %470 = vperm.xlu0 %3302, %v3684_v16  }
  0x65   : > { %495 = vperm.xlu2 %3304, %v3692_v17  }
  0x66   : > { %490 = vperm.xlu1 %3303, %v3697_v18   ;;  %485 = vperm.xlu0 %3302, %v3702_v19  }
  0x6d   : > { %510 = vperm.xlu2 %3304, %v3710_v20  }
  0x6e   : > { %505 = vperm.xlu1 %3303, %v3715_v21   ;;  %500 = vperm.xlu0 %3302, %v3720_v22  }
  0x75   : > { %525 = vperm.xlu2 %3304, %v3728_v23  }
  0x76   : > { %520 = vperm.xlu1 %3303, %v3733_v24   ;;  %515 = vperm.xlu0 %3302, %v3738_v25  }
  0x7d   : > { %540 = vperm.xlu2 %3304, %v3746_v26  }
  0x7e   : > { %535 = vperm.xlu1 %3303, %v3751_v27   ;;  %530 = vperm.xlu0 %3302, %v3756_v28  }
  0x85   : > { %555 = vperm.xlu2 %3304, %v3764_v29  }
  0x86   : > { %550 = vperm.xlu1 %3303, %v3769_v30   ;;  %545 = vperm.xlu0 %3302, %v3774_v31  }
  0x8d   : > { %570 = vperm.xlu2 %3304, %v3782_v32  }
  0x8e   : > { %565 = vperm.xlu1 %3303, %v3787_v33   ;;  %560 = vperm.xlu0 %3302, %v3792_v34  }
  0x95   : > { %3305 = vset.pattern.permute.xlu2 %v6791_v37 }
  0x96   : > { %580 = vperm.xlu1 %3303, %v3800_v35   ;;  %575 = vperm.xlu0 %3302, %v3805_v36  }
  0x97   : > { %617 = vperm.xlu2 %3305, %v3630_v7  }
  0x9e   : > { %3306 = vset.pattern.permute.xlu1 %v6791_v37  ;;  %3309 = vset.pattern.permute.xlu0 %v6789_v38 }
  0x9f   : > { %625 = vperm.xlu1 %3306, %v3625_v6   ;;  %629 = vperm.xlu2 %3305, %v3643_v9   ;;  %v3816_v39 = vpop.permute.xlu2 %445  ;;  %v3910_v9 = vld [vmem:[%s3605_s25 + $0xc] sm:$0x7] }
  0xa0   : > { %1063 = vperm.xlu0 %3309, %v3720_v22   ;;  %6916 = vst [vmem:[#allocation21_spill] sm:$0xff] %v3816_v39  ;;  %v3932_v4 = vperm.slane %v3910_v9, 0  ;;  %v3938_v38 = vperm.slane %v3910_v9, 1 }
  0xa7   : > { %633 = vperm.xlu1 %3306, %v3620_v5   ;;  %637 = vperm.xlu2 %3305, %v3638_v8   ;;  %v3821_v40 = vpop.permute.xlu2 %450  ;;  %v3907_v8 = vperm.slane %v3898_v1, 0 }
  0xa8   : > { %1127 = vperm.xlu0 %3309, %v3800_v35   ;;  %6917 = vst [vmem:[#allocation22_spill] sm:$0xff] %v3821_v40 }
  0xaf   : > { %645 = vperm.xlu1 %3306, %v3661_v12   ;;  %649 = vperm.xlu2 %3305, %v3656_v11   ;;  %v3826_v41 = vpop.permute.xlu2 %465 }
  0xb0   : > { %3313 = vset.pattern.permute.xlu0 %v6791_v37  ;;  %6918 = vst [vmem:[#allocation23_spill] sm:$0xff] %v3826_v41 }
  0xb1   : > { %621 = vperm.xlu0 %3313, %v3648_v10   ;;  %v3913_v10 = vperm.slane %v3901_v2, 0 }
  0xb7   : > { %657 = vperm.xlu1 %3306, %v3679_v15   ;;  %661 = vperm.xlu2 %3305, %v3674_v14   ;;  %v3831_v42 = vpop.permute.xlu2 %480 }
  0xb8   : > { %6919 = vst [vmem:[#allocation24_spill] sm:$0xff] %v3831_v42  ;;  %v3833_v43 = vpop.permute.xlu1 %435  ;;  %v3836_v44 = vpop.permute.xlu0 %425 }
  0xb9   : > { %6920 = vst [vmem:[#allocation25_spill] sm:$0xff] %v3833_v43  ;;  %641 = vperm.xlu0 %3313, %v3666_v13   ;;  %v2610_v39 = vmul.f32 %v3932_v4, %v3836_v44 }
  0xbf   : > { %669 = vperm.xlu1 %3306, %v3697_v18   ;;  %673 = vperm.xlu2 %3305, %v3692_v17   ;;  %v3840_v45 = vpop.permute.xlu2 %495 }
  0xc0   : > { %v3842_v46 = vpop.permute.xlu1 %440  ;;  %v3845_v47 = vpop.permute.xlu0 %430 }
  0xc1   : > { %6921 = vst [vmem:[#allocation26_spill] sm:$0xff] %v3842_v46  ;;  %653 = vperm.xlu0 %3313, %v3684_v16  }
  0xc7   : > { %681 = vperm.xlu1 %3306, %v3715_v21   ;;  %685 = vperm.xlu2 %3305, %v3710_v20   ;;  %v3849_v48 = vpop.permute.xlu2 %510  ;;  %v584_v20 = vmul.f32 %v3904_v3, %v3836_v44  ;;  %v1586_v21 = vmul.f32 %v3907_v8, %v3836_v44 }
  0xc8   : > { %v3851_v49 = vpop.permute.xlu1 %460  ;;  %v3854_v50 = vpop.permute.xlu0 %455 }
  0xc9   : > { %6922 = vst [vmem:[#allocation27_spill] sm:$0xff] %v3851_v49  ;;  %665 = vperm.xlu0 %3313, %v3702_v19  }
  0xcf   : > { %693 = vperm.xlu1 %3306, %v3733_v24   ;;  %697 = vperm.xlu2 %3305, %v3728_v23   ;;  %v3858_v51 = vpop.permute.xlu2 %525  ;;  %v3923_v24 = vperm.slane %v3894_v0, 1 }
  0xd0   : > { %v3860_v52 = vpop.permute.xlu1 %475  ;;  %v3863_v53 = vpop.permute.xlu0 %470  ;;  %v604_v12 = vmul.f32 %v3904_v3, %v3858_v51 }
  0xd1   : > { %6923 = vst [vmem:[#allocation28_spill] sm:$0xff] %v3860_v52  ;;  %677 = vperm.xlu0 %3313, %v3720_v22  }
  0xd7   : > { %705 = vperm.xlu1 %3306, %v3751_v27   ;;  %709 = vperm.xlu2 %3305, %v3746_v26   ;;  %v3867_v54 = vpop.permute.xlu2 %540 }
  0xd8   : > { %v3869_v55 = vpop.permute.xlu1 %490  ;;  %v3872_v56 = vpop.permute.xlu0 %485 }
  0xd9   : > { %689 = vperm.xlu0 %3313, %v3738_v25   ;;  %v3926_v25 = vperm.slane %v3898_v1, 1 }
  0xdf   : > { %741 = vperm.xlu1 %3306, %v3800_v35   ;;  %3307 = vset.pattern.permute.xlu2 %v6787_v57  ;;  %v3876_v58 = vpop.permute.xlu2 %555 }
  0xe0   : > { %6924 = vst [vmem:[#allocation29_spill] sm:$0xff] %v3876_v58  ;;  %v3878_v59 = vpop.permute.xlu1 %505  ;;  %870 = vperm.xlu2 %3307, %v3720_v22   ;;  %v3881_v60 = vpop.permute.xlu0 %500 }
  0xe1   : > { %701 = vperm.xlu0 %3313, %v3756_v28   ;;  %v6930_v28 = vmov 1  }
  0xe7   : > { %3308 = vset.pattern.permute.xlu1 %v6787_v57  ;;  %v3885_v61 = vpop.permute.xlu2 %570  ;;  %v2098_v57 = vmul.f32 %v3913_v10, %v3836_v44  ;;  %v6937_v44 = vmov 2  }
  0xe8   : > { %6925 = vst [vmem:[#allocation30_spill] sm:$0xff] %v3885_v61  ;;  %866 = vperm.xlu1 %3308, %v3692_v17   ;;  %v3888_v62 = vpop.permute.xlu1 %520  ;;  %934 = vperm.xlu2 %3307, %v3800_v35   ;;  %v3891_v63 = vpop.permute.xlu0 %515  ;;  %v3929_v35 = vperm.slane %v3901_v2, 1 }
  0xe9   : > { %713 = vperm.xlu0 %3313, %v3774_v31  }
  0xf0   : > { %862 = vperm.xlu1 %3308, %v3697_v18   ;;  %v3920_v22 = vpop.permute.xlu1 %535  ;;  %930 = vperm.xlu2 %3307, %v3805_v36   ;;  %v3940_v46 = vpop.permute.xlu0 %530 }
  0xf1   : > { %v618_v37 = vpop.permute.xlu2 %617  ;;  %737 = vperm.xlu0 %3313, %v3805_v36  }
  0xf2   : > { %v745_v40 = vmul.f32 %v3923_v24, %v618_v37  ;;  %v1619_v49 = vmul.f32 %v3926_v25, %v618_v37  ;;  %v2131_v43 = vmul.f32 %v3929_v35, %v618_v37  ;;  %v2643_v58 = vmul.f32 %v3938_v38, %v618_v37 }
  0xf4   : > { %v3949_v41 = vadd.f32 %v745_v40, %v584_v20  ;;  %v3951_v52 = vadd.f32 %v1619_v49, %v1586_v21  ;;  %v3953_v61 = vadd.f32 %v2131_v43, %v2098_v57  ;;  %v3955_v27 = vadd.f32 %v2643_v58, %v2610_v39 }
  0xf5   : > { %v6935_v43 = vmov 3  }
  0xf6   : > { %6926 = vst [vmem:[#allocation31_spill] sm:$0xff] %v3949_v41  ;;  %v2624_v41 = vmul.f32 %v3932_v4, %v3840_v45 }
  0xf7   : > { %6927 = vst [vmem:[#allocation32_spill] sm:$0xff] %v3951_v52  ;;  %v2112_v52 = vmul.f32 %v3913_v10, %v3840_v45 }
  0xf8   : > { %6928 = vst [vmem:[#allocation33_spill] sm:$0xff] %v3953_v61  ;;  %3310 = vset.pattern.permute.xlu1 %v6930_v28  ;;  %v3958_v26 = vpop.permute.xlu1 %550  ;;  %858 = vperm.xlu2 %3307, %v3702_v19   ;;  %v3961_v7 = vpop.permute.xlu0 %545 }
  0xf9   : > { %6929 = vst [vmem:[#allocation34_spill] sm:$0xff] %v3955_v27  ;;  %733 = vperm.xlu0 %3313, %v3782_v32   ;;  %729 = vperm.xlu1 %3310, %v3787_v33   ;;  %v3965_v37 = vpop.permute.xlu2 %629 }
  0xfa   : > { %6931 = vst [vmem:[#allocation35_spill] sm:$0xff] %v3958_v26  ;;  %v2611_v26 = vmul.f32 %v3932_v4, %v3845_v47 }
  0xfb   : > { %6932 = vst [vmem:[#allocation36_spill] sm:$0xff] %v3961_v7  ;;  %v4085_v7 = vmul.f32 %v3904_v3, %v3863_v53 }
  0xfc   : > { %6933 = vst [vmem:[#allocation37_spill] sm:$0xff] %v3965_v37 }
 0x100   : > { %v3967_v40 = vpop.permute.xlu1 %565  ;;  %3312 = vset.pattern.permute.xlu2 %v6935_v43  ;;  %v3970_v39 = vpop.permute.xlu0 %560 }
 0x101   : > { %6934 = vst [vmem:[#allocation38_spill] sm:$0xff] %v3967_v40  ;;  %717 = vperm.xlu0 %3313, %v3769_v30   ;;  %3311 = vset.pattern.permute.xlu1 %v6937_v44  ;;  %v3974_v49 = vpop.permute.xlu2 %637  ;;  %v601_v40 = vmul.f32 %v3904_v3, %v3849_v48 }
 0x102   : > { %6936 = vst [vmem:[#allocation39_spill] sm:$0xff] %v3970_v39  ;;  %1059 = vperm.xlu2 %3312, %v3692_v17   ;;  %926 = vperm.xlu1 %3311, %v3782_v32   ;;  %v4030_v39 = vmul.f32 %v3904_v3, %v3831_v42 }
 0x103   : > { %6938 = vst [vmem:[#allocation40_spill] sm:$0xff] %v3974_v49 }
 0x104   : > { %6951 = vst [vmem:[#allocation53_spill] sm:$0xff] %v4030_v39 }
 0x108   : > { %v3978_v57 = vpop.permute.xlu1 %580  ;;  %v3980_v58 = vpop.permute.xlu0 %575 }
 0x109   : > { %6939 = vst [vmem:[#allocation41_spill] sm:$0xff] %v3978_v57  ;;  %3322 = vset.pattern.permute.xlu0 %v6937_v44  ;;  %v3983_v20 = vpop.permute.xlu2 %649  ;;  %v2630_v57 = vmul.f32 %v3932_v4, %v3858_v51 }
 0x10a   : > { %6940 = vst [vmem:[#allocation42_spill] sm:$0xff] %v3980_v58  ;;  %3315 = vset.pattern.permute.xlu2 %v6937_v44  ;;  %922 = vperm.xlu0 %3322, %v3787_v33   ;;  %v2627_v58 = vmul.f32 %v3932_v4, %v3849_v48 }
 0x10b   : > { %6941 = vst [vmem:[#allocation43_spill] sm:$0xff] %v3983_v20  ;;  %3314 = vset.pattern.permute.xlu1 %v6930_v28  ;;  %854 = vperm.xlu2 %3315, %v3674_v14   ;;  %v4024_v20 = vmul.f32 %v3904_v3, %v3840_v45 }
 0x10c   : > { %725 = vperm.xlu1 %3314, %v3792_v34  }
 0x10d   : > { %6950 = vst [vmem:[#allocation52_spill] sm:$0xff] %v4024_v20 }
 0x111   : > { %v3990_v17 = vpop.permute.xlu1 %625  ;;  %v3992_v21 = vpop.permute.xlu2 %661 }
 0x112   : > { %6942 = vst [vmem:[#allocation44_spill] sm:$0xff] %v3990_v17  ;;  %v3994_v37 = vpop.permute.xlu0 %1063  ;;  %918 = vperm.xlu0 %3322, %v3792_v34  }
 0x113   : > { %6943 = vst [vmem:[#allocation45_spill] sm:$0xff] %v3992_v21  ;;  %3317 = vset.pattern.permute.xlu2 %v6935_v43 }
 0x114   : > { %6944 = vst [vmem:[#allocation46_spill] sm:$0xff] %v3994_v37  ;;  %3316 = vset.pattern.permute.xlu1 %v6935_v43  ;;  %1123 = vperm.xlu2 %3317, %v3805_v36   ;;  %v2616_v37 = vmul.f32 %v3932_v4, %v3854_v50 }
 0x115   : > { %1055 = vperm.xlu1 %3316, %v3697_v18  }
 0x119   : > { %v4001_v49 = vpop.permute.xlu1 %633  ;;  %v4003_v27 = vpop.permute.xlu2 %673 }
 0x11a   : > { %6945 = vst [vmem:[#allocation47_spill] sm:$0xff] %v4001_v49  ;;  %v4005_v61 = vpop.permute.xlu0 %1127  ;;  %v2145_v17 = vmul.f32 %v3929_v35, %v4003_v27  ;;  %v2657_v36 = vmul.f32 %v3938_v38, %v4003_v27  ;;  %842 = vperm.xlu0 %3322, %v3656_v11  }
 0x11b   : > { %6946 = vst [vmem:[#allocation48_spill] sm:$0xff] %v4003_v27 }
 0x11c   : > { %6947 = vst [vmem:[#allocation49_spill] sm:$0xff] %v4005_v61  ;;  %v4016_v18 = vadd.f32 %v2145_v17, %v2112_v52  ;;  %v4018_v49 = vadd.f32 %v2657_v36, %v2624_v41  ;;  %3319 = vset.pattern.permute.xlu2 %v6937_v44  ;;  %v4034_v41 = vmul.f32 %v3907_v8, %v3831_v42 }
 0x11d   : > { %3318 = vset.pattern.permute.xlu1 %v6930_v28  ;;  %850 = vperm.xlu2 %3319, %v3679_v15   ;;  %v4038_v52 = vmul.f32 %v3907_v8, %v3840_v45  ;;  %v585_v28 = vmul.f32 %v3904_v3, %v3845_v47  ;;  %v1587_v17 = vmul.f32 %v3907_v8, %v3845_v47 }
 0x11e   : > { %6948 = vst [vmem:[#allocation50_spill] sm:$0xff] %v4016_v18  ;;  %721 = vperm.xlu1 %3318, %v3764_v29   ;;  %v2099_v36 = vmul.f32 %v3913_v10, %v3845_v47  ;;  %v2115_v45 = vmul.f32 %v3913_v10, %v3849_v48  ;;  %v590_v42 = vmul.f32 %v3904_v3, %v3854_v50 }
 0x11f   : > { %6949 = vst [vmem:[#allocation51_spill] sm:$0xff] %v4018_v49  ;;  %v1592_v47 = vmul.f32 %v3907_v8, %v3854_v50  ;;  %v2104_v49 = vmul.f32 %v3913_v10, %v3854_v50 }
 0x120   : > { %6952 = vst [vmem:[#allocation54_spill] sm:$0xff] %v4034_v41  ;;  %v1603_v41 = vmul.f32 %v3907_v8, %v3849_v48 }
 0x121   : > { %6953 = vst [vmem:[#allocation55_spill] sm:$0xff] %v4038_v52  ;;  %v4054_v39 = vpop.permute.xlu1 %645  ;;  %v686_v18 = vpop.permute.xlu2 %685 }
 0x122   : > { %6954 = vst [vmem:[#allocation56_spill] sm:$0xff] %v4054_v39  ;;  %v762_v11 = vmul.f32 %v3923_v24, %v686_v18  ;;  %v1636_v52 = vmul.f32 %v3926_v25, %v686_v18  ;;  %v2148_v20 = vmul.f32 %v3929_v35, %v686_v18  ;;  %v2660_v39 = vmul.f32 %v3938_v38, %v686_v18 }
 0x123   : > { %v622_v61 = vpop.permute.xlu0 %621  ;;  %906 = vperm.xlu0 %3322, %v3774_v31   ;;  %v1606_v18 = vmul.f32 %v3907_v8, %v3858_v51  ;;  %v2118_v31 = vmul.f32 %v3913_v10, %v3858_v51 }
 0x124   : > { %v746_v48 = vmul.f32 %v3923_v24, %v622_v61  ;;  %v1620_v27 = vmul.f32 %v3926_v25, %v622_v61  ;;  %v2132_v21 = vmul.f32 %v3929_v35, %v622_v61  ;;  %v2644_v34 = vmul.f32 %v3938_v38, %v622_v61 }
 0x125   : > { %3321 = vset.pattern.permute.xlu2 %v6935_v43  ;;  %v4093_v50 = vadd.f32 %v762_v11, %v601_v40  ;;  %v4095_v30 = vadd.f32 %v1636_v52, %v1603_v41  ;;  %v4113_v11 = vmul.f32 %v3913_v10, %v3863_v53  ;;  %v4117_v40 = vmul.f32 %v3932_v4, %v3863_v53 }
 0x126   : > { %v4087_v61 = vadd.f32 %v746_v48, %v585_v28  ;;  %v4089_v6 = vadd.f32 %v1620_v27, %v1587_v17  ;;  %3320 = vset.pattern.permute.xlu1 %v6935_v43  ;;  %v4097_v15 = vadd.f32 %v2132_v21, %v2099_v36  ;;  %1119 = vperm.xlu2 %3321, %v3782_v32  }
 0x127   : > { %6957 = vst [vmem:[#allocation59_spill] sm:$0xff] %v4093_v50  ;;  %1051 = vperm.xlu1 %3320, %v3702_v19   ;;  %v4101_v51 = vadd.f32 %v2644_v34, %v2611_v26  ;;  %v4103_v28 = vadd.f32 %v2148_v20, %v2115_v45  ;;  %v4105_v27 = vadd.f32 %v2660_v39, %v2627_v58 }
 0x128   : > { %6955 = vst [vmem:[#allocation57_spill] sm:$0xff] %v4087_v61  ;;  %v4109_v17 = vmul.f32 %v3907_v8, %v3863_v53  ;;  %v607_v19 = vmul.f32 %v3904_v3, %v3867_v54  ;;  %v1609_v32 = vmul.f32 %v3907_v8, %v3867_v54  ;;  %v2121_v34 = vmul.f32 %v3913_v10, %v3867_v54 }
 0x129   : > { %6956 = vst [vmem:[#allocation58_spill] sm:$0xff] %v4089_v6  ;;  %v4121_v26 = vpop.permute.xlu1 %657  ;;  %v2633_v39 = vmul.f32 %v3932_v4, %v3867_v54  ;;  %v597_v58 = vmul.f32 %v3904_v3, %v3869_v55  ;;  %v698_v20 = vpop.permute.xlu2 %697 }
 0x12a   : > { %6958 = vst [vmem:[#allocation60_spill] sm:$0xff] %v4095_v30  ;;  %v765_v53 = vmul.f32 %v3923_v24, %v698_v20  ;;  %v1639_v21 = vmul.f32 %v3926_v25, %v698_v20  ;;  %v2151_v41 = vmul.f32 %v3929_v35, %v698_v20  ;;  %v2663_v52 = vmul.f32 %v3938_v38, %v698_v20 }
 0x12b   : > { %6959 = vst [vmem:[#allocation61_spill] sm:$0xff] %v4097_v15  ;;  %v642_v36 = vpop.permute.xlu0 %641  ;;  %834 = vperm.xlu0 %3322, %v3666_v13   ;;  %v2111_v30 = vmul.f32 %v3913_v10, %v3869_v55  ;;  %v2623_v13 = vmul.f32 %v3932_v4, %v3869_v55 }
 0x12c   : > { %6960 = vst [vmem:[#allocation62_spill] sm:$0xff] %v4101_v51  ;;  %v751_v45 = vmul.f32 %v3923_v24, %v642_v36  ;;  %v1625_v48 = vmul.f32 %v3926_v25, %v642_v36  ;;  %v2137_v54 = vmul.f32 %v3929_v35, %v642_v36  ;;  %v4144_v50 = vadd.f32 %v765_v53, %v604_v12 }
 0x12d   : > { %6961 = vst [vmem:[#allocation63_spill] sm:$0xff] %v4103_v28  ;;  %v1599_v28 = vmul.f32 %v3907_v8, %v3869_v55  ;;  %v4146_v20 = vadd.f32 %v1639_v21, %v1606_v18  ;;  %v4152_v51 = vmul.f32 %v3904_v3, %v3872_v56  ;;  %v4164_v12 = vadd.f32 %v2663_v52, %v2630_v57 }
 0x12e   : > { %6962 = vst [vmem:[#allocation64_spill] sm:$0xff] %v4105_v27  ;;  %v2649_v27 = vmul.f32 %v3938_v38, %v642_v36  ;;  %v4154_v15 = vadd.f32 %v751_v45, %v590_v42  ;;  %v4156_v36 = vadd.f32 %v1625_v48, %v1592_v47  ;;  %v4158_v6 = vadd.f32 %v2137_v54, %v2104_v49 }
 0x12f   : > { %6963 = vst [vmem:[#allocation65_spill] sm:$0xff] %v4121_v26  ;;  %v4162_v26 = vadd.f32 %v2151_v41, %v2118_v31  ;;  %v4168_v18 = vmul.f32 %v3907_v8, %v3872_v56  ;;  %v4172_v55 = vmul.f32 %v3913_v10, %v3872_v56  ;;  %v4176_v42 = vmul.f32 %v3932_v4, %v3872_v56 }
 0x130   : > { %6964 = vst [vmem:[#allocation66_spill] sm:$0xff] %v4144_v50  ;;  %v4160_v61 = vadd.f32 %v2649_v27, %v2616_v37  ;;  %3324 = vset.pattern.permute.xlu2 %v6937_v44  ;;  %3323 = vset.pattern.permute.xlu1 %v6937_v44  ;;  %v4182_v37 = vmul.f32 %v3904_v3, %v3878_v59 }
 0x131   : > { %6965 = vst [vmem:[#allocation67_spill] sm:$0xff] %v4146_v20  ;;  %v4186_v49 = vmul.f32 %v3907_v8, %v3878_v59  ;;  %v4190_v57 = vmul.f32 %v3913_v10, %v3878_v59  ;;  %914 = vperm.xlu2 %3324, %v3764_v29   ;;  %846 = vperm.xlu1 %3323, %v3684_v16   ;;  %v670_v56 = vpop.permute.xlu1 %669  ;;  %v710_v21 = vpop.permute.xlu2 %709 }
 0x132   : > { %6966 = vst [vmem:[#allocation68_spill] sm:$0xff] %v4154_v15  ;;  %v758_v47 = vmul.f32 %v3923_v24, %v670_v56  ;;  %v1632_v31 = vmul.f32 %v3926_v25, %v670_v56  ;;  %v2144_v27 = vmul.f32 %v3929_v35, %v670_v56  ;;  %v2656_v53 = vmul.f32 %v3938_v38, %v670_v56 }
 0x133   : > { %6967 = vst [vmem:[#allocation69_spill] sm:$0xff] %v4156_v36  ;;  %v768_v41 = vmul.f32 %v3923_v24, %v710_v21  ;;  %v1642_v52 = vmul.f32 %v3926_v25, %v710_v21  ;;  %v2154_v45 = vmul.f32 %v3929_v35, %v710_v21  ;;  %v2666_v48 = vmul.f32 %v3938_v38, %v710_v21  ;;  %v654_v54 = vpop.permute.xlu0 %653 }
 0x134   : > { %6968 = vst [vmem:[#allocation70_spill] sm:$0xff] %v4158_v6  ;;  %826 = vperm.xlu0 %3322, %v3620_v5   ;;  %v2140_v20 = vmul.f32 %v3929_v35, %v654_v54  ;;  %v2652_v56 = vmul.f32 %v3938_v38, %v654_v54  ;;  %v4207_v50 = vadd.f32 %v758_v47, %v597_v58 }
 0x135   : > { %6969 = vst [vmem:[#allocation71_spill] sm:$0xff] %v4160_v61  ;;  %v4209_v61 = vadd.f32 %v1632_v31, %v1599_v28  ;;  %v4211_v6 = vadd.f32 %v768_v41, %v607_v19  ;;  %v4213_v36 = vadd.f32 %v1642_v52, %v1609_v32  ;;  %v4221_v15 = vadd.f32 %v2144_v27, %v2111_v30 }
 0x136   : > { %6970 = vst [vmem:[#allocation72_spill] sm:$0xff] %v4162_v26  ;;  %v1628_v26 = vmul.f32 %v3926_v25, %v654_v54  ;;  %v4223_v16 = vadd.f32 %v2656_v53, %v2623_v13  ;;  %v4229_v28 = vadd.f32 %v2652_v56, %v4117_v40  ;;  %v4231_v19 = vadd.f32 %v2154_v45, %v2121_v34 }
 0x137   : > { %6971 = vst [vmem:[#allocation73_spill] sm:$0xff] %v4164_v12  ;;  %v754_v12 = vmul.f32 %v3923_v24, %v654_v54  ;;  %v4226_v54 = vadd.f32 %v2140_v20, %v4113_v11  ;;  %v4233_v32 = vadd.f32 %v2666_v48, %v2633_v39  ;;  %v4243_v30 = vmul.f32 %v3907_v8, %v3881_v60 }
 0x138   : > { %6972 = vst [vmem:[#allocation74_spill] sm:$0xff] %v4207_v50  ;;  %v4219_v5 = vadd.f32 %v1628_v26, %v4109_v17  ;;  %v4239_v17 = vmul.f32 %v3904_v3, %v3881_v60  ;;  %v4247_v11 = vmul.f32 %v3913_v10, %v3881_v60  ;;  %v4251_v40 = vmul.f32 %v3932_v4, %v3881_v60 }
 0x139   : > { %6973 = vst [vmem:[#allocation75_spill] sm:$0xff] %v4209_v61  ;;  %v4216_v21 = vadd.f32 %v754_v12, %v4085_v7  ;;  %v2626_v7 = vmul.f32 %v3932_v4, %v3878_v59  ;;  %v4255_v26 = vmul.f32 %v3904_v3, %v3888_v62  ;;  %v4259_v59 = vmul.f32 %v3907_v8, %v3888_v62  ;;  %v682_v34 = vpop.permute.xlu1 %681 }
 0x13a   : > { %6974 = vst [vmem:[#allocation76_spill] sm:$0xff] %v4211_v6  ;;  %3326 = vset.pattern.permute.xlu2 %v6935_v43  ;;  %3325 = vset.pattern.permute.xlu1 %v6935_v43  ;;  %v4265_v39 = vmul.f32 %v3913_v10, %v3888_v62  ;;  %v761_v60 = vmul.f32 %v3923_v24, %v682_v34  ;;  %v871_v31 = vpop.permute.xlu2 %870 }
 0x13b   : > { %6975 = vst [vmem:[#allocation77_spill] sm:$0xff] %v4213_v36  ;;  %1115 = vperm.xlu2 %3326, %v3787_v33   ;;  %1047 = vperm.xlu1 %3325, %v3674_v14   ;;  %v1635_v58 = vmul.f32 %v3926_v25, %v682_v34  ;;  %v2629_v20 = vmul.f32 %v3932_v4, %v3888_v62  ;;  %v666_v27 = vpop.permute.xlu0 %665 }
 0x13c   : > { %6976 = vst [vmem:[#allocation78_spill] sm:$0xff] %v4216_v21  ;;  %v4275_v13 = vmul.f32 %v3904_v3, %v3891_v63  ;;  %v2147_v12 = vmul.f32 %v3929_v35, %v682_v34  ;;  %v2659_v47 = vmul.f32 %v3938_v38, %v682_v34  ;;  %v4281_v14 = vmul.f32 %v3907_v8, %v3891_v63 }
 0x13d   : > { %6977 = vst [vmem:[#allocation79_spill] sm:$0xff] %v4219_v5  ;;  %v4285_v33 = vmul.f32 %v3913_v10, %v3891_v63  ;;  %890 = vperm.xlu0 %3322, %v3728_v23   ;;  %v757_v62 = vmul.f32 %v3923_v24, %v666_v27  ;;  %v1631_v53 = vmul.f32 %v3926_v25, %v666_v27 }
 0x13e   : > { %6978 = vst [vmem:[#allocation80_spill] sm:$0xff] %v4226_v54  ;;  %v4292_v41 = vmul.f32 %v3932_v4, %v3891_v63  ;;  %v4296_v52 = vmul.f32 %v3904_v3, %v3920_v22  ;;  %v2143_v45 = vmul.f32 %v3929_v35, %v666_v27  ;;  %v2655_v48 = vmul.f32 %v3938_v38, %v666_v27 }
 0x13f   : > { %6979 = vst [vmem:[#allocation81_spill] sm:$0xff] %v4229_v28  ;;  %v4301_v56 = vadd.f32 %v757_v62, %v4152_v51  ;;  %v4304_v23 = vadd.f32 %v1631_v53, %v4168_v18  ;;  %v4307_v34 = vadd.f32 %v761_v60, %v4182_v37  ;;  %v4310_v63 = vadd.f32 %v1635_v58, %v4186_v49 }
 0x140   : > { %6980 = vst [vmem:[#allocation82_spill] sm:$0xff] %v4231_v19  ;;  %v4313_v36 = vadd.f32 %v2143_v45, %v4172_v55  ;;  %v4316_v6 = vadd.f32 %v2655_v48, %v4176_v42  ;;  %v4319_v27 = vadd.f32 %v2147_v12, %v4190_v57  ;;  %v4321_v51 = vadd.f32 %v2659_v47, %v2626_v7  ;;  %v6988_v47 = vld [vmem:[#allocation19_spill] sm:$0xff] }
 0x141   : > { %6981 = vst [vmem:[#allocation83_spill] sm:$0xff] %v4233_v32  ;;  %v4325_v18 = vmul.f32 %v3907_v8, %v3920_v22  ;;  %v4329_v37 = vmul.f32 %v3913_v10, %v3920_v22  ;;  %v4332_v49 = vperm.slane %v3894_v0, 2  ;;  %v4335_v55 = vperm.slane %v3898_v1, 2  ;;  %v694_v58 = vpop.permute.xlu1 %693  ;;  %v6987_v1 = vld [vmem:[#allocation14_spill] sm:$0xff] }
 0x142   : > { %6982 = vst [vmem:[#allocation84_spill] sm:$0xff] %v4301_v56  ;;  %v4339_v42 = vmul.f32 %v3932_v4, %v3920_v22  ;;  %v4343_v57 = vmul.f32 %v3904_v3, %v3940_v46  ;;  %v4346_v7 = vperm.slane %v3901_v2, 2  ;;  %v4349_v60 = vperm.slane %v3910_v9, 2  ;;  %v4370_v45 = vpop.permute.xlu2 %934 }
 0x143   : > { %6983 = vst [vmem:[#allocation85_spill] sm:$0xff] %v4307_v34  ;;  %v4353_v0 = vmul.f32 %v3907_v8, %v3940_v46  ;;  %1043 = vperm.xlu2 %3326, %v6987_v1   ;;  %3327 = vset.pattern.permute.xlu1 %v6937_v44  ;;  %v764_v22 = vmul.f32 %v3923_v24, %v694_v58  ;;  %v678_v48 = vpop.permute.xlu0 %677  ;;  %v6989_v1 = vld [vmem:[#allocation10_spill] sm:$0xff] }
 0x144   : > { %6984 = vst [vmem:[#allocation86_spill] sm:$0xff] %v4310_v63  ;;  %v1638_v12 = vmul.f32 %v3926_v25, %v694_v58  ;;  %v4361_v2 = vmul.f32 %v3913_v10, %v3940_v46  ;;  %v4365_v9 = vmul.f32 %v3932_v4, %v3940_v46  ;;  %910 = vperm.xlu1 %3327, %v6988_v47  }
 0x145   : > { %6985 = vst [vmem:[#allocation87_spill] sm:$0xff] %v4319_v27  ;;  %v2150_v62 = vmul.f32 %v3929_v35, %v694_v58  ;;  %v2662_v53 = vmul.f32 %v3938_v38, %v694_v58  ;;  %818 = vperm.xlu0 %3322, %v6989_v1   ;;  %v760_v63 = vmul.f32 %v3923_v24, %v678_v48 }
 0x146   : > { %6986 = vst [vmem:[#allocation88_spill] sm:$0xff] %v4321_v51  ;;  %v1634_v34 = vmul.f32 %v3926_v25, %v678_v48  ;;  %v953_v51 = vmul.f32 %v4332_v49, %v871_v31  ;;  %v1699_v46 = vmul.f32 %v4335_v55, %v871_v31  ;;  %v2211_v27 = vmul.f32 %v4346_v7, %v871_v31 }
 0x147   : > { %v2723_v32 = vmul.f32 %v4349_v60, %v871_v31  ;;  %v2146_v19 = vmul.f32 %v3929_v35, %v678_v48  ;;  %v2658_v58 = vmul.f32 %v3938_v38, %v678_v48  ;;  %v792_v5 = vadd.f32 %v760_v63, %v4239_v17  ;;  %v6994_v48 = vld [vmem:[#allocation36_spill] sm:$0xff] }
 0x148   : > { %v1666_v1 = vadd.f32 %v1634_v34, %v4243_v30  ;;  %v4384_v21 = vadd.f32 %v764_v22, %v4255_v26  ;;  %v4387_v28 = vadd.f32 %v1638_v12, %v4259_v59  ;;  %v4392_v31 = vadd.f32 %v2150_v62, %v4265_v39  ;;  %v6995_v34 = vld [vmem:[#allocation41_spill] sm:$0xff] }
 0x149   : > { %v2178_v54 = vadd.f32 %v2146_v19, %v4247_v11  ;;  %v2690_v56 = vadd.f32 %v2658_v58, %v4251_v40  ;;  %v4394_v61 = vadd.f32 %v2662_v53, %v2629_v20  ;;  %v4398_v17 = vmul.f32 %v3904_v3, %v6994_v48  ;;  %v706_v40 = vpop.permute.xlu1 %705  ;;  %v6996_v12 = vld [vmem:[#allocation13_spill] sm:$0xff] }
 0x14a   : > { %6990 = vst [vmem:[#allocation14_spill] sm:$0xff] %v4384_v21  ;;  %v4402_v30 = vmul.f32 %v3907_v8, %v6994_v48  ;;  %v985_v26 = vadd.f32 %v953_v51, %v792_v5  ;;  %v1731_v59 = vadd.f32 %v1699_v46, %v1666_v1  ;;  %v4406_v19 = vmul.f32 %v3913_v10, %v6994_v48  ;;  %v4421_v62 = vpop.permute.xlu2 %930 }
 0x14b   : > { %6991 = vst [vmem:[#allocation19_spill] sm:$0xff] %v4387_v28  ;;  %v4410_v11 = vmul.f32 %v3932_v4, %v6994_v48  ;;  %v2243_v39 = vadd.f32 %v2211_v27, %v2178_v54  ;;  %v2755_v20 = vadd.f32 %v2723_v32, %v2690_v56  ;;  %v615_v63 = vmul.f32 %v3904_v3, %v6995_v34  ;;  %v690_v54 = vpop.permute.xlu0 %689  ;;  %v6997_v32 = vld [vmem:[#allocation46_spill] sm:$0xff]  ;;  %v6999_v48 = vld [vmem:[#allocation11_spill] sm:$0xff] }
 0x14c   : > { %6992 = vst [vmem:[#allocation10_spill] sm:$0xff] %v4392_v31  ;;  %v1617_v22 = vmul.f32 %v3907_v8, %v6995_v34  ;;  %3329 = vset.pattern.permute.xlu2 %v6937_v44  ;;  %v767_v5 = vmul.f32 %v3923_v24, %v706_v40  ;;  %v1641_v51 = vmul.f32 %v3926_v25, %v706_v40 }
 0x14d   : > { %6993 = vst [vmem:[#allocation89_spill] sm:$0xff] %v4394_v61  ;;  %838 = vperm.xlu2 %3329, %v6996_v12   ;;  %3328 = vset.pattern.permute.xlu1 %v6935_v43  ;;  %v1145_v56 = vadd.f32 %v6997_v32, %v985_v26  ;;  %v1763_v27 = vadd.f32 %v1731_v59, %v6997_v32  ;;  %v7000_v12 = vld [vmem:[#allocation20_spill] sm:$0xff] }
 0x14e   : > { %v4426_v53 = vadd.f32 %v2243_v39, %v6997_v32  ;;  %v2129_v46 = vmul.f32 %v3913_v10, %v6995_v34  ;;  %v2153_v58 = vmul.f32 %v3929_v35, %v706_v40  ;;  %v2665_v1 = vmul.f32 %v3938_v38, %v706_v40  ;;  %810 = vperm.xlu0 %3322, %v6999_v48   ;;  %v7002_v40 = vld [vmem:[#allocation45_spill] sm:$0xff] }
 0x14f   : > { %1111 = vperm.xlu1 %3328, %v7000_v12   ;;  %v2641_v28 = vmul.f32 %v3932_v4, %v6995_v34  ;;  %v763_v26 = vmul.f32 %v3923_v24, %v690_v54  ;;  %v1637_v59 = vmul.f32 %v3926_v25, %v690_v54  ;;  %v2149_v39 = vmul.f32 %v3929_v35, %v690_v54 }
 0x150   : > { %6998 = vst [vmem:[#allocation36_spill] sm:$0xff] %v4426_v53  ;;  %v2661_v21 = vmul.f32 %v3938_v38, %v690_v54  ;;  %v1177_v53 = vmax.f32 %v1145_v56, 0.0  ;;  %v1795_v61 = vmax.f32 %v1763_v27, 0.0  ;;  %v4441_v31 = vadd.f32 %v767_v5, %v4296_v52 }
 0x151   : > { %v4445_v48 = vmul.f32 %v3923_v24, %v7002_v40  ;;  %v4448_v12 = vadd.f32 %v1641_v51, %v4325_v18  ;;  %v4451_v34 = vadd.f32 %v2755_v20, %v6997_v32  ;;  %v4454_v50 = vadd.f32 %v763_v26, %v4275_v13  ;;  %v742_v13 = vpop.permute.xlu1 %741 }
 0x152   : > { %7001 = vst [vmem:[#allocation41_spill] sm:$0xff] %v4441_v31  ;;  %1294 = vmatpush.msra.mxu0 %v1177_v53  ;;  %1812 = vmatpush.msra.mxu2 %v1795_v61  ;;  %v4457_v54 = vadd.f32 %v1637_v59, %v4281_v14  ;;  %v4460_v52 = vadd.f32 %v2153_v58, %v4329_v37  ;;  %v7011_v37 = vld [vmem:[#allocation48_spill] sm:$0xff]  ;;  %v4489_v53 = vpop.permute.xlu2 %858 }
 0x153   : > { %7003 = vst [vmem:[#allocation13_spill] sm:$0xff] %v4448_v12  ;;  %v4463_v5 = vadd.f32 %v2665_v1, %v4339_v42  ;;  %v4467_v18 = vmul.f32 %v3926_v25, %v7002_v40  ;;  %v4471_v20 = vmul.f32 %v3929_v35, %v7002_v40  ;;  %v4474_v61 = vadd.f32 %v2149_v39, %v4285_v33  ;;  %v702_v59 = vpop.permute.xlu0 %701  ;;  %v7012_v39 = vld [vmem:[#allocation15_spill] sm:$0xff] }
 0x154   : > { %7004 = vst [vmem:[#allocation46_spill] sm:$0xff] %v4451_v34  ;;  %v4477_v14 = vadd.f32 %v2661_v21, %v4292_v41  ;;  %v759_v51 = vmul.f32 %v3923_v24, %v7011_v37  ;;  %v1633_v42 = vmul.f32 %v3926_v25, %v7011_v37  ;;  %v776_v32 = vmul.f32 %v3923_v24, %v742_v13 }
 0x155   : > { %7005 = vst [vmem:[#allocation11_spill] sm:$0xff] %v4454_v50  ;;  %v1650_v56 = vmul.f32 %v3926_v25, %v742_v13  ;;  %v2227_v27 = vmul.f32 %v4346_v7, %v4370_v45  ;;  %3330 = vset.pattern.permute.xlu2 %v6935_v43  ;;  %v2162_v33 = vmul.f32 %v3929_v35, %v742_v13 }
 0x156   : > { %7006 = vst [vmem:[#allocation20_spill] sm:$0xff] %v4457_v54  ;;  %v969_v21 = vmul.f32 %v4332_v49, %v4370_v45  ;;  %v1715_v41 = vmul.f32 %v4335_v55, %v4370_v45  ;;  %v2674_v58 = vmul.f32 %v3938_v38, %v742_v13  ;;  %1107 = vperm.xlu2 %3330, %v3764_v29  }
 0x157   : > { %7007 = vst [vmem:[#allocation45_spill] sm:$0xff] %v4460_v52  ;;  %3343 = vset.pattern.permute.xlu0 %v6935_v43  ;;  %v1696_v1 = vmul.f32 %v4335_v55, %v4489_v53  ;;  %v2208_v26 = vmul.f32 %v4346_v7, %v4489_v53  ;;  %1039 = vperm.xlu1 %3328, %v7012_v39  }
 0x158   : > { %7008 = vst [vmem:[#allocation90_spill] sm:$0xff] %v4463_v5  ;;  %v2720_v37 = vmul.f32 %v4349_v60, %v4489_v53  ;;  %1103 = vperm.xlu0 %3343, %v6988_v47   ;;  %v766_v13 = vmul.f32 %v3923_v24, %v702_v59  ;;  %v1640_v29 = vmul.f32 %v3926_v25, %v702_v59 }
 0x159   : > { %7009 = vst [vmem:[#allocation91_spill] sm:$0xff] %v4474_v61  ;;  %v2152_v54 = vmul.f32 %v3929_v35, %v702_v59  ;;  %v2664_v50 = vmul.f32 %v3938_v38, %v702_v59  ;;  %v808_v34 = vadd.f32 %v776_v32, %v615_v63  ;;  %v2739_v61 = vmul.f32 %v4349_v60, %v4370_v45  ;;  %v7021_v59 = vld [vmem:[#allocation16_spill] sm:$0xff] }
 0x15a   : > { %7010 = vst [vmem:[#allocation92_spill] sm:$0xff] %v4477_v14  ;;  %v1682_v14 = vadd.f32 %v1650_v56, %v1617_v22  ;;  %v4513_v39 = vadd.f32 %v1696_v1, %v4304_v23  ;;  %v4516_v12 = vadd.f32 %v766_v13, %v4343_v57  ;;  %v4519_v47 = vadd.f32 %v1640_v29, %v4353_v0  ;;  %v867_v57 = vpop.permute.xlu1 %866  ;;  %v7017_v56 = vld [vmem:[#allocation49_spill] sm:$0xff]  ;;  %v7022_v29 = vld [vmem:[#allocation50_spill] sm:$0xff] }
 0x15b   : > { %v1001_v31 = vadd.f32 %v969_v21, %v808_v34  ;;  %v4522_v52 = vadd.f32 %v2208_v26, %v4313_v36  ;;  %v4525_v63 = vadd.f32 %v2720_v37, %v4316_v6  ;;  %v2194_v22 = vadd.f32 %v2162_v33, %v2129_v46  ;;  %v7019_v36 = vld [vmem:[#allocation55_spill] sm:$0xff] }
 0x15c   : > { %7013 = vst [vmem:[#allocation48_spill] sm:$0xff] %v4516_v12  ;;  %v1747_v5 = vadd.f32 %v1715_v41, %v1682_v14  ;;  %v2706_v32 = vadd.f32 %v2674_v58, %v2641_v28  ;;  %v4528_v45 = vadd.f32 %v2152_v54, %v4361_v2  ;;  %v4531_v23 = vadd.f32 %v2664_v50, %v4365_v9  ;;  %v7018_v14 = vld [vmem:[#allocation52_spill] sm:$0xff]  ;;  %v714_v50 = vpop.permute.xlu0 %713  ;;  %v1060_v26 = vpop.permute.xlu2 %1059 }
 0x15d   : > { %7014 = vst [vmem:[#allocation15_spill] sm:$0xff] %v4519_v47  ;;  %v1161_v0 = vadd.f32 %v7017_v56, %v1001_v31  ;;  %v791_v21 = vadd.f32 %v759_v51, %v7018_v14  ;;  %v1665_v41 = vadd.f32 %v1633_v42, %v7019_v36  ;;  %v952_v6 = vmul.f32 %v4332_v49, %v867_v57  ;;  %v7020_v54 = vld [vmem:[#allocation12_spill] sm:$0xff] }
 0x15e   : > { %7015 = vst [vmem:[#allocation93_spill] sm:$0xff] %v4528_v45  ;;  %v1779_v34 = vadd.f32 %v1747_v5, %v7017_v56  ;;  %v1698_v46 = vmul.f32 %v4335_v55, %v867_v57  ;;  %v2210_v28 = vmul.f32 %v4346_v7, %v867_v57  ;;  %v2722_v2 = vmul.f32 %v4349_v60, %v867_v57 }
 0x15f   : > { %7016 = vst [vmem:[#allocation94_spill] sm:$0xff] %v4531_v23  ;;  %1035 = vperm.xlu2 %3330, %v7020_v54   ;;  %v1193_v9 = vmax.f32 %v1161_v0, 0.0  ;;  %v2259_v31 = vadd.f32 %v2227_v27, %v2194_v22  ;;  %v2771_v58 = vadd.f32 %v2739_v61, %v2706_v32  ;;  %3331 = vset.pattern.permute.xlu1 %v6937_v44  ;;  %v7023_v61 = vld [vmem:[#allocation18_spill] sm:$0xff]  ;;  %v7026_v32 = vld [vmem:[#allocation51_spill] sm:$0xff] }
 0x160   : > { %v1811_v33 = vmax.f32 %v1779_v34, 0.0  ;;  %v769_v5 = vmul.f32 %v3923_v24, %v714_v50  ;;  %v1643_v51 = vmul.f32 %v3926_v25, %v714_v50  ;;  %v2155_v42 = vmul.f32 %v3929_v35, %v714_v50  ;;  %902 = vperm.xlu1 %3331, %v7021_v59   ;;  %1087 = vperm.xlu0 %3343, %v7023_v61   ;;  %v4605_v61 = vld [vmem:[%s6780_s1 + $0x28] sm:$0xff] }
 0x161   : > { %v2667_v1 = vmul.f32 %v3938_v38, %v714_v50  ;;  %1371 = vmatpush.msra.mxu1 %v1193_v9  ;;  %v984_v37 = vadd.f32 %v952_v6, %v791_v21  ;;  %v1730_v13 = vadd.f32 %v1698_v46, %v1665_v41  ;;  %v2242_v57 = vadd.f32 %v2210_v28, %v7022_v29  ;;  %v7031_v50 = vld [vmem:[#allocation24_spill] sm:$0xff] }
 0x162   : > { %1889 = vmatpush.msra.mxu3 %v1811_v33  ;;  %v4551_v27 = vadd.f32 %v769_v5, %v4398_v17  ;;  %v4554_v22 = vadd.f32 %v1643_v51, %v4402_v30  ;;  %v2754_v0 = vadd.f32 %v2722_v2, %v7026_v32  ;;  %v4560_v21 = vadd.f32 %v2259_v31, %v7017_v56  ;;  %v4575_v28 = vpop.permute.xlu1 %862  ;;  %v7032_v33 = vld [vmem:[#allocation42_spill] sm:$0xff]  ;;  %v7033_v51 = vld [vmem:[#allocation53_spill] sm:$0xff] }
 0x163   : > { %v1144_v34 = vadd.f32 %v1060_v26, %v984_v37  ;;  %v1762_v14 = vadd.f32 %v1730_v13, %v1060_v26  ;;  %v4557_v36 = vadd.f32 %v2242_v57, %v1060_v26  ;;  %v4565_v6 = vadd.f32 %v2771_v58, %v7017_v56  ;;  %v7035_v37 = vld [vmem:[#allocation54_spill] sm:$0xff] }
 0x164   : > { %7024 = vst [vmem:[#allocation49_spill] sm:$0xff] %v4551_v27  ;;  %v4562_v41 = vadd.f32 %v2754_v0, %v1060_v26  ;;  %v4568_v17 = vadd.f32 %v2155_v42, %v4406_v19  ;;  %v4571_v30 = vadd.f32 %v2667_v1, %v4410_v11  ;;  %v2654_v46 = vmul.f32 %v3938_v38, %v7002_v40  ;;  %v738_v5 = vpop.permute.xlu0 %737  ;;  %v7034_v1 = vld [vmem:[#allocation17_spill] sm:$0xff] }
 0x165   : > { %7025 = vst [vmem:[#allocation52_spill] sm:$0xff] %v4554_v22  ;;  %v1176_v2 = vmax.f32 %v1144_v34, 0.0  ;;  %v1794_v54 = vmax.f32 %v1762_v14, 0.0  ;;  %v2109_v9 = vmul.f32 %v3913_v10, %v7031_v50  ;;  %v614_v56 = vmul.f32 %v3904_v3, %v7032_v33  ;;  %v4616_v34 = vld [vmem:[%s6780_s1 + $0x8] sm:$0xff] }
 0x166   : > { %7027 = vst [vmem:[#allocation55_spill] sm:$0xff] %v4557_v36  ;;  %v2209_v19 = vmul.f32 %v4346_v7, %v4575_v28  ;;  %v2721_v11 = vmul.f32 %v4349_v60, %v4575_v28  ;;  %v2621_v31 = vmul.f32 %v3932_v4, %v7031_v50  ;;  %v2128_v40 = vmul.f32 %v3913_v10, %v7032_v33 }
 0x167   : > { %7028 = vst [vmem:[#allocation12_spill] sm:$0xff] %v4560_v21  ;;  %v2640_v58 = vmul.f32 %v3932_v4, %v7032_v33  ;;  %3332 = vset.pattern.permute.xlu2 %v6937_v44  ;;  %1295 = vmatpush.msra.mxu0 %v1176_v2  ;;  %v788_v42 = vadd.f32 %v4445_v48, %v7033_v51 }
 0x168   : > { %7029 = vst [vmem:[#allocation16_spill] sm:$0xff] %v4562_v41  ;;  %898 = vperm.xlu2 %3332, %v7034_v1   ;;  %v2161_v26 = vmul.f32 %v3929_v35, %v738_v5  ;;  %v2673_v59 = vmul.f32 %v3938_v38, %v738_v5  ;;  %v1662_v13 = vadd.f32 %v4467_v18, %v7035_v37 }
 0x169   : > { %7030 = vst [vmem:[#allocation50_spill] sm:$0xff] %v4565_v6  ;;  %v2174_v29 = vadd.f32 %v4471_v20, %v2109_v9  ;;  %v2226_v57 = vmul.f32 %v4346_v7, %v4421_v62  ;;  %830 = vperm.xlu1 %3331, %v4605_v61   ;;  %1813 = vmatpush.msra.mxu2 %v1794_v54  ;;  %v855_v20 = vpop.permute.xlu2 %854 }
 0x16a   : > { %v4609_v48 = vadd.f32 %v2209_v19, %v4221_v15  ;;  %v2686_v32 = vadd.f32 %v2654_v46, %v2621_v31  ;;  %v775_v0 = vmul.f32 %v3923_v24, %v738_v5  ;;  %v1649_v18 = vmul.f32 %v3926_v25, %v738_v5  ;;  %1007 = vperm.xlu0 %3343, %v4616_v34  }
 0x16b   : > { %v4620_v14 = vadd.f32 %v2721_v11, %v4223_v16  ;;  %v2193_v2 = vadd.f32 %v2161_v26, %v2128_v40  ;;  %v949_v15 = vmul.f32 %v4332_v49, %v855_v20  ;;  %v1695_v46 = vmul.f32 %v4335_v55, %v855_v20  ;;  %v4642_v21 = vpop.permute.xlu1 %729 }
 0x16c   : > { %v2207_v54 = vmul.f32 %v4346_v7, %v855_v20  ;;  %v2719_v50 = vmul.f32 %v4349_v60, %v855_v20  ;;  %v1616_v9 = vmul.f32 %v3907_v8, %v7032_v33  ;;  %v2738_v19 = vmul.f32 %v4349_v60, %v4421_v62  ;;  %v7037_v20 = vld [vmem:[#allocation30_spill] sm:$0xff]  ;;  %v4640_v33 = vpop.permute.xlu0 %733 }
 0x16d   : > { %v2258_v31 = vadd.f32 %v2226_v57, %v2193_v2  ;;  %v2705_v5 = vadd.f32 %v2673_v59, %v2640_v58  ;;  %v4630_v51 = vadd.f32 %v949_v15, %v788_v42  ;;  %v4632_v16 = vadd.f32 %v1695_v46, %v1662_v13 }
 0x16e   : > { %v4634_v11 = vadd.f32 %v2207_v54, %v2174_v29  ;;  %v4636_v40 = vadd.f32 %v2719_v50, %v2686_v32  ;;  %v807_v1 = vadd.f32 %v775_v0, %v614_v56  ;;  %v1681_v26 = vadd.f32 %v1649_v18, %v1616_v9  ;;  %v7038_v29 = vld [vmem:[#allocation38_spill] sm:$0xff]  ;;  %v3354_v18 = vld [vmem:[%s6780_s1 + $0x38] sm:$0xff] }
 0x16f   : > { %v2770_v37 = vadd.f32 %v2738_v19, %v2705_v5  ;;  %v2127_v6 = vmul.f32 %v3913_v10, %v7037_v20  ;;  %v968_v58 = vmul.f32 %v4332_v49, %v4421_v62  ;;  %v1714_v42 = vmul.f32 %v4335_v55, %v4421_v62  ;;  %v3353_v0 = vld [vmem:[%s6780_s1 + $0xc0] sm:$0xff] }
 0x170   : > { %7036 = vst [vmem:[#allocation18_spill] sm:$0xff] %v4636_v40  ;;  %3334 = vset.pattern.permute.xlu2 %v6935_v43  ;;  %v2160_v56 = vmul.f32 %v3929_v35, %v4640_v33  ;;  %v2672_v59 = vmul.f32 %v3938_v38, %v4640_v33  ;;  %v2639_v13 = vmul.f32 %v3932_v4, %v7037_v20  ;;  %v7039_v5 = vmov 0  }
 0x171   : > { %v2126_v57 = vmul.f32 %v3913_v10, %v7038_v29  ;;  %3333 = vset.pattern.permute.xlu1 %v6935_v43  ;;  %v2159_v32 = vmul.f32 %v3929_v35, %v4642_v21  ;;  %v2671_v62 = vmul.f32 %v3938_v38, %v4642_v21  ;;  %1099 = vperm.xlu2 %3334, %v3353_v0   ;;  %v1124_v50 = vpop.permute.xlu2 %1123 }
 0x172   : > { %1031 = vperm.xlu1 %3333, %v3354_v18   ;;  %v1000_v2 = vadd.f32 %v968_v58, %v807_v1  ;;  %v1746_v15 = vadd.f32 %v1714_v42, %v1681_v26  ;;  %v2192_v46 = vadd.f32 %v2160_v56, %v2127_v6  ;;  %v2638_v54 = vmul.f32 %v3932_v4, %v7038_v29  ;;  %v7042_v6 = vld [vmem:[#allocation35_spill] sm:$0xff] }
 0x173   : > { %v2704_v9 = vadd.f32 %v2672_v59, %v2639_v13  ;;  %v4670_v19 = vadd.f32 %v2159_v32, %v2126_v57  ;;  %3348 = vset.pattern.permute.xlu0 %v7039_v5  ;;  %v4673_v0 = vadd.f32 %v2258_v31, %v1124_v50  ;;  %v4675_v47 = vadd.f32 %v2770_v37, %v1124_v50  ;;  %v7043_v59 = vld [vmem:[#allocation28_spill] sm:$0xff] }
 0x174   : > { %v1160_v41 = vadd.f32 %v1124_v50, %v1000_v2  ;;  %v1778_v36 = vadd.f32 %v1746_v15, %v1124_v50  ;;  %v4677_v12 = vadd.f32 %v2671_v62, %v2638_v54  ;;  %v609_v58 = vmul.f32 %v3904_v3, %v7042_v6  ;;  %v718_v56 = vpop.permute.xlu0 %717  ;;  %v927_v2 = vpop.permute.xlu1 %926  ;;  %v3355_v54 = vld [vmem:[%s6780_s1 + $0x30] sm:$0xff] }
 0x175   : > { %7040 = vst [vmem:[#allocation51_spill] sm:$0xff] %v4673_v0  ;;  %v1611_v42 = vmul.f32 %v3907_v8, %v7042_v6  ;;  %v2108_v13 = vmul.f32 %v3913_v10, %v7043_v59  ;;  %v770_v31 = vmul.f32 %v3923_v24, %v718_v56  ;;  %v1644_v37 = vmul.f32 %v3926_v25, %v718_v56 }
 0x176   : > { %7041 = vst [vmem:[#allocation24_spill] sm:$0xff] %v4675_v47  ;;  %v1192_v1 = vmax.f32 %v1160_v41, 0.0  ;;  %v1810_v26 = vmax.f32 %v1778_v36, 0.0  ;;  %v2156_v57 = vmul.f32 %v3929_v35, %v718_v56  ;;  %v2123_v36 = vmul.f32 %v3913_v10, %v7042_v6  ;;  %v7044_v41 = vld [vmem:[#allocation65_spill] sm:$0xff] }
 0x177   : > { %v2141_v32 = vmul.f32 %v3929_v35, %v7044_v41  ;;  %v2653_v62 = vmul.f32 %v3938_v38, %v7044_v41  ;;  %v2668_v18 = vmul.f32 %v3938_v38, %v718_v56  ;;  %v2635_v15 = vmul.f32 %v3932_v4, %v7042_v6  ;;  %v3356_v56 = vld [vmem:[%s6780_s1 + $0xa8] sm:$0xff] }
 0x178   : > { %1372 = vmatpush.msra.mxu1 %v1192_v1  ;;  %1890 = vmatpush.msra.mxu3 %v1810_v26  ;;  %v2225_v50 = vmul.f32 %v4346_v7, %v927_v2  ;;  %v2620_v1 = vmul.f32 %v3932_v4, %v7043_v59  ;;  %v2737_v26 = vmul.f32 %v4349_v60, %v927_v2 }
 0x179   : > { %1027 = vperm.xlu2 %3334, %v3355_v54   ;;  %v4708_v6 = vadd.f32 %v770_v31, %v609_v58  ;;  %v4710_v47 = vadd.f32 %v1644_v37, %v1611_v42  ;;  %v4712_v0 = vadd.f32 %v2156_v57, %v2123_v36  ;;  %v4714_v54 = vpop.permute.xlu2 %850  ;;  %v4716_v45 = vadd.f32 %v2668_v18, %v2635_v15 }
 0x17a   : > { %3335 = vset.pattern.permute.xlu1 %v6937_v44  ;;  %v2257_v23 = vadd.f32 %v2225_v50, %v2192_v46  ;;  %v2206_v5 = vmul.f32 %v4346_v7, %v4714_v54  ;;  %v2718_v22 = vmul.f32 %v4349_v60, %v4714_v54  ;;  %v2173_v27 = vadd.f32 %v2141_v32, %v2108_v13 }
 0x17b   : > { %894 = vperm.xlu1 %3335, %v3356_v56   ;;  %7045 = vst [vmem:[#allocation42_spill] sm:$0xff] %v4708_v6  ;;  %v2685_v40 = vadd.f32 %v2653_v62, %v2620_v1  ;;  %v774_v58 = vmul.f32 %v3923_v24, %v4640_v33  ;;  %v1648_v42 = vmul.f32 %v3926_v25, %v4640_v33  ;;  %v3358_v1 = vld [vmem:[%s6780_s1 + $0xb8] sm:$0xff] }
 0x17c   : > { %7046 = vst [vmem:[#allocation53_spill] sm:$0xff] %v4710_v47  ;;  %v2769_v31 = vadd.f32 %v2737_v26, %v2704_v9  ;;  %v4726_v37 = vadd.f32 %v2206_v5, %v2173_v27  ;;  %v613_v57 = vmul.f32 %v3904_v3, %v7037_v20  ;;  %v1615_v36 = vmul.f32 %v3907_v8, %v7037_v20  ;;  %v4736_v62 = vpop.permute.xlu0 %922  ;;  %v7050_v5 = vld [vmem:[#allocation39_spill] sm:$0xff] }
 0x17d   : > { %7047 = vst [vmem:[#allocation17_spill] sm:$0xff] %v4712_v0  ;;  %v4728_v46 = vadd.f32 %v2718_v22, %v2685_v40  ;;  %v967_v13 = vmul.f32 %v4332_v49, %v927_v2  ;;  %v1713_v32 = vmul.f32 %v4335_v55, %v927_v2  ;;  %v2224_v27 = vmul.f32 %v4346_v7, %v4736_v62  ;;  %v4752_v2 = vld [vmem:[%s6780_s1 + $0x18] sm:$0xff] }
 0x17e   : > { %7048 = vst [vmem:[#allocation54_spill] sm:$0xff] %v4716_v45  ;;  %v2736_v22 = vmul.f32 %v4349_v60, %v4736_v62  ;;  %v4743_v40 = vpop.permute.xlu1 %725  ;;  %v806_v33 = vadd.f32 %v774_v58, %v613_v57  ;;  %v1680_v9 = vadd.f32 %v1648_v42, %v1615_v36  ;;  %v2125_v20 = vmul.f32 %v3913_v10, %v7050_v5 }
 0x17f   : > { %7049 = vst [vmem:[#allocation30_spill] sm:$0xff] %v4743_v40  ;;  %v2637_v18 = vmul.f32 %v3932_v4, %v7050_v5  ;;  %v2158_v15 = vmul.f32 %v3929_v35, %v4743_v40  ;;  %v2670_v50 = vmul.f32 %v3938_v38, %v4743_v40  ;;  %v4764_v58 = vadd.f32 %v2224_v27, %v4670_v19 }
 0x180   : > { %v999_v26 = vadd.f32 %v967_v13, %v806_v33  ;;  %v1745_v56 = vadd.f32 %v1713_v32, %v1680_v9  ;;  %v951_v42 = vmul.f32 %v4332_v49, %v4575_v28  ;;  %v1697_v57 = vmul.f32 %v4335_v55, %v4575_v28 }
 0x181   : > { %3337 = vset.pattern.permute.xlu2 %v6937_v44  ;;  %v1120_v36 = vpop.permute.xlu2 %1119  ;;  %v4771_v47 = vadd.f32 %v2736_v22, %v4677_v12  ;;  %v2190_v6 = vadd.f32 %v2158_v15, %v2125_v20  ;;  %v2702_v32 = vadd.f32 %v2670_v50, %v2637_v18  ;;  %v7053_v12 = vld [vmem:[#allocation74_spill] sm:$0xff]  ;;  %v7054_v20 = vld [vmem:[#allocation75_spill] sm:$0xff] }
 0x182   : > { %822 = vperm.xlu2 %3337, %v4752_v2   ;;  %v1159_v45 = vadd.f32 %v1120_v36, %v999_v26  ;;  %v1777_v0 = vadd.f32 %v1745_v56, %v1120_v36  ;;  %v4773_v40 = vadd.f32 %v2257_v23, %v1120_v36  ;;  %v4775_v13 = vadd.f32 %v2769_v31, %v1120_v36  ;;  %v7055_v18 = vld [vmem:[#allocation43_spill] sm:$0xff] }
 0x183   : > { %3336 = vset.pattern.permute.xlu1 %v6935_v43  ;;  %v983_v22 = vadd.f32 %v951_v42, %v7053_v12  ;;  %v1729_v15 = vadd.f32 %v1697_v57, %v7054_v20  ;;  %v2139_v50 = vmul.f32 %v3929_v35, %v7055_v18  ;;  %v966_v20 = vmul.f32 %v4332_v49, %v4736_v62 }
 0x184   : > { %1095 = vperm.xlu1 %3336, %v3358_v1   ;;  %7051 = vst [vmem:[#allocation38_spill] sm:$0xff] %v4773_v40  ;;  %v1191_v19 = vmax.f32 %v1159_v45, 0.0  ;;  %v1809_v27 = vmax.f32 %v1777_v0, 0.0  ;;  %v4777_v33 = vpop.permute.xlu0 %918  ;;  %v3359_v45 = vld [vmem:[%s6780_s1 + $0xb0] sm:$0xff] }
 0x185   : > { %7052 = vst [vmem:[#allocation35_spill] sm:$0xff] %v4775_v13  ;;  %v2223_v9 = vmul.f32 %v4346_v7, %v4777_v33  ;;  %v2735_v28 = vmul.f32 %v4349_v60, %v4777_v33 }
 0x186   : > { %1373 = vmatpush.msra.mxu1 %v1191_v19  ;;  %1891 = vmatpush.msra.mxu3 %v1809_v27  ;;  %v7060_v27 = vld [vmem:[#allocation23_spill] sm:$0xff] }
 0x187   : > { %v1056_v23 = vpop.permute.xlu1 %1055  ;;  %v4798_v56 = vadd.f32 %v2223_v9, %v2190_v6  ;;  %v4802_v19 = vadd.f32 %v2735_v28, %v2702_v32  ;;  %v2106_v12 = vmul.f32 %v3913_v10, %v7060_v27  ;;  %v612_v6 = vmul.f32 %v3904_v3, %v7038_v29 }
 0x188   : > { %v1143_v0 = vadd.f32 %v1056_v23, %v983_v22  ;;  %v1761_v31 = vadd.f32 %v1729_v15, %v1056_v23  ;;  %v4793_v1 = vadd.f32 %v4609_v48, %v1056_v23  ;;  %v4796_v26 = vadd.f32 %v4620_v14, %v1056_v23 }
 0x189   : > { %7058 = vst [vmem:[#allocation39_spill] sm:$0xff] %v4798_v56  ;;  %v773_v48 = vmul.f32 %v3923_v24, %v4642_v21  ;;  %v1647_v14 = vmul.f32 %v3926_v25, %v4642_v21  ;;  %v1614_v32 = vmul.f32 %v3907_v8, %v7038_v29  ;;  %v2171_v28 = vadd.f32 %v2139_v50, %v2106_v12  ;;  %v3360_v50 = vld [vmem:[%s6780_s1 + $0x20] sm:$0xff] }
 0x18a   : > { %3338 = vset.pattern.permute.xlu2 %v6935_v43  ;;  %7056 = vst [vmem:[#allocation28_spill] sm:$0xff] %v4793_v1  ;;  %v1175_v57 = vmax.f32 %v1143_v0, 0.0  ;;  %v1793_v36 = vmax.f32 %v1761_v31, 0.0  ;;  %v2618_v22 = vmul.f32 %v3932_v4, %v7060_v27  ;;  %v1712_v21 = vmul.f32 %v4335_v55, %v4736_v62 }
 0x18b   : > { %1091 = vperm.xlu2 %3338, %v3359_v45   ;;  %7057 = vst [vmem:[#allocation65_spill] sm:$0xff] %v4796_v26  ;;  %v4800_v42 = vpop.permute.xlu2 %914  ;;  %v7062_v45 = vld [vmem:[#allocation29_spill] sm:$0xff] }
 0x18c   : > { %1023 = vperm.xlu1 %3336, %v4605_v61   ;;  %7059 = vst [vmem:[#allocation74_spill] sm:$0xff] %v4802_v19  ;;  %v2651_v61 = vmul.f32 %v3938_v38, %v7055_v18  ;;  %1296 = vmatpush.msra.mxu0 %v1175_v57  ;;  %v4816_v9 = vpop.permute.xlu0 %842  ;;  %v2124_v29 = vmul.f32 %v3913_v10, %v7062_v45 }
 0x18d   : > { %1814 = vmatpush.msra.mxu2 %v1793_v36  ;;  %7061 = vst [vmem:[#allocation75_spill] sm:$0xff] %v4816_v9  ;;  %v2204_v15 = vmul.f32 %v4346_v7, %v4816_v9  ;;  %v2716_v23 = vmul.f32 %v4349_v60, %v4816_v9  ;;  %v2636_v0 = vmul.f32 %v3932_v4, %v7062_v45 }
 0x18e   : > { %v2683_v31 = vadd.f32 %v2651_v61, %v2618_v22  ;;  %v805_v57 = vadd.f32 %v773_v48, %v612_v6  ;;  %v1679_v36 = vadd.f32 %v1647_v14, %v1614_v32  ;;  %v2222_v13 = vmul.f32 %v4346_v7, %v4800_v42  ;;  %v4847_v61 = vld [vmem:[%s6780_s1 + $0x98] sm:$0xff] }
 0x18f   : > { %v4838_v12 = vadd.f32 %v2204_v15, %v2171_v28  ;;  %v2734_v40 = vmul.f32 %v4349_v60, %v4800_v42  ;;  %v950_v28 = vmul.f32 %v4332_v49, %v4489_v53 }
 0x190   : > { %v4836_v62 = vpop.permute.xlu1 %721  ;;  %v998_v14 = vadd.f32 %v966_v20, %v805_v57  ;;  %v1744_v6 = vadd.f32 %v1712_v21, %v1679_v36  ;;  %v4854_v32 = vadd.f32 %v2716_v23, %v2683_v31  ;;  %v7072_v57 = vld [vmem:[#allocation21_spill] sm:$0xff] }
 0x191   : > { %7063 = vst [vmem:[#allocation43_spill] sm:$0xff] %v4838_v12  ;;  %v2157_v22 = vmul.f32 %v3929_v35, %v4836_v62  ;;  %v2669_v48 = vmul.f32 %v3938_v38, %v4836_v62  ;;  %v588_v36 = vmul.f32 %v3904_v3, %v7072_v57 }
 0x193   : > { %1019 = vperm.xlu2 %3338, %v3360_v50   ;;  %v2189_v50 = vadd.f32 %v2157_v22, %v2124_v29  ;;  %v2701_v26 = vadd.f32 %v2669_v48, %v2636_v0  ;;  %v1590_v22 = vmul.f32 %v3907_v8, %v7072_v57 }
 0x194   : > { %3339 = vset.pattern.permute.xlu1 %v6937_v44 }
 0x195   : > { %886 = vperm.xlu1 %3339, %v4847_v61   ;;  %v1116_v15 = vpop.permute.xlu2 %1115  ;;  %v4864_v12 = vpop.permute.xlu0 %906  ;;  %v4866_v20 = vadd.f32 %v2222_v13, %v2189_v50  ;;  %v4868_v21 = vadd.f32 %v2734_v40, %v2701_v26  ;;  %v4885_v40 = vld [vmem:[%s6780_s1 + $0x90] sm:$0xff]  ;;  %v7076_v50 = vld [vmem:[#allocation25_spill] sm:$0xff] }
 0x196   : > { %v1158_v1 = vadd.f32 %v1116_v15, %v998_v14  ;;  %v1776_v19 = vadd.f32 %v1744_v6, %v1116_v15  ;;  %v4859_v56 = vadd.f32 %v4764_v58, %v1116_v15  ;;  %v4862_v9 = vadd.f32 %v4771_v47, %v1116_v15  ;;  %7066 = vst [vmem:[#allocation95_spill] sm:$0xff] %v4864_v12  ;;  %v7067_v58 = vld [vmem:[#allocation84_spill] sm:$0xff] }
 0x197   : > { %v2220_v53 = vmul.f32 %v4346_v7, %v4864_v12  ;;  %v2732_v23 = vmul.f32 %v4349_v60, %v4864_v12  ;;  %v982_v31 = vadd.f32 %v950_v28, %v7067_v58  ;;  %7070 = vst [vmem:[#allocation97_spill] sm:$0xff] %v4885_v40  ;;  %v4912_v15 = vmul.f32 %v3907_v8, %v7060_v27 }
 0x198   : > { %7064 = vst [vmem:[#allocation23_spill] sm:$0xff] %v4859_v56  ;;  %v1190_v29 = vmax.f32 %v1158_v1, 0.0  ;;  %v1808_v0 = vmax.f32 %v1776_v19, 0.0 }
 0x199   : > { %7065 = vst [vmem:[#allocation29_spill] sm:$0xff] %v4862_v9  ;;  %v4877_v47 = vadd.f32 %v2220_v53, %v4568_v17  ;;  %v4880_v13 = vadd.f32 %v2732_v23, %v4571_v30  ;;  %v1052_v1 = vpop.permute.xlu1 %1051  ;;  %v7082_v9 = vld [vmem:[#allocation69_spill] sm:$0xff] }
 0x19a   : > { %1374 = vmatpush.msra.mxu1 %v1190_v29  ;;  %1892 = vmatpush.msra.mxu3 %v1808_v0  ;;  %v1142_v26 = vadd.f32 %v1052_v1, %v982_v31  ;;  %v1760_v19 = vadd.f32 %v4513_v39, %v1052_v1  ;;  %v4891_v17 = vadd.f32 %v4522_v52, %v1052_v1  ;;  %v7079_v31 = vld [vmem:[#allocation47_spill] sm:$0xff] }
 0x19b   : > { %3340 = vset.pattern.permute.xlu2 %v6937_v44  ;;  %7068 = vst [vmem:[#allocation84_spill] sm:$0xff] %v4877_v47  ;;  %v4900_v48 = vadd.f32 %v4525_v63, %v1052_v1  ;;  %v4906_v52 = vmul.f32 %v3904_v3, %v7060_v27  ;;  %v2614_v39 = vmul.f32 %v3932_v4, %v7072_v57 }
 0x19c   : > { %7069 = vst [vmem:[#allocation96_spill] sm:$0xff] %v4880_v13  ;;  %882 = vperm.xlu2 %3340, %v4885_v40   ;;  %v1174_v14 = vmax.f32 %v1142_v26, 0.0  ;;  %v1792_v6 = vmax.f32 %v1760_v19, 0.0  ;;  %v4916_v63 = vmul.f32 %v3904_v3, %v7076_v50  ;;  %v749_v1 = vmul.f32 %v3923_v24, %v7079_v31  ;;  %v7080_v19 = vld [vmem:[#allocation68_spill] sm:$0xff] }
 0x19d   : > { %814 = vperm.xlu1 %3339, %v4616_v34   ;;  %7071 = vst [vmem:[#allocation98_spill] sm:$0xff] %v4891_v17  ;;  %v4893_v30 = vpop.permute.xlu2 %1043  ;;  %v2102_v34 = vmul.f32 %v3913_v10, %v7072_v57  ;;  %v835_v28 = vpop.permute.xlu0 %834  ;;  %v2135_v26 = vmul.f32 %v3929_v35, %v7079_v31 }
 0x19e   : > { %7073 = vst [vmem:[#allocation21_spill] sm:$0xff] %v4900_v48  ;;  %v4920_v53 = vadd.f32 %v4726_v37, %v4893_v30  ;;  %v4924_v23 = vadd.f32 %v4728_v46, %v4893_v30  ;;  %v944_v29 = vmul.f32 %v4332_v49, %v835_v28  ;;  %v1690_v0 = vmul.f32 %v4335_v55, %v835_v28  ;;  %v7088_v48 = vld [vmem:[#allocation56_spill] sm:$0xff] }
 0x19f   : > { %7074 = vst [vmem:[#allocation99_spill] sm:$0xff] %v4906_v52  ;;  %v2202_v58 = vmul.f32 %v4346_v7, %v835_v28  ;;  %v2714_v27 = vmul.f32 %v4349_v60, %v835_v28  ;;  %1297 = vmatpush.msra.mxu0 %v1174_v14  ;;  %v1623_v37 = vmul.f32 %v3926_v25, %v7079_v31  ;;  %v7084_v14 = vld [vmem:[#allocation70_spill] sm:$0xff] }
 0x1a0   : > { %7075 = vst [vmem:[#allocation100_spill] sm:$0xff] %v4912_v15  ;;  %v2647_v46 = vmul.f32 %v3938_v38, %v7079_v31  ;;  %1815 = vmatpush.msra.mxu2 %v1792_v6  ;;  %v4939_v57 = vadd.f32 %v944_v29, %v7080_v19  ;;  %v4942_v56 = vadd.f32 %v1690_v0, %v7082_v9  ;;  %v7089_v9 = vld [vmem:[#allocation27_spill] sm:$0xff] }
 0x1a1   : > { %7077 = vst [vmem:[#allocation25_spill] sm:$0xff] %v4920_v53  ;;  %v4945_v28 = vadd.f32 %v2202_v58, %v7084_v14  ;;  %v2138_v17 = vmul.f32 %v3929_v35, %v7088_v48  ;;  %v2650_v13 = vmul.f32 %v3938_v38, %v7088_v48  ;;  %v4957_v6 = vmul.f32 %v3907_v8, %v7076_v50 }
 0x1a2   : > { %7078 = vst [vmem:[#allocation101_spill] sm:$0xff] %v4924_v23  ;;  %v7086_v23 = vld [vmem:[#allocation71_spill] sm:$0xff]  ;;  %v2105_v29 = vmul.f32 %v3913_v10, %v7089_v9  ;;  %v594_v58 = vmul.f32 %v3904_v3, %v7043_v59  ;;  %v2617_v31 = vmul.f32 %v3932_v4, %v7089_v9  ;;  %v755_v19 = vmul.f32 %v3923_v24, %v7044_v41 }
 0x1a3   : > { %7081 = vst [vmem:[#allocation47_spill] sm:$0xff] %v4939_v57  ;;  %v4948_v53 = vadd.f32 %v2714_v27, %v7086_v23  ;;  %v3363_v23 = vld [vmem:[%s6780_s1 + $0xa0] sm:$0xff]  ;;  %v4965_v0 = vpop.permute.xlu1 %846  ;;  %v1596_v27 = vmul.f32 %v3907_v8, %v7043_v59  ;;  %v1629_v14 = vmul.f32 %v3926_v25, %v7044_v41  ;;  %v2679_v9 = vadd.f32 %v2647_v46, %v2614_v39 }
 0x1a4   : > { %7083 = vst [vmem:[#allocation68_spill] sm:$0xff] %v4942_v56  ;;  %3342 = vset.pattern.permute.xlu2 %v6935_v43  ;;  %v1655_v56 = vadd.f32 %v1623_v37, %v1590_v22  ;;  %v2205_v57 = vmul.f32 %v4346_v7, %v4965_v0  ;;  %v2717_v48 = vmul.f32 %v4349_v60, %v4965_v0 }
 0x1a5   : > { %7085 = vst [vmem:[#allocation69_spill] sm:$0xff] %v4945_v28  ;;  %3341 = vset.pattern.permute.xlu1 %v6935_v43  ;;  %1083 = vperm.xlu2 %3342, %v3363_v23   ;;  %v781_v23 = vadd.f32 %v749_v1, %v588_v36  ;;  %v2682_v36 = vadd.f32 %v2650_v13, %v2617_v31  ;;  %v7092_v13 = vld [vmem:[#allocation80_spill] sm:$0xff]  ;;  %v7093_v31 = vld [vmem:[#allocation81_spill] sm:$0xff] }
 0x1a6   : > { %7087 = vst [vmem:[#allocation70_spill] sm:$0xff] %v4948_v53  ;;  %1015 = vperm.xlu1 %3341, %v4752_v2   ;;  %v2167_v53 = vadd.f32 %v2135_v26, %v2102_v34  ;;  %v827_v47 = vpop.permute.xlu0 %826  ;;  %v2170_v2 = vadd.f32 %v2138_v17, %v2105_v29  ;;  %v948_v34 = vmul.f32 %v4332_v49, %v4714_v54 }
 0x1a7   : > { %7090 = vst [vmem:[#allocation71_spill] sm:$0xff] %v4965_v0  ;;  %v4982_v59 = vpop.permute.xlu2 %838  ;;  %v942_v22 = vmul.f32 %v4332_v49, %v827_v47  ;;  %v1688_v1 = vmul.f32 %v4335_v55, %v827_v47  ;;  %v2200_v37 = vmul.f32 %v4346_v7, %v827_v47  ;;  %v2712_v40 = vmul.f32 %v4349_v60, %v827_v47 }
 0x1a8   : > { %7091 = vst [vmem:[#allocation102_spill] sm:$0xff] %v4982_v59  ;;  %v2203_v28 = vmul.f32 %v4346_v7, %v4982_v59  ;;  %v2715_v41 = vmul.f32 %v4349_v60, %v4982_v59  ;;  %v1694_v39 = vmul.f32 %v4335_v55, %v4714_v54  ;;  %v787_v26 = vadd.f32 %v755_v19, %v594_v58 }
 0x1a9   : > { %v1661_v46 = vadd.f32 %v1629_v14, %v1596_v27  ;;  %v4996_v59 = vadd.f32 %v942_v22, %v781_v23  ;;  %v4998_v17 = vadd.f32 %v1688_v1, %v1655_v56  ;;  %v5001_v29 = vadd.f32 %v2205_v57, %v7092_v13  ;;  %v5041_v27 = vld [vmem:[%s6780_s1 + $0x88] sm:$0xff] }
 0x1aa   : > { %v5004_v0 = vadd.f32 %v2717_v48, %v7093_v31  ;;  %v5006_v12 = vadd.f32 %v2203_v28, %v2170_v2  ;;  %v5008_v47 = vadd.f32 %v2715_v41, %v2682_v36  ;;  %v5010_v15 = vadd.f32 %v2200_v37, %v2167_v53  ;;  %v3364_v48 = vld [vmem:[%s6780_s1 + $0x10] sm:$0xff] }
 0x1ab   : > { %v5012_v52 = vadd.f32 %v2712_v40, %v2679_v9  ;;  %v5016_v54 = vmul.f32 %v3904_v3, %v7062_v45  ;;  %v5020_v56 = vmul.f32 %v3907_v8, %v7062_v45  ;;  %v2100_v57 = vmul.f32 %v3913_v10, %v7076_v50  ;;  %v7097_v41 = vld [vmem:[#allocation44_spill] sm:$0xff] }
 0x1ac   : > { %v2612_v40 = vmul.f32 %v3932_v4, %v7076_v50  ;;  %v5031_v53 = vmul.f32 %v3904_v3, %v7050_v5  ;;  %v5035_v28 = vmul.f32 %v3907_v8, %v7050_v5  ;;  %v980_v9 = vadd.f32 %v948_v34, %v787_v26  ;;  %v7095_v5 = vld [vmem:[#allocation18_spill] sm:$0xff] }
 0x1ad   : > { %1011 = vperm.xlu2 %3342, %v3364_v48   ;;  %v1048_v45 = vpop.permute.xlu1 %1047  ;;  %v1726_v58 = vadd.f32 %v1694_v39, %v1661_v46  ;;  %v747_v2 = vmul.f32 %v3923_v24, %v7097_v41  ;;  %v1621_v36 = vmul.f32 %v3926_v25, %v7097_v41  ;;  %v753_v26 = vmul.f32 %v3923_v24, %v7055_v18 }
 0x1ae   : > { %3344 = vset.pattern.permute.xlu1 %v6937_v44  ;;  %v1141_v50 = vadd.f32 %v1048_v45, %v4630_v51  ;;  %v1759_v19 = vadd.f32 %v4632_v16, %v1048_v45  ;;  %v5047_v14 = vadd.f32 %v4634_v11, %v1048_v45  ;;  %v5050_v23 = vadd.f32 %v7095_v5, %v1048_v45  ;;  %v7098_v45 = vld [vmem:[#allocation66_spill] sm:$0xff] }
 0x1af   : > { %878 = vperm.xlu1 %3344, %v5041_v27   ;;  %v891_v1 = vpop.permute.xlu0 %890  ;;  %v1140_v37 = vadd.f32 %v4893_v30, %v980_v9  ;;  %v1758_v51 = vadd.f32 %v1726_v58, %v4893_v30  ;;  %v2133_v46 = vmul.f32 %v3929_v35, %v7097_v41  ;;  %v1627_v48 = vmul.f32 %v3926_v25, %v7055_v18  ;;  %v7099_v58 = vld [vmem:[#allocation67_spill] sm:$0xff] }
 0x1b0   : > { %7094 = vst [vmem:[#allocation80_spill] sm:$0xff] %v5047_v14  ;;  %v5056_v22 = vpop.permute.xlu2 %1107  ;;  %v958_v16 = vmul.f32 %v4332_v49, %v891_v1  ;;  %v1704_v11 = vmul.f32 %v4335_v55, %v891_v1  ;;  %v2216_v34 = vmul.f32 %v4346_v7, %v891_v1  ;;  %v2728_v39 = vmul.f32 %v4349_v60, %v891_v1 }
 0x1b1   : > { %7096 = vst [vmem:[#allocation81_spill] sm:$0xff] %v5050_v23  ;;  %v1173_v13 = vmax.f32 %v1141_v50, 0.0  ;;  %v1791_v31 = vmax.f32 %v1759_v19, 0.0  ;;  %v2645_v30 = vmul.f32 %v3938_v38, %v7097_v41  ;;  %v1172_v1 = vmax.f32 %v1140_v37, 0.0 }
 0x1b2   : > { %v5073_v9 = vadd.f32 %v958_v16, %v7098_v45  ;;  %v5076_v5 = vadd.f32 %v1704_v11, %v7099_v58  ;;  %v779_v23 = vadd.f32 %v747_v2, %v4916_v63  ;;  %v5081_v50 = vadd.f32 %v4866_v20, %v5056_v22  ;;  %v7102_v16 = vld [vmem:[#allocation72_spill] sm:$0xff] }
 0x1b3   : > { %1298 = vmatpush.msra.mxu0 %v1173_v13  ;;  %1816 = vmatpush.msra.mxu2 %v1791_v31  ;;  %v5085_v18 = vadd.f32 %v4868_v21, %v5056_v22  ;;  %v1790_v19 = vmax.f32 %v1758_v51, 0.0  ;;  %v1653_v41 = vadd.f32 %v1621_v36, %v4957_v6  ;;  %v5090_v11 = vadd.f32 %v2216_v34, %v7102_v16  ;;  %v7103_v13 = vld [vmem:[#allocation73_spill] sm:$0xff]  ;;  %v5102_v21 = vld [vmem:[%s6780_s1 + $0x80] sm:$0xff] }
 0x1b4   : > { %7100 = vst [vmem:[#allocation18_spill] sm:$0xff] %v5081_v50  ;;  %v5093_v37 = vadd.f32 %v2728_v39, %v7103_v13  ;;  %v771_v63 = vmul.f32 %v3923_v24, %v4836_v62  ;;  %v1645_v20 = vmul.f32 %v3926_v25, %v4836_v62  ;;  %v7105_v6 = vld [vmem:[#allocation30_spill] sm:$0xff]  ;;  %v2677_v62 = vadd.f32 %v2645_v30, %v2612_v40 }
 0x1b5   : > { %7101 = vst [vmem:[#allocation44_spill] sm:$0xff] %v5085_v18  ;;  %3346 = vset.pattern.permute.xlu2 %v6937_v44  ;;  %1299 = vmatpush.msra.mxu0 %v1172_v1  ;;  %v2165_v44 = vadd.f32 %v2133_v46, %v2100_v57  ;;  %v772_v2 = vmul.f32 %v3923_v24, %v7105_v6  ;;  %v7108_v18 = vld [vmem:[#allocation43_spill] sm:$0xff] }
 0x1b6   : > { %7104 = vst [vmem:[#allocation66_spill] sm:$0xff] %v5093_v37  ;;  %874 = vperm.xlu2 %3346, %v5102_v21   ;;  %v1646_v36 = vmul.f32 %v3926_v25, %v7105_v6  ;;  %1817 = vmatpush.msra.mxu2 %v1790_v19  ;;  %v911_v51 = vpop.permute.xlu1 %910  ;;  %v965_v34 = vmul.f32 %v4332_v49, %v4777_v33 }
 0x1b7   : > { %3345 = vset.pattern.permute.xlu1 %v6935_v43  ;;  %v1711_v39 = vmul.f32 %v4335_v55, %v4777_v33  ;;  %v2221_v57 = vmul.f32 %v4346_v7, %v911_v51  ;;  %v2733_v46 = vmul.f32 %v4349_v60, %v911_v51  ;;  %v819_v45 = vpop.permute.xlu0 %818  ;;  %v964_v33 = vmul.f32 %v4332_v49, %v4800_v42 }
 0x1b8   : > { %1079 = vperm.xlu1 %3345, %v4847_v61   ;;  %v940_v58 = vmul.f32 %v4332_v49, %v819_v45  ;;  %v1686_v1 = vmul.f32 %v4335_v55, %v819_v45  ;;  %v2198_v40 = vmul.f32 %v4346_v7, %v819_v45  ;;  %v2710_v30 = vmul.f32 %v4349_v60, %v819_v45 }
 0x1b9   : > { %v5117_v31 = vpop.permute.xlu2 %1035  ;;  %v1710_v61 = vmul.f32 %v4335_v55, %v4800_v42  ;;  %v803_v19 = vadd.f32 %v771_v63, %v5016_v54  ;;  %v1677_v16 = vadd.f32 %v1645_v20, %v5020_v56  ;;  %v804_v14 = vadd.f32 %v772_v2, %v5031_v53  ;;  %v7113_v56 = vld [vmem:[#allocation17_spill] sm:$0xff]  ;;  %v7117_v2 = vld [vmem:[#allocation75_spill] sm:$0xff] }
 0x1ba   : > { %v5129_v13 = vadd.f32 %v940_v58, %v779_v23  ;;  %v5131_v6 = vadd.f32 %v1686_v1, %v1653_v41  ;;  %v5135_v50 = vadd.f32 %v7108_v18, %v5117_v31  ;;  %v5139_v45 = vadd.f32 %v4854_v32, %v5117_v31  ;;  %v7114_v41 = vld [vmem:[#allocation54_spill] sm:$0xff]  ;;  %v7115_v32 = vld [vmem:[#allocation99_spill] sm:$0xff]  ;;  %v7116_v1 = vld [vmem:[#allocation100_spill] sm:$0xff] }
 0x1bb   : > { %v1678_v42 = vadd.f32 %v1646_v36, %v5035_v28  ;;  %v5143_v37 = vadd.f32 %v2198_v40, %v2165_v44  ;;  %v5145_v54 = vadd.f32 %v2710_v30, %v2677_v62  ;;  %v5148_v23 = vadd.f32 %v2221_v57, %v7113_v56  ;;  %v3367_v36 = vld [vmem:[%s6780_s1] sm:$0xff] }
 0x1bc   : > { %7106 = vst [vmem:[#allocation67_spill] sm:$0xff] %v5129_v13  ;;  %v5151_v63 = vadd.f32 %v2733_v46, %v7114_v41  ;;  %v997_v18 = vadd.f32 %v965_v34, %v804_v14  ;;  %v785_v58 = vadd.f32 %v753_v26, %v7115_v32  ;;  %v1659_v53 = vadd.f32 %v1627_v48, %v7116_v1  ;;  %v7119_v48 = vld [vmem:[#allocation71_spill] sm:$0xff]  ;;  %v7120_v46 = vld [vmem:[#allocation97_spill] sm:$0xff] }
 0x1bd   : > { %7107 = vst [vmem:[#allocation72_spill] sm:$0xff] %v5131_v6  ;;  %v1743_v20 = vadd.f32 %v1711_v39, %v1678_v42  ;;  %v946_v28 = vmul.f32 %v4332_v49, %v7117_v2  ;;  %v1692_v44 = vmul.f32 %v4335_v55, %v7117_v2  ;;  %v996_v62 = vadd.f32 %v964_v33, %v803_v19  ;;  %v7126_v6 = vld [vmem:[#allocation34_spill] sm:$0xff] }
 0x1be   : > { %7109 = vst [vmem:[#allocation73_spill] sm:$0xff] %v5135_v50  ;;  %3347 = vset.pattern.permute.xlu2 %v6935_v43  ;;  %v1742_v57 = vadd.f32 %v1710_v61, %v1677_v16  ;;  %v7118_v43 = vld [vmem:[#allocation95_spill] sm:$0xff]  ;;  %v947_v34 = vmul.f32 %v4332_v49, %v7119_v48  ;;  %v1693_v39 = vmul.f32 %v4335_v55, %v7119_v48 }
 0x1bf   : > { %7110 = vst [vmem:[#allocation30_spill] sm:$0xff] %v5139_v45  ;;  %1003 = vperm.xlu2 %3347, %v3367_v36   ;;  %v962_v14 = vmul.f32 %v4332_v49, %v7118_v43  ;;  %v1708_v26 = vmul.f32 %v4335_v55, %v7118_v43  ;;  %v1156_v32 = vadd.f32 %v5056_v22, %v996_v62  ;;  %v7121_v43 = vld [vmem:[#allocation31_spill] sm:$0xff]  ;;  %v7124_v45 = vld [vmem:[#allocation33_spill] sm:$0xff] }
 0x1c0   : > { %7111 = vst [vmem:[#allocation43_spill] sm:$0xff] %v5143_v37  ;;  %1075 = vperm.xlu1 %3345, %v7120_v46   ;;  %v811_v40 = vpop.permute.xlu0 %810  ;;  %v1774_v1 = vadd.f32 %v1742_v57, %v5056_v22  ;;  %v7122_v46 = vld [vmem:[#allocation32_spill] sm:$0xff]  ;;  %v1709_v37 = vmul.f32 %v4335_v55, %v911_v51  ;;  %v7130_v57 = vld [vmem:[#allocation74_spill] sm:$0xff] }
 0x1c1   : > { %7112 = vst [vmem:[#allocation103_spill] sm:$0xff] %v5145_v54  ;;  %v1112_v30 = vpop.permute.xlu1 %1111  ;;  %v938_v42 = vmul.f32 %v4332_v49, %v811_v40  ;;  %v1684_v33 = vmul.f32 %v4335_v55, %v811_v40  ;;  %v2196_v61 = vmul.f32 %v4346_v7, %v811_v40  ;;  %v2708_v19 = vmul.f32 %v4349_v60, %v811_v40 }
 0x1c2   : > { %v5176_v16 = vpop.permute.xlu2 %898  ;;  %v1157_v2 = vadd.f32 %v1112_v30, %v997_v18  ;;  %v1775_v36 = vadd.f32 %v1743_v20, %v1112_v30  ;;  %v963_v40 = vmul.f32 %v4332_v49, %v911_v51  ;;  %v7128_v18 = vld [vmem:[#allocation39_spill] sm:$0xff]  ;;  %v1188_v51 = vmax.f32 %v1156_v32, 0.0  ;;  %v7138_v32 = vld [vmem:[#allocation49_spill] sm:$0xff] }
 0x1c3   : > { %v2218_v56 = vmul.f32 %v4346_v7, %v5176_v16  ;;  %v2730_v41 = vmul.f32 %v4349_v60, %v5176_v16  ;;  %v5185_v48 = vadd.f32 %v938_v42, %v7121_v43  ;;  %v5188_v54 = vadd.f32 %v1684_v33, %v7122_v46  ;;  %v7132_v33 = vld [vmem:[#allocation45_spill] sm:$0xff]  ;;  %v7133_v46 = vld [vmem:[#allocation90_spill] sm:$0xff] }
 0x1c4   : > { %v5193_v50 = vadd.f32 %v2196_v61, %v7124_v45  ;;  %v5196_v13 = vadd.f32 %v2708_v19, %v7126_v6  ;;  %v1189_v62 = vmax.f32 %v1157_v2, 0.0  ;;  %v1807_v22 = vmax.f32 %v1775_v36, 0.0  ;;  %v7134_v6 = vld [vmem:[#allocation78_spill] sm:$0xff] }
 0x1c5   : > { %7123 = vst [vmem:[#allocation17_spill] sm:$0xff] %v5188_v54  ;;  %v5199_v20 = vadd.f32 %v7128_v18, %v1112_v30  ;;  %v5202_v42 = vadd.f32 %v7130_v57, %v1112_v30  ;;  %v5205_v43 = vadd.f32 %v2218_v56, %v7132_v33  ;;  %v5208_v54 = vadd.f32 %v2730_v41, %v7133_v46  ;;  %v7135_v30 = vld [vmem:[#allocation42_spill] sm:$0xff]  ;;  %v7136_v18 = vld [vmem:[#allocation79_spill] sm:$0xff]  ;;  %v7137_v57 = vld [vmem:[#allocation53_spill] sm:$0xff] }
 0x1c6   : > { %7125 = vst [vmem:[#allocation54_spill] sm:$0xff] %v5193_v50  ;;  %1375 = vmatpush.msra.mxu1 %v1189_v62  ;;  %v979_v45 = vadd.f32 %v947_v34, %v7134_v6  ;;  %v978_v61 = vadd.f32 %v946_v28, %v785_v58  ;;  %v1724_v19 = vadd.f32 %v1692_v44, %v1659_v53  ;;  %v1806_v2 = vmax.f32 %v1774_v1, 0.0  ;;  %v7139_v53 = vld [vmem:[#allocation52_spill] sm:$0xff] }
 0x1c7   : > { %7127 = vst [vmem:[#allocation99_spill] sm:$0xff] %v5196_v13  ;;  %1067 = vperm.xlu2 %3347, %v5102_v21   ;;  %1893 = vmatpush.msra.mxu3 %v1807_v22  ;;  %v995_v36 = vadd.f32 %v963_v40, %v7135_v30  ;;  %v1725_v56 = vadd.f32 %v1693_v39, %v7136_v18  ;;  %v7146_v18 = vmov 0  }
 0x1c8   : > { %7129 = vst [vmem:[#allocation100_spill] sm:$0xff] %v5199_v20  ;;  %1071 = vperm.xlu1 %3345, %v5041_v27   ;;  %v1741_v33 = vadd.f32 %v1709_v37, %v7137_v57  ;;  %1376 = vmatpush.msra.mxu1 %v1188_v51  ;;  %v1138_v21 = vadd.f32 %v5117_v31, %v978_v61 }
 0x1c9   : > { %7131 = vst [vmem:[#allocation75_spill] sm:$0xff] %v5202_v42  ;;  %v1040_v41 = vpop.permute.xlu1 %1039  ;;  %v994_v62 = vadd.f32 %v962_v14, %v7138_v32  ;;  %v1756_v58 = vadd.f32 %v1724_v19, %v5117_v31  ;;  %v1740_v28 = vadd.f32 %v1708_v26, %v7139_v53  ;;  %1894 = vmatpush.msra.mxu3 %v1806_v2  ;;  %v7148_v32 = vld [vmem:[#allocation70_spill] sm:$0xff] }
 0x1ca   : > { %v1104_v46 = vpop.permute.xlu0 %1103  ;;  %v1139_v27 = vadd.f32 %v1040_v41, %v979_v45  ;;  %v1757_v34 = vadd.f32 %v1725_v56, %v1040_v41  ;;  %v5221_v39 = vadd.f32 %v5001_v29, %v1040_v41  ;;  %v5224_v37 = vadd.f32 %v5004_v0, %v1040_v41  ;;  %v7142_v29 = vld [vmem:[#allocation84_spill] sm:$0xff] }
 0x1cb   : > { %v1155_v44 = vadd.f32 %v1104_v46, %v995_v36  ;;  %v1773_v1 = vadd.f32 %v1741_v33, %v1104_v46  ;;  %v1100_v40 = vpop.permute.xlu2 %1099  ;;  %v5227_v22 = vadd.f32 %v5148_v23, %v1104_v46  ;;  %v5230_v14 = vadd.f32 %v5151_v63, %v1104_v46  ;;  %v7144_v0 = vld [vmem:[#allocation96_spill] sm:$0xff]  ;;  %v7147_v46 = vld [vmem:[#allocation69_spill] sm:$0xff] }
 0x1cc   : > { %v1171_v31 = vmax.f32 %v1139_v27, 0.0  ;;  %v1789_v51 = vmax.f32 %v1757_v34, 0.0  ;;  %v1154_v45 = vadd.f32 %v1100_v40, %v994_v62  ;;  %v1772_v61 = vadd.f32 %v1740_v28, %v1100_v40  ;;  %v7151_v28 = vld [vmem:[#allocation83_spill] sm:$0xff] }
 0x1cd   : > { %7140 = vst [vmem:[#allocation95_spill] sm:$0xff] %v5227_v22  ;;  %v1187_v26 = vmax.f32 %v1155_v44, 0.0  ;;  %v1805_v6 = vmax.f32 %v1773_v1, 0.0  ;;  %v1170_v19 = vmax.f32 %v1138_v21, 0.0  ;;  %v5233_v2 = vadd.f32 %v7142_v29, %v1100_v40  ;;  %v7152_v44 = vld [vmem:[#allocation40_spill] sm:$0xff] }
 0x1ce   : > { %7141 = vst [vmem:[#allocation71_spill] sm:$0xff] %v5230_v14  ;;  %1300 = vmatpush.msra.mxu0 %v1171_v31  ;;  %v5236_v30 = vadd.f32 %v7144_v0, %v1100_v40  ;;  %1818 = vmatpush.msra.mxu2 %v1789_v51  ;;  %v1186_v23 = vmax.f32 %v1154_v45, 0.0  ;;  %v1788_v63 = vmax.f32 %v1756_v58, 0.0  ;;  %v1804_v36 = vmax.f32 %v1772_v61, 0.0  ;;  %v7150_v58 = vld [vmem:[#allocation82_spill] sm:$0xff]  ;;  %v7153_v40 = vld [vmem:[#allocation37_spill] sm:$0xff] }
 0x1cf   : > { %1377 = vmatpush.msra.mxu1 %v1187_v26  ;;  %7143 = vst [vmem:[#allocation97_spill] sm:$0xff] %v5233_v2  ;;  %1895 = vmatpush.msra.mxu3 %v1805_v6  ;;  %v2136_v34 = vmul.f32 %v3929_v35, %v7152_v44  ;;  %v2648_v1 = vmul.f32 %v3938_v38, %v7152_v44  ;;  %v7154_v6 = vld [vmem:[#allocation22_spill] sm:$0xff] }
 0x1d0   : > { %7145 = vst [vmem:[#allocation31_spill] sm:$0xff] %v5236_v30  ;;  %1301 = vmatpush.msra.mxu0 %v1170_v19  ;;  %3349 = vset.pattern.permute.xlu1 %v7146_v18  ;;  %v2134_v31 = vmul.f32 %v3929_v35, %v7153_v40  ;;  %v2646_v26 = vmul.f32 %v3938_v38, %v7153_v40  ;;  %v7155_v19 = vld [vmem:[#allocation26_spill] sm:$0xff] }
 0x1d1   : > { %1378 = vmatpush.msra.mxu1 %v1186_v23  ;;  %1819 = vmatpush.msra.mxu2 %v1788_v63  ;;  %v2103_v45 = vmul.f32 %v3913_v10, %v7154_v6  ;;  %v2615_v61 = vmul.f32 %v3932_v4, %v7154_v6  ;;  %v2101_v29 = vmul.f32 %v3913_v10, %v7155_v19  ;;  %v7156_v23 = vld [vmem:[#allocation27_spill] sm:$0xff]  ;;  %v7158_v2 = vld [vmem:[#allocation102_spill] sm:$0xff] }
 0x1d2   : > { %1896 = vmatpush.msra.mxu3 %v1804_v36  ;;  %v5239_v56 = vpop.permute.xlu1 %902  ;;  %3350 = vset.pattern.permute.xlu2 %v7146_v18  ;;  %v2613_v0 = vmul.f32 %v3932_v4, %v7155_v19  ;;  %v591_v63 = vmul.f32 %v3904_v3, %v7156_v23  ;;  %v1593_v36 = vmul.f32 %v3907_v8, %v7156_v23  ;;  %v7157_v18 = vld [vmem:[#allocation56_spill] sm:$0xff] }
 0x1d3   : > { %v2219_v57 = vmul.f32 %v4346_v7, %v5239_v56  ;;  %v2731_v33 = vmul.f32 %v4349_v60, %v5239_v56  ;;  %v1028_v41 = vpop.permute.xlu2 %1027  ;;  %v1626_v10 = vmul.f32 %v3926_v25, %v7157_v18  ;;  %v2168_v4 = vadd.f32 %v2136_v34, %v2103_v45 }
 0x1d4   : > { %v5247_v21 = vadd.f32 %v7147_v46, %v1028_v41  ;;  %v5250_v62 = vadd.f32 %v7148_v32, %v1028_v41  ;;  %v2680_v46 = vadd.f32 %v2648_v1, %v2615_v61  ;;  %v2678_v30 = vadd.f32 %v2646_v26, %v2613_v0  ;;  %v7159_v26 = vld [vmem:[#allocation47_spill] sm:$0xff]  ;;  %v7160_v0 = vld [vmem:[#allocation68_spill] sm:$0xff] }
 0x1d5   : > { %v5253_v53 = vadd.f32 %v2219_v57, %v7150_v58  ;;  %v5256_v27 = vadd.f32 %v2731_v33, %v7151_v28  ;;  %v752_v57 = vmul.f32 %v3923_v24, %v7157_v18  ;;  %v2166_v28 = vadd.f32 %v2134_v31, %v2101_v29 }
 0x1d6   : > { %7149 = vst [vmem:[#allocation32_spill] sm:$0xff] %v5250_v62  ;;  %v945_v23 = vmul.f32 %v4332_v49, %v7158_v2  ;;  %v1691_v14 = vmul.f32 %v4335_v55, %v7158_v2  ;;  %v1658_v61 = vadd.f32 %v1626_v10, %v1593_v36  ;;  %v1136_v29 = vadd.f32 %v1028_v41, %v7159_v26 }
 0x1d7   : > { %v784_v45 = vadd.f32 %v752_v57, %v591_v63  ;;  %v1754_v13 = vadd.f32 %v7160_v0, %v1028_v41  ;;  %v7161_v57 = vld [vmem:[#allocation93_spill] sm:$0xff]  ;;  %v1591_v0 = vmul.f32 %v3907_v8, %v7154_v6 }
 0x1d8   : > { %v1723_v20 = vadd.f32 %v1691_v14, %v1658_v61  ;;  %v1168_v41 = vmax.f32 %v1136_v29, 0.0  ;;  %v7164_v61 = vld [vmem:[#allocation41_spill] sm:$0xff]  ;;  %v589_v29 = vmul.f32 %v3904_v3, %v7154_v6 }
 0x1d9   : > { %v977_v42 = vadd.f32 %v945_v23, %v784_v45 }
 0x1db   : > { %v5266_v51 = vpop.permute.xlu1 %830 }
 0x1dc   : > { %v2201_v35 = vmul.f32 %v4346_v7, %v5266_v51  ;;  %v2713_v38 = vmul.f32 %v4349_v60, %v5266_v51  ;;  %v5288_v33 = vpop.permute.xlu2 %822 }
 0x1dd   : > { %v2199_v32 = vmul.f32 %v4346_v7, %v5288_v33  ;;  %v2711_v58 = vmul.f32 %v4349_v60, %v5288_v33 }
 0x1de   : > { %v5298_v22 = vadd.f32 %v2201_v35, %v2168_v4  ;;  %v5300_v18 = vadd.f32 %v2713_v38, %v2680_v46  ;;  %v7162_v46 = vld [vmem:[#allocation94_spill] sm:$0xff] }
 0x1df   : > { %v5302_v34 = vadd.f32 %v2199_v32, %v2166_v28  ;;  %v5304_v1 = vadd.f32 %v2711_v58, %v2678_v30  ;;  %v961_v58 = vmul.f32 %v4332_v49, %v5239_v56 }
 0x1e4   : > { %v1032_v31 = vpop.permute.xlu1 %1031 }
 0x1e5   : > { %v1137_v50 = vadd.f32 %v1032_v31, %v977_v42  ;;  %v1755_v62 = vadd.f32 %v1723_v20, %v1032_v31  ;;  %v5309_v2 = vadd.f32 %v5006_v12, %v1032_v31  ;;  %v5312_v35 = vadd.f32 %v5008_v47, %v1032_v31  ;;  %v1092_v38 = vpop.permute.xlu2 %1091  ;;  %v7165_v31 = vld [vmem:[#allocation13_spill] sm:$0xff] }
 0x1e6   : > { %v5315_v63 = vadd.f32 %v5205_v43, %v1092_v38  ;;  %v5318_v14 = vadd.f32 %v5208_v54, %v1092_v38  ;;  %v1786_v42 = vmax.f32 %v1754_v13, 0.0  ;;  %v960_v54 = vmul.f32 %v4332_v49, %v5176_v16 }
 0x1e7   : > { %v1169_v30 = vmax.f32 %v1137_v50, 0.0  ;;  %v1787_v4 = vmax.f32 %v1755_v62, 0.0  ;;  %v1088_v50 = vpop.permute.xlu0 %1087  ;;  %v1706_v13 = vmul.f32 %v4335_v55, %v5176_v16 }
 0x1e8   : > { %v992_v16 = vadd.f32 %v960_v54, %v7164_v61  ;;  %v1624_v54 = vmul.f32 %v3926_v25, %v7152_v44 }
 0x1e9   : > { %1302 = vmatpush.msra.mxu0 %v1169_v30  ;;  %1820 = vmatpush.msra.mxu2 %v1787_v4  ;;  %v1738_v26 = vadd.f32 %v1706_v13, %v7165_v31  ;;  %v7166_v30 = vld [vmem:[#allocation76_spill] sm:$0xff]  ;;  %v7167_v4 = vld [vmem:[#allocation77_spill] sm:$0xff] }
 0x1eb   : > { %1303 = vmatpush.msra.mxu0 %v1168_v41  ;;  %1821 = vmatpush.msra.mxu2 %v1786_v42  ;;  %v7168_v42 = vld [vmem:[#allocation48_spill] sm:$0xff] }
 0x1ed   : > { %v895_v12 = vpop.permute.xlu1 %894  ;;  %v1020_v36 = vpop.permute.xlu2 %1019 }
 0x1ee   : > { %v2217_v20 = vmul.f32 %v4346_v7, %v895_v12  ;;  %v2729_v47 = vmul.f32 %v4349_v60, %v895_v12  ;;  %v5323_v62 = vadd.f32 %v5010_v15, %v1020_v36  ;;  %v5326_v43 = vadd.f32 %v5012_v52, %v1020_v36 }
 0x1ef   : > { %v1707_v15 = vmul.f32 %v4335_v55, %v5239_v56  ;;  %v959_v28 = vmul.f32 %v4332_v49, %v895_v12  ;;  %v1705_v52 = vmul.f32 %v4335_v55, %v895_v12  ;;  %v993_v56 = vadd.f32 %v961_v58, %v7166_v30  ;;  %v7170_v30 = vld [vmem:[#allocation91_spill] sm:$0xff] }
 0x1f0   : > { %v2249_v10 = vadd.f32 %v2217_v20, %v7161_v57  ;;  %v2761_v32 = vadd.f32 %v2729_v47, %v7162_v46  ;;  %v7169_v20 = vld [vmem:[#allocation15_spill] sm:$0xff]  ;;  %v750_v57 = vmul.f32 %v3923_v24, %v7152_v44  ;;  %v1770_v46 = vadd.f32 %v1738_v26, %v1092_v38 }
 0x1f1   : > { %v1739_v41 = vadd.f32 %v1707_v15, %v7167_v4  ;;  %v991_v12 = vadd.f32 %v959_v28, %v7168_v42  ;;  %v1737_v47 = vadd.f32 %v1705_v52, %v7169_v20  ;;  %v943_v28 = vmul.f32 %v4332_v49, %v5266_v51 }
 0x1f2   : > { %v5340_v23 = vadd.f32 %v2249_v10, %v1088_v50  ;;  %v5342_v45 = vadd.f32 %v2761_v32, %v1088_v50  ;;  %v1152_v10 = vadd.f32 %v1092_v38, %v992_v16  ;;  %v1689_v52 = vmul.f32 %v4335_v55, %v5266_v51 }
 0x1f3   : > { %v1151_v26 = vadd.f32 %v1088_v50, %v991_v12  ;;  %v1802_v51 = vmax.f32 %v1770_v46, 0.0  ;;  %v782_v42 = vadd.f32 %v750_v57, %v589_v29  ;;  %v1656_v20 = vadd.f32 %v1624_v54, %v1591_v0 }
 0x1f4   : > { %7163 = vst [vmem:[#allocation33_spill] sm:$0xff] %v5342_v45  ;;  %v1752_v29 = vadd.f32 %v4998_v17, %v1020_v36 }
 0x1f6   : > { %v1096_v13 = vpop.permute.xlu1 %1095  ;;  %v5358_v32 = vpop.permute.xlu2 %882 }
 0x1f7   : > { %v1153_v6 = vadd.f32 %v1096_v13, %v993_v56  ;;  %v1771_v61 = vadd.f32 %v1739_v41, %v1096_v13  ;;  %v5361_v58 = vadd.f32 %v5253_v53, %v1096_v13  ;;  %v5364_v15 = vadd.f32 %v5256_v27, %v1096_v13  ;;  %v7171_v27 = vld [vmem:[#allocation92_spill] sm:$0xff] }
 0x1f8   : > { %v2214_v44 = vmul.f32 %v4346_v7, %v5358_v32  ;;  %v2726_v38 = vmul.f32 %v4349_v60, %v5358_v32  ;;  %v1769_v53 = vadd.f32 %v1737_v47, %v1088_v50  ;;  %v1184_v41 = vmax.f32 %v1152_v10, 0.0 }
 0x1f9   : > { %v1185_v16 = vmax.f32 %v1153_v6, 0.0  ;;  %v1803_v31 = vmax.f32 %v1771_v61, 0.0  ;;  %v1183_v13 = vmax.f32 %v1151_v26, 0.0  ;;  %v975_v6 = vadd.f32 %v943_v28, %v782_v42 }
 0x1fa   : > { %v5375_v56 = vadd.f32 %v2214_v44, %v7170_v30  ;;  %v5378_v4 = vadd.f32 %v2726_v38, %v7171_v27  ;;  %v1801_v45 = vmax.f32 %v1769_v53, 0.0  ;;  %v1721_v61 = vadd.f32 %v1689_v52, %v1656_v20  ;;  %v7172_v52 = vld [vmem:[#allocation66_spill] sm:$0xff]  ;;  %v7174_v53 = vld [vmem:[#allocation89_spill] sm:$0xff] }
 0x1fb   : > { %1379 = vmatpush.msra.mxu1 %v1185_v16  ;;  %1897 = vmatpush.msra.mxu3 %v1803_v31  ;;  %v1134_v10 = vadd.f32 %v1020_v36, %v4996_v59  ;;  %v1784_v59 = vmax.f32 %v1752_v29, 0.0  ;;  %v7173_v36 = vld [vmem:[#allocation10_spill] sm:$0xff]  ;;  %v1622_v42 = vmul.f32 %v3926_v25, %v7153_v40 }
 0x1fd   : > { %1380 = vmatpush.msra.mxu1 %v1184_v41  ;;  %1898 = vmatpush.msra.mxu3 %v1802_v51  ;;  %v1166_v31 = vmax.f32 %v1134_v10, 0.0  ;;  %v748_v51 = vmul.f32 %v3923_v24, %v7153_v40  ;;  %v1589_v24 = vmul.f32 %v3907_v8, %v7155_v19  ;;  %v7176_v10 = vld [vmem:[#allocation88_spill] sm:$0xff] }
 0x1fe   : > { %v5380_v12 = vpop.permute.xlu1 %1023 }
 0x1ff   : > { %1381 = vmatpush.msra.mxu1 %v1183_v13  ;;  %1899 = vmatpush.msra.mxu3 %v1801_v45  ;;  %v1135_v50 = vadd.f32 %v5380_v12, %v975_v6  ;;  %v1753_v47 = vadd.f32 %v1721_v61, %v5380_v12  ;;  %v1084_v44 = vpop.permute.xlu2 %1083  ;;  %v941_v6 = vmul.f32 %v4332_v49, %v5288_v33 }
 0x200   : > { %v1150_v54 = vadd.f32 %v1084_v44, %v5073_v9  ;;  %v1768_v46 = vadd.f32 %v5076_v5, %v1084_v44  ;;  %v5389_v28 = vadd.f32 %v5090_v11, %v1084_v44  ;;  %v5392_v45 = vadd.f32 %v7172_v52, %v1084_v44  ;;  %v7178_v52 = vld [vmem:[#allocation58_spill] sm:$0xff] }
 0x201   : > { %v1167_v0 = vmax.f32 %v1135_v50, 0.0  ;;  %v1785_v57 = vmax.f32 %v1753_v47, 0.0  ;;  %v1687_v61 = vmul.f32 %v4335_v55, %v5288_v33  ;;  %v587_v50 = vmul.f32 %v3904_v3, %v7155_v19  ;;  %v7175_v47 = vld [vmem:[#allocation87_spill] sm:$0xff]  ;;  %v7177_v3 = vld [vmem:[#allocation57_spill] sm:$0xff]  ;;  %v5436_v19 = vpop.permute.xlu0 %1007 }
 0x202   : > { %v1182_v38 = vmax.f32 %v1150_v54, 0.0  ;;  %v1800_v16 = vmax.f32 %v1768_v46, 0.0  ;;  %v1654_v33 = vadd.f32 %v1622_v42, %v1589_v24  ;;  %v7181_v24 = vld [vmem:[#allocation17_spill] sm:$0xff] }
 0x203   : > { %1304 = vmatpush.msra.mxu0 %v1167_v0  ;;  %1822 = vmatpush.msra.mxu2 %v1785_v57  ;;  %v780_v0 = vadd.f32 %v748_v51, %v587_v50 }
 0x204   : > { %1382 = vmatpush.msra.mxu1 %v1182_v38  ;;  %1900 = vmatpush.msra.mxu3 %v1800_v16  ;;  %v1719_v54 = vadd.f32 %v1687_v61, %v1654_v33 }
 0x205   : > { %1305 = vmatpush.msra.mxu0 %v1166_v31  ;;  %1823 = vmatpush.msra.mxu2 %v1784_v59  ;;  %v973_v57 = vadd.f32 %v941_v6, %v780_v0  ;;  %v7179_v59 = vld [vmem:[#allocation67_spill] sm:$0xff] }
 0x207   : > { %v887_v17 = vpop.permute.xlu1 %886  ;;  %v5396_v11 = vpop.permute.xlu2 %1011 }
 0x208   : > { %v2215_v9 = vmul.f32 %v4346_v7, %v887_v17  ;;  %v2727_v5 = vmul.f32 %v4349_v60, %v887_v17 }
 0x20a   : > { %v5399_v26 = vadd.f32 %v2215_v9, %v7173_v36  ;;  %v5402_v30 = vadd.f32 %v2727_v5, %v7174_v53  ;;  %v1132_v9 = vadd.f32 %v5396_v11, %v7179_v59  ;;  %v7180_v5 = vld [vmem:[#allocation72_spill] sm:$0xff] }
 0x20b   : > { %v1750_v36 = vadd.f32 %v7180_v5, %v5396_v11  ;;  %v7185_v59 = vld [vmem:[#allocation16_spill] sm:$0xff] }
 0x20c   : > { %v1164_v6 = vmax.f32 %v1132_v9, 0.0  ;;  %v2818_v9 = vmax.f32 %v7185_v59, 0.0  ;;  %v7186_v5 = vld [vmem:[#allocation28_spill] sm:$0xff]  ;;  %v956_v59 = vmul.f32 %v4332_v49, %v5358_v32 }
 0x20d   : > { %v1782_v61 = vmax.f32 %v1750_v36, 0.0  ;;  %v2305_v36 = vmax.f32 %v7186_v5, 0.0 }
 0x20f   : > { %v5404_v27 = vpop.permute.xlu1 %814 }
 0x210   : > { %v5406_v41 = vpop.permute.xlu2 %874  ;;  %v939_v25 = vmul.f32 %v4332_v49, %v5404_v27  ;;  %v1685_v40 = vmul.f32 %v4335_v55, %v5404_v27 }
 0x211   : > { %v2212_v20 = vmul.f32 %v4346_v7, %v5406_v41  ;;  %v2724_v13 = vmul.f32 %v4349_v60, %v5406_v41 }
 0x212   : > { %v971_v46 = vadd.f32 %v939_v25, %v7177_v3  ;;  %v1717_v8 = vadd.f32 %v1685_v40, %v7178_v52  ;;  %v7183_v3 = vld [vmem:[#allocation46_spill] sm:$0xff]  ;;  %v957_v52 = vmul.f32 %v4332_v49, %v887_v17 }
 0x213   : > { %v5429_v44 = vadd.f32 %v2212_v20, %v7175_v47  ;;  %v5432_v29 = vadd.f32 %v2724_v13, %v7176_v10 }
 0x214   : > { %v1131_v20 = vadd.f32 %v5436_v19, %v971_v46  ;;  %v1749_v13 = vadd.f32 %v1717_v8, %v5436_v19  ;;  %v2819_v46 = vmax.f32 %v7183_v3, 0.0  ;;  %v1703_v8 = vmul.f32 %v4335_v55, %v887_v17  ;;  %v5476_v17 = vld [vmem:[%s6781_s2 + $0x10] sm:$0xff] }
 0x216   : > { %v1163_v40 = vmax.f32 %v1131_v20, 0.0  ;;  %v1781_v47 = vmax.f32 %v1749_v13, 0.0  ;;  %v7188_v20 = vld [vmem:[#allocation98_spill] sm:$0xff] }
 0x217   : > { %v2304_v13 = vmax.f32 %v7188_v20, 0.0  ;;  %v7196_v20 = vld [vmem:[#allocation73_spill] sm:$0xff] }
 0x218   : > { %v5438_v38 = vpop.permute.xlu1 %1015 }
 0x219   : > { %v1133_v16 = vadd.f32 %v5438_v38, %v973_v57  ;;  %v1751_v31 = vadd.f32 %v1719_v54, %v5438_v38  ;;  %v5446_v53 = vpop.permute.xlu2 %1003  ;;  %v5459_v57 = vld [vmem:[%s6781_s2] sm:$0xff] }
 0x21a   : > { %v1130_v50 = vadd.f32 %v5446_v53, %v5185_v48  ;;  %v1748_v25 = vadd.f32 %v7181_v24, %v5446_v53  ;;  %v7182_v48 = vld [vmem:[#allocation36_spill] sm:$0xff] }
 0x21b   : > { %v1165_v51 = vmax.f32 %v1133_v16, 0.0  ;;  %v1783_v42 = vmax.f32 %v1751_v31, 0.0  ;;  %v2307_v54 = vmax.f32 %v7182_v48, 0.0  ;;  %v7184_v16 = vld [vmem:[#allocation55_spill] sm:$0xff]  ;;  %v7193_v48 = vld [vmem:[#allocation81_spill] sm:$0xff] }
 0x21c   : > { %v1162_v0 = vmax.f32 %v1130_v50, 0.0  ;;  %v1780_v33 = vmax.f32 %v1748_v25, 0.0  ;;  %v2306_v31 = vmax.f32 %v7184_v16, 0.0  ;;  %v7190_v50 = vld [vmem:[#allocation14_spill] sm:$0xff]  ;;  %v7191_v25 = vld [vmem:[#allocation19_spill] sm:$0xff]  ;;  %v7194_v16 = vld [vmem:[#allocation25_spill] sm:$0xff] }
 0x21d   : > { %1306 = vmatpush.msra.mxu0 %v1165_v51  ;;  %1824 = vmatpush.msra.mxu2 %v1783_v42  ;;  %v7187_v51 = vld [vmem:[#allocation65_spill] sm:$0xff]  ;;  %v989_v24 = vadd.f32 %v957_v52, %v7190_v50  ;;  %v2302_v52 = vmax.f32 %v7194_v16, 0.0  ;;  %v7198_v50 = vld [vmem:[#allocation11_spill] sm:$0xff]  ;;  %v2777_v16 = vadd.f32 %v5300_v18, %v5380_v12 }
 0x21e   : > { %v2817_v42 = vmax.f32 %v7187_v51, 0.0  ;;  %v2301_v51 = vmax.f32 %v5221_v39, 0.0  ;;  %v2197_v39 = vmul.f32 %v4346_v7, %v5404_v27 }
 0x21f   : > { %1307 = vmatpush.msra.mxu0 %v1164_v6  ;;  %1825 = vmatpush.msra.mxu2 %v1782_v61  ;;  %v7189_v6 = vld [vmem:[#allocation21_spill] sm:$0xff] }
 0x220   : > { %v2816_v61 = vmax.f32 %v7189_v6, 0.0  ;;  %v7197_v6 = vld [vmem:[#allocation30_spill] sm:$0xff] }
 0x221   : > { %v5454_v10 = vpop.permute.xlu1 %878  ;;  %1308 = vmatpush.msra.mxu0 %v1163_v40  ;;  %1826 = vmatpush.msra.mxu2 %v1781_v47  ;;  %v1735_v40 = vadd.f32 %v1703_v8, %v7191_v25  ;;  %v7199_v25 = vld [vmem:[#allocation20_spill] sm:$0xff] }
 0x222   : > { %v1701_v18 = vmul.f32 %v4335_v55, %v5454_v10 }
 0x223   : > { %1309 = vmatpush.msra.mxu0 %v1162_v0  ;;  %1827 = vmatpush.msra.mxu2 %v1780_v33  ;;  %v7192_v0 = vld [vmem:[#allocation80_spill] sm:$0xff] }
 0x224   : > { %1310 = vmatmul.f32.vlgmr.msra.gmra.mxu0 %v5459_v57  ;;  %1828 = vmatmul.f32.vlgmr.msra.gmra.mxu2 %v5459_v57  ;;  %v2303_v33 = vmax.f32 %v7192_v0, 0.0 }
 0x225   : > { %2324 = vmatpush.msrb.mxu0 %v2307_v54  ;;  %2836 = vmatpush.msrb.mxu2 %v2819_v46  ;;  %v2815_v54 = vmax.f32 %v7193_v48, 0.0  ;;  %v2265_v48 = vadd.f32 %v5298_v22, %v5380_v12  ;;  %v2298_v22 = vmax.f32 %v5247_v21, 0.0  ;;  %v7201_v21 = vld [vmem:[#allocation61_spill] sm:$0xff] }
 0x227   : > { %2325 = vmatpush.msrb.mxu0 %v2306_v31  ;;  %2837 = vmatpush.msrb.mxu2 %v2818_v9  ;;  %v7195_v31 = vld [vmem:[#allocation101_spill] sm:$0xff]  ;;  %v1702_v9 = vmul.f32 %v4335_v55, %v5358_v32  ;;  %v5501_v32 = vld [vmem:[%s6781_s2 + $0x20] sm:$0xff] }
 0x228   : > { %v2814_v8 = vmax.f32 %v7195_v31, 0.0  ;;  %v955_v31 = vmul.f32 %v4332_v49, %v5454_v10 }
 0x229   : > { %2326 = vmatpush.msrb.mxu0 %v2305_v36  ;;  %2838 = vmatpush.msrb.mxu2 %v2817_v42  ;;  %v2813_v42 = vmax.f32 %v5224_v37, 0.0  ;;  %v2709_v37 = vmul.f32 %v4349_v60, %v5404_v27  ;;  %v391_v27 = vld [vmem:[%s6782_s3] sm:$0xff] }
 0x22a   : > { %v5480_v47 = vpop.permute.xlu1 %1079  ;;  %1196 = vperm.xlu0 %3348, %v391_v27  }
 0x22b   : > { %2327 = vmatpush.msrb.mxu0 %v2304_v13  ;;  %2839 = vmatpush.msrb.mxu2 %v2816_v61  ;;  %v1149_v3 = vadd.f32 %v5480_v47, %v989_v24  ;;  %v1767_v46 = vadd.f32 %v1735_v40, %v5480_v47  ;;  %v2300_v13 = vmax.f32 %v7196_v20, 0.0  ;;  %v2812_v61 = vmax.f32 %v7197_v6, 0.0 }
 0x22c   : > { %1313 = vmatmul.f32.gmra.mxu0 %v5476_v17  ;;  %1831 = vmatmul.f32.gmra.mxu2 %v5476_v17  ;;  %v988_v24 = vadd.f32 %v956_v59, %v7198_v50  ;;  %v1734_v40 = vadd.f32 %v1702_v9, %v7199_v25  ;;  %v392_v59 = vld [vmem:[%s6782_s3 + $0x8] sm:$0xff]  ;;  %v1700_v9 = vmul.f32 %v4335_v55, %v5406_v41  ;;  %v2296_v55 = vmax.f32 %v5323_v62, 0.0  ;;  %v7206_v62 = vld [vmem:[#allocation60_spill] sm:$0xff] }
 0x22d   : > { %2328 = vmatpush.msrb.mxu0 %v2303_v33  ;;  %2840 = vmatpush.msrb.mxu2 %v2815_v54  ;;  %v1181_v5 = vmax.f32 %v1149_v3, 0.0  ;;  %v1799_v36 = vmax.f32 %v1767_v46, 0.0  ;;  %v2299_v33 = vmax.f32 %v5309_v2, 0.0  ;;  %v2811_v54 = vmax.f32 %v5312_v35, 0.0  ;;  %v7200_v35 = vld [vmem:[#allocation32_spill] sm:$0xff] }
 0x22e   : > { %v954_v2 = vmul.f32 %v4332_v49, %v5406_v41  ;;  %1201 = vperm.xlu1 %3349, %v392_v59   ;;  %v2297_v49 = vmax.f32 %v2265_v48, 0.0  ;;  %v2263_v20 = vadd.f32 %v5302_v34, %v5438_v38  ;;  %v7203_v41 = vld [vmem:[#allocation43_spill] sm:$0xff]  ;;  %v2808_v50 = vmax.f32 %v5326_v43, 0.0  ;;  %v5552_v34 = vld [vmem:[%s6781_s2 + $0x30] sm:$0xff]  ;;  %v7207_v48 = vld [vmem:[#allocation85_spill] sm:$0xff] }
 0x22f   : > { %2329 = vmatpush.msrb.mxu0 %v2302_v52  ;;  %2841 = vmatpush.msrb.mxu2 %v2814_v8  ;;  %v2810_v52 = vmax.f32 %v7200_v35, 0.0  ;;  %v2262_v6 = vadd.f32 %v7203_v41, %v5396_v11  ;;  %v5586_v41 = vld [vmem:[%s6781_s2 + $0x40] sm:$0xff] }
 0x230   : > { %1383 = vmatpush.msra.mxu1 %v1181_v5  ;;  %1901 = vmatpush.msra.mxu3 %v1799_v36  ;;  %v2229_v5 = vadd.f32 %v2197_v39, %v7201_v21  ;;  %v7202_v36 = vld [vmem:[#allocation62_spill] sm:$0xff]  ;;  %v986_v43 = vadd.f32 %v954_v2, %v7207_v48 }
 0x231   : > { %2330 = vmatpush.msrb.mxu0 %v2301_v51  ;;  %2842 = vmatpush.msrb.mxu2 %v2813_v42  ;;  %v2741_v51 = vadd.f32 %v2709_v37, %v7202_v36  ;;  %v2809_v42 = vmax.f32 %v2777_v16, 0.0  ;;  %v2294_v2 = vmax.f32 %v2262_v6, 0.0  ;;  %v7213_v6 = vld [vmem:[#allocation51_spill] sm:$0xff] }
 0x232   : > { %v5509_v0 = vpop.permute.xlu1 %1075  ;;  %v2261_v37 = vadd.f32 %v2229_v5, %v5436_v19 }
 0x233   : > { %2331 = vmatpush.msrb.mxu0 %v2300_v13  ;;  %2843 = vmatpush.msrb.mxu2 %v2812_v61  ;;  %v1148_v3 = vadd.f32 %v5509_v0, %v988_v24  ;;  %v1766_v46 = vadd.f32 %v1734_v40, %v5509_v0  ;;  %v2775_v13 = vadd.f32 %v5304_v1, %v5438_v38  ;;  %v5546_v61 = vpop.permute.xlu2 %1067  ;;  %v7204_v1 = vld [vmem:[#allocation103_spill] sm:$0xff] }
 0x234   : > { %1316 = vmatmul.f32.gmra.mxu0 %v5501_v32  ;;  %1834 = vmatmul.f32.gmra.mxu2 %v5501_v32  ;;  %v2774_v38 = vadd.f32 %v7204_v1, %v5396_v11  ;;  %v7205_v24 = vld [vmem:[#allocation59_spill] sm:$0xff]  ;;  %v1733_v40 = vadd.f32 %v1701_v18, %v7206_v62  ;;  %v7209_v18 = vld [vmem:[#allocation54_spill] sm:$0xff]  ;;  %v7214_v1 = vld [vmem:[#allocation24_spill] sm:$0xff] }
 0x235   : > { %2332 = vmatpush.msrb.mxu0 %v2299_v33  ;;  %2844 = vmatpush.msrb.mxu2 %v2811_v54  ;;  %v1180_v12 = vmax.f32 %v1148_v3, 0.0  ;;  %v1798_v8 = vmax.f32 %v1766_v46, 0.0  ;;  %v987_v25 = vadd.f32 %v955_v31, %v7205_v24  ;;  %v2773_v33 = vadd.f32 %v2741_v51, %v5436_v19  ;;  %v7208_v54 = vld [vmem:[#allocation86_spill] sm:$0xff]  ;;  %v5577_v51 = vld [vmem:[%s6781_s2 + $0x8] sm:$0xff]  ;;  %v394_v24 = vld [vmem:[%s6782_s3 + $0x18] sm:$0xff] }
 0x236   : > { %v1732_v3 = vadd.f32 %v1700_v9, %v7208_v54  ;;  %v2295_v46 = vmax.f32 %v2263_v20, 0.0  ;;  %v2807_v16 = vmax.f32 %v2775_v13, 0.0  ;;  %v2806_v35 = vmax.f32 %v2774_v38, 0.0  ;;  %v7210_v9 = vld [vmem:[#allocation99_spill] sm:$0xff]  ;;  %v7212_v13 = vld [vmem:[#allocation50_spill] sm:$0xff]  ;;  %1211 = vperm.xlu1 %3349, %v394_v24  }
 0x237   : > { %2333 = vmatpush.msrb.mxu0 %v2298_v22  ;;  %2845 = vmatpush.msrb.mxu2 %v2810_v52  ;;  %v1146_v22 = vadd.f32 %v5546_v61, %v986_v43  ;;  %v2805_v59 = vmax.f32 %v2773_v33, 0.0  ;;  %v2772_v21 = vadd.f32 %v7210_v9, %v5446_v53  ;;  %v2834_v38 = vmax.f32 %v7214_v1, 0.0  ;;  %v7217_v33 = vld [vmem:[#allocation23_spill] sm:$0xff]  ;;  %v7218_v43 = vld [vmem:[#allocation29_spill] sm:$0xff] }
 0x238   : > { %1384 = vmatpush.msra.mxu1 %v1180_v12  ;;  %1902 = vmatpush.msra.mxu3 %v1798_v8  ;;  %v1764_v19 = vadd.f32 %v1732_v3, %v5546_v61  ;;  %v2260_v12 = vadd.f32 %v7209_v18, %v5446_v53  ;;  %v2293_v8 = vmax.f32 %v2261_v37, 0.0  ;;  %v2320_v48 = vmax.f32 %v7217_v33, 0.0  ;;  %v5602_v3 = vld [vmem:[%s6781_s2 + $0x18] sm:$0xff]  ;;  %v7228_v1 = vld [vmem:[#allocation63_spill] sm:$0xff] }
 0x239   : > { %2334 = vmatpush.msrb.mxu0 %v2297_v49  ;;  %2846 = vmatpush.msrb.mxu2 %v2809_v42  ;;  %v1178_v5 = vmax.f32 %v1146_v22, 0.0  ;;  %v7211_v42 = vld [vmem:[#allocation12_spill] sm:$0xff]  ;;  %v2804_v53 = vmax.f32 %v2772_v21, 0.0  ;;  %v2832_v54 = vmax.f32 %v7218_v43, 0.0  ;;  %v7226_v21 = vld [vmem:[#allocation31_spill] sm:$0xff]  ;;  %v2824_v24 = vmax.f32 %v5392_v45, 0.0 }
 0x23a   : > { %v5558_v39 = vpop.permute.xlu1 %1071  ;;  %v1796_v36 = vmax.f32 %v1764_v19, 0.0  ;;  %v2292_v49 = vmax.f32 %v2260_v12, 0.0  ;;  %v2323_v20 = vmax.f32 %v7211_v42, 0.0  ;;  %v5609_v22 = vld [vmem:[%s6781_s2 + $0x50] sm:$0xff]  ;;  %v7221_v19 = vld [vmem:[#allocation18_spill] sm:$0xff]  ;;  %v7224_v12 = vld [vmem:[#allocation71_spill] sm:$0xff]  ;;  %v2788_v33 = vadd.f32 %v5432_v29, %v5546_v61 }
 0x23b   : > { %2335 = vmatpush.msrb.mxu0 %v2296_v55  ;;  %2847 = vmatpush.msrb.mxu2 %v2808_v50  ;;  %v1147_v11 = vadd.f32 %v5558_v39, %v987_v25  ;;  %v1765_v27 = vadd.f32 %v1733_v40, %v5558_v39  ;;  %v2835_v55 = vmax.f32 %v7212_v13, 0.0  ;;  %v2322_v50 = vmax.f32 %v7213_v6, 0.0  ;;  %v7215_v25 = vld [vmem:[#allocation38_spill] sm:$0xff]  ;;  %v7216_v40 = vld [vmem:[#allocation35_spill] sm:$0xff]  ;;  %v5671_v45 = vld [vmem:[%s6781_s2 + $0x70] sm:$0xff] }
 0x23c   : > { %1319 = vmatmul.f32.gmra.mxu0 %v5552_v34  ;;  %1837 = vmatmul.f32.gmra.mxu2 %v5552_v34  ;;  %v2321_v62 = vmax.f32 %v7215_v25, 0.0  ;;  %v2833_v37 = vmax.f32 %v7216_v40, 0.0  ;;  %v2827_v42 = vmax.f32 %v5364_v15, 0.0  ;;  %v2725_v13 = vmul.f32 %v4349_v60, %v5454_v10  ;;  %v5689_v29 = vld [vmem:[%s6781_s2 + $0x48] sm:$0xff] }
 0x23d   : > { %2336 = vmatpush.msrb.mxu0 %v2295_v46  ;;  %2848 = vmatpush.msrb.mxu2 %v2807_v16  ;;  %v1179_v52 = vmax.f32 %v1147_v11, 0.0  ;;  %v1797_v31 = vmax.f32 %v1765_v27, 0.0  ;;  %v7219_v46 = vld [vmem:[#allocation100_spill] sm:$0xff]  ;;  %v7220_v11 = vld [vmem:[#allocation75_spill] sm:$0xff]  ;;  %v2826_v15 = vmax.f32 %v5318_v14, 0.0  ;;  %v2313_v60 = vmax.f32 %v5340_v23, 0.0 }
 0x23e   : > { %v2319_v16 = vmax.f32 %v7219_v46, 0.0  ;;  %v2831_v27 = vmax.f32 %v7220_v11, 0.0  ;;  %v2279_v14 = vadd.f32 %v5399_v26, %v5480_v47  ;;  %v2791_v6 = vadd.f32 %v5402_v30, %v5480_v47  ;;  %v5661_v23 = vld [vmem:[%s6781_s2 + $0x38] sm:$0xff]  ;;  %v395_v46 = vld [vmem:[%s6782_s3 + $0x20] sm:$0xff]  ;;  %v5711_v11 = vld [vmem:[%s6781_s2 + $0x90] sm:$0xff] }
 0x23f   : > { %2337 = vmatpush.msrb.mxu0 %v2294_v2  ;;  %2849 = vmatpush.msrb.mxu2 %v2806_v35  ;;  %v2318_v2 = vmax.f32 %v7221_v19, 0.0  ;;  %v7222_v35 = vld [vmem:[#allocation44_spill] sm:$0xff]  ;;  %v2278_v26 = vadd.f32 %v5375_v56, %v5509_v0  ;;  %v2790_v30 = vadd.f32 %v5378_v4, %v5509_v0  ;;  %v2276_v0 = vadd.f32 %v5429_v44, %v5546_v61  ;;  %v5694_v61 = vld [vmem:[%s6781_s2 + $0x80] sm:$0xff] }
 0x240   : > { %1385 = vmatpush.msra.mxu1 %v1179_v52  ;;  %1903 = vmatpush.msra.mxu3 %v1797_v31  ;;  %v2830_v52 = vmax.f32 %v7222_v35, 0.0  ;;  %v7223_v31 = vld [vmem:[#allocation95_spill] sm:$0xff]  ;;  %v2311_v25 = vmax.f32 %v2279_v14, 0.0  ;;  %v2820_v44 = vmax.f32 %v2788_v33, 0.0  ;;  %v5725_v19 = vld [vmem:[%s6781_s2 + $0xa0] sm:$0xff]  ;;  %v5737_v35 = vld [vmem:[%s6781_s2 + $0x78] sm:$0xff] }
 0x241   : > { %2338 = vmatpush.msrb.mxu0 %v2293_v8  ;;  %2850 = vmatpush.msrb.mxu2 %v2805_v59  ;;  %v2317_v18 = vmax.f32 %v7223_v31, 0.0  ;;  %v2829_v8 = vmax.f32 %v7224_v12, 0.0  ;;  %v7225_v59 = vld [vmem:[#allocation97_spill] sm:$0xff]  ;;  %v2310_v56 = vmax.f32 %v2278_v26, 0.0  ;;  %v2822_v4 = vmax.f32 %v2790_v30, 0.0  ;;  %v5757_v12 = vld [vmem:[%s6781_s2 + $0x88] sm:$0xff] }
 0x242   : > { %1386 = vmatpush.msra.mxu1 %v1178_v5  ;;  %1904 = vmatpush.msra.mxu3 %v1796_v36  ;;  %v2316_v9 = vmax.f32 %v7225_v59, 0.0  ;;  %v2828_v5 = vmax.f32 %v7226_v21, 0.0  ;;  %v5624_v36 = vld [vmem:[%s6781_s2 + $0x28] sm:$0xff]  ;;  %v406_v31 = vld [vmem:[%s6782_s3 + $0x78] sm:$0xff] }
 0x243   : > { %1387 = vmatmul.f32.vlgmr.msra.gmra.mxu1 %v5577_v51  ;;  %1905 = vmatmul.f32.vlgmr.msra.gmra.mxu3 %v5577_v51  ;;  %v402_v59 = vld [vmem:[%s6782_s3 + $0x58] sm:$0xff]  ;;  %v5868_v30 = vld [vmem:[%s6781_s2 + $0xe8] sm:$0xff] }
 0x244   : > { %2339 = vmatpush.msrb.mxu0 %v2292_v49  ;;  %2401 = vmatpush.msrb.mxu1 %v2323_v20  ;;  %v2315_v49 = vmax.f32 %v5361_v58, 0.0  ;;  %v5631_v20 = vld [vmem:[%s6781_s2 + $0x60] sm:$0xff]  ;;  %v2314_v58 = vmax.f32 %v5315_v63, 0.0  ;;  %v5777_v21 = vld [vmem:[%s6781_s2 + $0x98] sm:$0xff]  ;;  %7238 = vst [vmem:[#allocation53_spill] sm:$0xff] %v5868_v30 }
 0x245   : > { %2851 = vmatpush.msrb.mxu2 %v2804_v53  ;;  %2913 = vmatpush.msrb.mxu3 %v2835_v55  ;;  %v2213_v53 = vmul.f32 %v4346_v7, %v5454_v10  ;;  %v393_v55 = vld [vmem:[%s6782_s3 + $0x10] sm:$0xff]  ;;  %v396_v7 = vld [vmem:[%s6782_s3 + $0x28] sm:$0xff]  ;;  %v7227_v10 = vld [vmem:[#allocation33_spill] sm:$0xff] }
 0x246   : > { %1322 = vmatmul.f32.gmra.mxu0 %v5586_v41  ;;  %1840 = vmatmul.f32.gmra.mxu2 %v5586_v41  ;;  %v2825_v63 = vmax.f32 %v7227_v10, 0.0  ;;  %v5833_v10 = vld [vmem:[%s6781_s2 + $0xc8] sm:$0xff] }
 0x247   : > { %2402 = vmatpush.msrb.mxu1 %v2322_v50  ;;  %2914 = vmatpush.msrb.mxu3 %v2834_v38  ;;  %v2312_v50 = vmax.f32 %v5389_v28, 0.0  ;;  %v2245_v38 = vadd.f32 %v2213_v53, %v7228_v1  ;;  %v7229_v28 = vld [vmem:[#allocation64_spill] sm:$0xff]  ;;  %v5797_v53 = vld [vmem:[%s6781_s2 + $0xa8] sm:$0xff]  ;;  %7234 = vst [vmem:[#allocation90_spill] sm:$0xff] %v5833_v10 }
 0x248   : > { %1206 = vperm.xlu2 %3350, %v393_v55   ;;  %1221 = vperm.xlu0 %3348, %v396_v7   ;;  %v2757_v47 = vadd.f32 %v2725_v13, %v7229_v28  ;;  %7230 = vst [vmem:[#allocation34_spill] sm:$0xff] %v5797_v53  ;;  %v5802_v13 = vld [vmem:[%s6781_s2 + $0xe0] sm:$0xff]  ;;  %v5819_v55 = vld [vmem:[%s6781_s2 + $0xf0] sm:$0xff] }
 0x249   : > { %2403 = vmatpush.msrb.mxu1 %v2321_v62  ;;  %2915 = vmatpush.msrb.mxu3 %v2833_v37  ;;  %v2823_v62 = vmax.f32 %v2791_v6, 0.0  ;;  %v2277_v40 = vadd.f32 %v2245_v38, %v5558_v39  ;;  %7231 = vst [vmem:[#allocation39_spill] sm:$0xff] %v5802_v13  ;;  %v405_v7 = vld [vmem:[%s6782_s3 + $0x70] sm:$0xff]  ;;  %v407_v38 = vld [vmem:[%s6782_s3 + $0x80] sm:$0xff] }
 0x24a   : > { %v2789_v37 = vadd.f32 %v2757_v47, %v5558_v39  ;;  %7233 = vst [vmem:[#allocation45_spill] sm:$0xff] %v5819_v55  ;;  %v5854_v1 = vld [vmem:[%s6781_s2 + $0x110] sm:$0xff]  ;;  %v5873_v28 = vld [vmem:[%s6781_s2 + $0x120] sm:$0xff]  ;;  %v408_v47 = vld [vmem:[%s6782_s3 + $0x88] sm:$0xff] }
 0x24b   : > { %2404 = vmatpush.msrb.mxu1 %v2320_v48  ;;  %2916 = vmatpush.msrb.mxu3 %v2832_v54  ;;  %v397_v48 = vld [vmem:[%s6782_s3 + $0x30] sm:$0xff]  ;;  %v2309_v39 = vmax.f32 %v2277_v40, 0.0  ;;  %v2308_v54 = vmax.f32 %v2276_v0, 0.0  ;;  %7237 = vst [vmem:[#allocation79_spill] sm:$0xff] %v5854_v1  ;;  %v5887_v40 = vld [vmem:[%s6781_s2 + $0xf8] sm:$0xff] }
 0x24c   : > { %1390 = vmatmul.f32.gmra.mxu1 %v5602_v3  ;;  %1908 = vmatmul.f32.gmra.mxu3 %v5602_v3  ;;  %v2821_v43 = vmax.f32 %v2789_v37, 0.0  ;;  %7239 = vst [vmem:[#allocation49_spill] sm:$0xff] %v5873_v28  ;;  %v5892_v37 = vld [vmem:[%s6781_s2 + $0x130] sm:$0xff] }
 0x24d   : > { %2405 = vmatpush.msrb.mxu1 %v2319_v16  ;;  %2917 = vmatpush.msrb.mxu3 %v2831_v27  ;;  %v5706_v16 = vld [vmem:[%s6781_s2 + $0x58] sm:$0xff]  ;;  %v5720_v27 = vld [vmem:[%s6781_s2 + $0x68] sm:$0xff]  ;;  %7240 = vst [vmem:[#allocation52_spill] sm:$0xff] %v5887_v40 }
 0x24e   : > { %1325 = vmatmul.f32.gmra.mxu0 %v5609_v22  ;;  %1843 = vmatmul.f32.gmra.mxu2 %v5609_v22  ;;  %7241 = vst [vmem:[#allocation84_spill] sm:$0xff] %v5892_v37 }
 0x24f   : > { %2406 = vmatpush.msrb.mxu1 %v2318_v2  ;;  %2918 = vmatpush.msrb.mxu3 %v2830_v52  ;;  %v398_v2 = vld [vmem:[%s6782_s3 + $0x38] sm:$0xff]  ;;  %v5742_v52 = vld [vmem:[%s6781_s2 + $0xb0] sm:$0xff] }
 0x250   : > { %1226 = vperm.xlu1 %3349, %v397_v48   ;;  %1216 = vperm.xlu2 %3350, %v395_v46   ;;  %v5908_v48 = vld [vmem:[%s6781_s2 + $0x108] sm:$0xff] }
 0x251   : > { %2407 = vmatpush.msrb.mxu1 %v2317_v18  ;;  %2919 = vmatpush.msrb.mxu3 %v2829_v8  ;;  %v401_v18 = vld [vmem:[%s6782_s3 + $0x50] sm:$0xff]  ;;  %v5762_v8 = vld [vmem:[%s6781_s2 + $0xc0] sm:$0xff]  ;;  %7242 = vst [vmem:[#allocation96_spill] sm:$0xff] %v5908_v48 }
 0x252   : > { %1246 = vperm.xlu0 %3348, %v401_v18  }
 0x253   : > { %2408 = vmatpush.msrb.mxu1 %v2316_v9  ;;  %2920 = vmatpush.msrb.mxu3 %v2828_v5  ;;  %v399_v9 = vld [vmem:[%s6782_s3 + $0x40] sm:$0xff]  ;;  %v5782_v5 = vld [vmem:[%s6781_s2 + $0xd0] sm:$0xff] }
 0x254   : > { %1393 = vmatmul.f32.gmra.mxu1 %v5624_v36  ;;  %1911 = vmatmul.f32.gmra.mxu3 %v5624_v36 }
 0x255   : > { %2409 = vmatpush.msrb.mxu1 %v2315_v49  ;;  %2921 = vmatpush.msrb.mxu3 %v2827_v42  ;;  %v403_v49 = vld [vmem:[%s6782_s3 + $0x60] sm:$0xff]  ;;  %v400_v42 = vld [vmem:[%s6782_s3 + $0x48] sm:$0xff] }
 0x256   : > { %1328 = vmatmul.f32.gmra.mxu0 %v5631_v20  ;;  %1846 = vmatmul.f32.gmra.mxu2 %v5631_v20 }
 0x257   : > { %2410 = vmatpush.msrb.mxu1 %v2314_v58  ;;  %2922 = vmatpush.msrb.mxu3 %v2826_v15  ;;  %v404_v58 = vld [vmem:[%s6782_s3 + $0x68] sm:$0xff]  ;;  %v5814_v15 = vld [vmem:[%s6781_s2 + $0xb8] sm:$0xff] }
 0x258   : > { %1231 = vperm.xlu2 %3350, %v398_v2   ;;  %1251 = vperm.xlu1 %3349, %v402_v59   ;;  %7232 = vst [vmem:[#allocation74_spill] sm:$0xff] %v5814_v15 }
 0x259   : > { %2411 = vmatpush.msrb.mxu1 %v2313_v60  ;;  %2923 = vmatpush.msrb.mxu3 %v2825_v63  ;;  %v5838_v63 = vld [vmem:[%s6781_s2 + $0x100] sm:$0xff] }
 0x25a   : > { %7235 = vst [vmem:[#allocation78_spill] sm:$0xff] %v5838_v63  ;;  %1276 = vperm.xlu0 %3348, %v407_v38  }
 0x25b   : > { %2412 = vmatpush.msrb.mxu1 %v2312_v50  ;;  %2924 = vmatpush.msrb.mxu3 %v2824_v24  ;;  %v5849_v50 = vld [vmem:[%s6781_s2 + $0xd8] sm:$0xff] }
 0x25c   : > { %1396 = vmatmul.f32.gmra.mxu1 %v5661_v23  ;;  %1914 = vmatmul.f32.gmra.mxu3 %v5661_v23  ;;  %7236 = vst [vmem:[#allocation42_spill] sm:$0xff] %v5849_v50 }
 0x25d   : > { %2413 = vmatpush.msrb.mxu1 %v2311_v25  ;;  %2925 = vmatpush.msrb.mxu3 %v2823_v62 }
 0x25e   : > { %1331 = vmatmul.f32.gmra.mxu0 %v5671_v45  ;;  %1849 = vmatmul.f32.gmra.mxu2 %v5671_v45 }
 0x25f   : > { %2414 = vmatpush.msrb.mxu1 %v2310_v56  ;;  %2926 = vmatpush.msrb.mxu3 %v2822_v4  ;;  %v409_v56 = vld [vmem:[%s6782_s3 + $0x90] sm:$0xff] }
 0x260   : > { %1271 = vperm.xlu2 %3350, %v406_v31   ;;  %1256 = vperm.xlu1 %3349, %v403_v49   ;;  %v386_v31 = vld [vmem:[%s6781_s2 + $0x118] sm:$0xff] }
 0x261   : > { %2415 = vmatpush.msrb.mxu1 %v2309_v39  ;;  %2927 = vmatpush.msrb.mxu3 %v2821_v43  ;;  %v5935_v49 = vld [vmem:[%s3608_s26 + $0x28] sm:$0xff] }
 0x262   : > { %1281 = vperm.xlu0 %3348, %v408_v47  }
 0x263   : > { %2416 = vmatpush.msrb.mxu1 %v2308_v54  ;;  %2928 = vmatpush.msrb.mxu3 %v2820_v44 }
 0x264   : > { %1399 = vmatmul.f32.gmra.mxu1 %v5689_v29  ;;  %1917 = vmatmul.f32.gmra.mxu3 %v5689_v29 }
 0x266   : > { %1334 = vmatmul.f32.gmra.mxu0 %v5694_v61  ;;  %1852 = vmatmul.f32.gmra.mxu2 %v5694_v61 }
 0x268   : > { %1236 = vperm.xlu2 %3350, %v399_v9   ;;  %1261 = vperm.xlu1 %3349, %v404_v58   ;;  %v5932_v9 = vld [vmem:[%s3608_s26] sm:$0xff] }
 0x26a   : > { %1286 = vperm.xlu0 %3348, %v409_v56  }
 0x26c   : > { %1402 = vmatmul.f32.gmra.mxu1 %v5706_v16  ;;  %1920 = vmatmul.f32.gmra.mxu3 %v5706_v16 }
 0x26e   : > { %1337 = vmatmul.f32.gmra.mxu0 %v5711_v11  ;;  %1855 = vmatmul.f32.gmra.mxu2 %v5711_v11 }
 0x270   : > { %1241 = vperm.xlu2 %3350, %v400_v42   ;;  %1266 = vperm.xlu1 %3349, %v405_v7   ;;  %v5938_v7 = vld [vmem:[%s3608_s26 + $0x8] sm:$0xff] }
 0x274   : > { %1405 = vmatmul.f32.gmra.mxu1 %v5720_v27  ;;  %1923 = vmatmul.f32.gmra.mxu3 %v5720_v27 }
 0x276   : > { %1340 = vmatmul.f32.gmra.mxu0 %v5725_v19  ;;  %1858 = vmatmul.f32.gmra.mxu2 %v5725_v19 }
 0x27c   : > { %1408 = vmatmul.f32.gmra.mxu1 %v5737_v35  ;;  %1926 = vmatmul.f32.gmra.mxu3 %v5737_v35 }
 0x27e   : > { %1343 = vmatmul.f32.gmra.mxu0 %v5742_v52  ;;  %1861 = vmatmul.f32.gmra.mxu2 %v5742_v52 }
 0x284   : > { %1411 = vmatmul.f32.gmra.mxu1 %v5757_v12  ;;  %1929 = vmatmul.f32.gmra.mxu3 %v5757_v12 }
 0x286   : > { %1346 = vmatmul.f32.gmra.mxu0 %v5762_v8  ;;  %1864 = vmatmul.f32.gmra.mxu2 %v5762_v8 }
 0x28c   : > { %1414 = vmatmul.f32.gmra.mxu1 %v5777_v21  ;;  %1932 = vmatmul.f32.gmra.mxu3 %v5777_v21 }
 0x28e   : > { %1349 = vmatmul.f32.gmra.mxu0 %v5782_v5  ;;  %1867 = vmatmul.f32.gmra.mxu2 %v5782_v5 }
 0x294   : > { %1417 = vmatmul.f32.gmra.mxu1 %v5797_v53  ;;  %1935 = vmatmul.f32.gmra.mxu3 %v5797_v53 }
 0x296   : > { %1352 = vmatmul.f32.gmra.mxu0 %v5802_v13  ;;  %1870 = vmatmul.f32.gmra.mxu2 %v5802_v13  ;;  %v6012_v13 = vld [vmem:[%s3608_s26 + $0x48] sm:$0xff] }
 0x29c   : > { %1420 = vmatmul.f32.gmra.mxu1 %v5814_v15  ;;  %1938 = vmatmul.f32.gmra.mxu3 %v5814_v15  ;;  %v5903_v33 = vpop.permute.xlu0 %1196 }
 0x29e   : > { %1355 = vmatmul.f32.gmra.mxu0 %v5819_v55  ;;  %1873 = vmatmul.f32.gmra.mxu2 %v5819_v55 }
 0x2a0   : > { %v5924_v18 = vpop.permute.xlu1 %1201 }
 0x2a1   : > { %v5828_v60 = vpop.f32.mrf.mxu0  ;;  %7243 = vst [vmem:[#allocation69_spill] sm:$0xff] %v5924_v18 }
 0x2a4   : > { %1423 = vmatmul.f32.gmra.mxu1 %v5833_v10  ;;  %1941 = vmatmul.f32.gmra.mxu3 %v5833_v10  ;;  %v5989_v10 = vld [vmem:[%s3608_s26 + $0x18] sm:$0xff] }
 0x2a6   : > { %1358 = vmatmul.f32.gmra.mxu0 %v5838_v63  ;;  %1876 = vmatmul.f32.gmra.mxu2 %v5838_v63 }
 0x2a7   : > { %v1829_v14 = vpop.f32.mrf.mxu2 }
 0x2a8   : > { %v1830_v43 = vadd.f32 %v1829_v14, %v5903_v33  ;;  %v5941_v14 = vld [vmem:[%s3608_s26 + $0x30] sm:$0xff] }
 0x2a9   : > { %v5844_v6 = vpop.f32.mrf.mxu0 }
 0x2ac   : > { %1426 = vmatmul.f32.gmra.mxu1 %v5849_v50  ;;  %1944 = vmatmul.f32.gmra.mxu3 %v5849_v50 }
 0x2ae   : > { %1361 = vmatmul.f32.gmra.mxu0 %v5854_v1  ;;  %1879 = vmatmul.f32.gmra.mxu2 %v5854_v1 }
 0x2af   : > { %v1832_v24 = vpop.f32.mrf.mxu2 }
 0x2b1   : > { %v5863_v26 = vpop.f32.mrf.mxu0 }
 0x2b4   : > { %1429 = vmatmul.f32.gmra.mxu1 %v5868_v30  ;;  %1947 = vmatmul.f32.gmra.mxu3 %v5868_v30  ;;  %v5965_v30 = vld [vmem:[%s3608_s26 + $0x38] sm:$0xff] }
 0x2b6   : > { %1364 = vmatmul.f32.gmra.mxu0 %v5873_v28  ;;  %1882 = vmatmul.f32.gmra.mxu2 %v5873_v28  ;;  %v5962_v28 = vld [vmem:[%s3608_s26 + $0x10] sm:$0xff] }
 0x2b7   : > { %v1835_v25 = vpop.f32.mrf.mxu2 }
 0x2b9   : > { %v5882_v62 = vpop.f32.mrf.mxu0 }
 0x2bc   : > { %1432 = vmatmul.f32.gmra.mxu1 %v5887_v40  ;;  %1950 = vmatmul.f32.gmra.mxu3 %v5887_v40 }
 0x2be   : > { %1367 = vmatmul.f32.gmra.mxu0 %v5892_v37  ;;  %1885 = vmatmul.f32.gmra.mxu2 %v5892_v37 }
 0x2bf   : > { %v1838_v4 = vpop.f32.mrf.mxu2 }
 0x2c0   : > { %v5901_v0 = vpop.f32.mrf.mxu1 }
 0x2c3   : > { %v5910_v39 = vpop.f32.mrf.mxu0 }
 0x2c4   : > { %1435 = vmatmul.f32.gmra.mxu1 %v5908_v48  ;;  %1953 = vmatmul.f32.gmra.mxu3 %v5908_v48 }
 0x2c6   : > { %2340 = vmatmul.f32.vlgmr.msrb.gmra.mxu0 %v5459_v57  ;;  %2852 = vmatmul.f32.vlgmr.msrb.gmra.mxu2 %v5459_v57  ;;  %v1906_v54 = vpop.f32.mrf.mxu3  ;;  %v1833_v57 = vadd.f32 %v1832_v24, %v5924_v18  ;;  %v388_v24 = vld [vmem:[%s6781_s2 + $0x128] sm:$0xff] }
 0x2c7   : > { %v1907_v44 = vadd.f32 %v1906_v54, %v1830_v43 }
 0x2c9   : > { %v5917_v46 = vpop.f32.mrf.mxu1  ;;  %v5919_v2 = vpop.f32.mrf.mxu2  ;;  %v2026_v56 = vmul.f32 %v5935_v49, %v1907_v44 }
 0x2cb   : > { %v5926_v59 = vpop.f32.mrf.mxu0 }
 0x2cc   : > { %1438 = vmatmul.f32.gmra.mxu1 %v386_v31  ;;  %1956 = vmatmul.f32.gmra.mxu3 %v386_v31  ;;  %v5954_v31 = vpop.permute.xlu2 %1206 }
 0x2cd   : > { %7244 = vst [vmem:[#allocation70_spill] sm:$0xff] %v5954_v31  ;;  %v1836_v37 = vadd.f32 %v1835_v25, %v5954_v31 }
 0x2ce   : > { %2343 = vmatmul.f32.gmra.mxu0 %v5476_v17  ;;  %2855 = vmatmul.f32.gmra.mxu2 %v5476_v17  ;;  %v1966_v17 = vmul.f32 %v1907_v44, %v5932_v9 }
 0x2cf   : > { %v1909_v42 = vpop.f32.mrf.mxu3 }
 0x2d0   : > { %v1910_v58 = vadd.f32 %v1909_v42, %v1833_v57 }
 0x2d1   : > { %v5943_v38 = vpop.f32.mrf.mxu1  ;;  %v5945_v47 = vpop.f32.mrf.mxu2 }
 0x2d2   : > { %v1967_v43 = vmul.f32 %v1910_v58, %v5938_v7  ;;  %v2027_v54 = vmul.f32 %v5941_v14, %v1910_v58 }
 0x2d3   : > { %v5956_v57 = vpop.f32.mrf.mxu0 }
 0x2d4   : > { %v1971_v42 = vadd.f32 %v1967_v43, %v1966_v17  ;;  %v2031_v48 = vadd.f32 %v2027_v54, %v2026_v56  ;;  %1441 = vmatmul.f32.gmra.mxu1 %v388_v24  ;;  %1959 = vmatmul.f32.gmra.mxu3 %v388_v24  ;;  %v390_v17 = vld [vmem:[%s6781_s2 + $0x138] sm:$0xff]  ;;  %v5980_v43 = vpop.permute.xlu2 %1216 }
 0x2d5   : > { %7246 = vst [vmem:[#allocation83_spill] sm:$0xff] %v5980_v43 }
 0x2d6   : > { %2346 = vmatmul.f32.gmra.mxu0 %v5501_v32  ;;  %2858 = vmatmul.f32.gmra.mxu2 %v5501_v32  ;;  %v5976_v32 = vpop.permute.xlu1 %1211 }
 0x2d7   : > { %v1912_v40 = vpop.f32.mrf.mxu3  ;;  %7245 = vst [vmem:[#allocation82_spill] sm:$0xff] %v5976_v32  ;;  %v1839_v54 = vadd.f32 %v1838_v4, %v5976_v32 }
 0x2d8   : > { %v1913_v44 = vadd.f32 %v1912_v40, %v1836_v37 }
 0x2d9   : > { %v5967_v58 = vpop.f32.mrf.mxu1  ;;  %v5969_v1 = vpop.f32.mrf.mxu2 }
 0x2da   : > { %v1968_v25 = vmul.f32 %v1913_v44, %v5962_v28  ;;  %v2028_v24 = vmul.f32 %v5965_v30, %v1913_v44  ;;  %v410_v44 = vld [vmem:[%s6782_s3 + $0x98] sm:$0xff] }
 0x2db   : > { %v5978_v40 = vpop.f32.mrf.mxu0  ;;  %1291 = vperm.xlu2 %3350, %v410_v44  }
 0x2dc   : > { %v1972_v37 = vadd.f32 %v1971_v42, %v1968_v25  ;;  %v2032_v56 = vadd.f32 %v2031_v48, %v2028_v24  ;;  %1444 = vmatmul.f32.gmra.mxu1 %v390_v17  ;;  %1962 = vmatmul.f32.gmra.mxu3 %v390_v17  ;;  %v5992_v48 = vld [vmem:[%s3608_s26 + $0x40] sm:$0xff] }
 0x2de   : > { %2349 = vmatmul.f32.gmra.mxu0 %v5552_v34  ;;  %2861 = vmatmul.f32.gmra.mxu2 %v5552_v34 }
 0x2df   : > { %v1915_v50 = vpop.f32.mrf.mxu3 }
 0x2e0   : > { %v1916_v63 = vadd.f32 %v1915_v50, %v1839_v54  ;;  %v1842_v50 = vadd.f32 %v5919_v2, %v5980_v43  ;;  %v6003_v54 = vpop.permute.xlu2 %1231 }
 0x2e1   : > { %v1400_v42 = vpop.f32.mrf.mxu1  ;;  %v5994_v4 = vpop.f32.mrf.mxu2  ;;  %7247 = vst [vmem:[#allocation40_spill] sm:$0xff] %v6003_v54 }
 0x2e2   : > { %v1969_v17 = vmul.f32 %v1916_v63, %v5989_v10  ;;  %v2029_v34 = vmul.f32 %v5992_v48, %v1916_v63  ;;  %v6009_v63 = vld [vmem:[%s3608_s26 + $0x20] sm:$0xff] }
 0x2e3   : > { %v5998_v25 = vpop.f32.mrf.mxu0 }
 0x2e4   : > { %v1973_v24 = vadd.f32 %v1972_v37, %v1969_v17  ;;  %v2033_v55 = vadd.f32 %v2032_v56, %v2029_v34  ;;  %2417 = vmatmul.f32.vlgmr.msrb.gmra.mxu1 %v5577_v51  ;;  %2929 = vmatmul.f32.vlgmr.msrb.gmra.mxu3 %v5577_v51  ;;  %v6020_v34 = vpop.permute.xlu0 %1221 }
 0x2e6   : > { %2352 = vmatmul.f32.gmra.mxu0 %v5586_v41  ;;  %2864 = vmatmul.f32.gmra.mxu2 %v5586_v41 }
 0x2e7   : > { %v1918_v44 = vpop.f32.mrf.mxu3 }
 0x2e8   : > { %v1919_v15 = vadd.f32 %v1918_v44, %v1842_v50  ;;  %v1845_v50 = vadd.f32 %v5945_v47, %v6020_v34  ;;  %v1315_v44 = vadd.f32 %v5844_v6, %v5924_v18 }
 0x2e9   : > { %v6014_v37 = vpop.f32.mrf.mxu1  ;;  %v6016_v56 = vpop.f32.mrf.mxu2 }
 0x2ea   : > { %v1970_v2 = vmul.f32 %v1919_v15, %v6009_v63  ;;  %v2030_v17 = vmul.f32 %v6012_v13, %v1919_v15  ;;  %v6034_v15 = vpop.permute.xlu2 %1271  ;;  %v6045_v47 = vadd.f32 %v5917_v46, %v1315_v44  ;;  %v1324_v46 = vadd.f32 %v5910_v39, %v5980_v43 }
 0x2eb   : > { %v6022_v51 = vpop.f32.mrf.mxu0  ;;  %7249 = vst [vmem:[#allocation22_spill] sm:$0xff] %v6034_v15  ;;  %v6049_v15 = vpop.permute.xlu1 %1226 }
 0x2ec   : > { %v6024_v53 = vadd.f32 %v1973_v24, %v1970_v2  ;;  %v6026_v41 = vadd.f32 %v2033_v55, %v2030_v17  ;;  %2420 = vmatmul.f32.gmra.mxu1 %v5602_v3  ;;  %2932 = vmatmul.f32.gmra.mxu3 %v5602_v3  ;;  %v1312_v55 = vadd.f32 %v5828_v60, %v5903_v33 }
 0x2ed   : > { %v1318_v2 = vadd.f32 %v5863_v26, %v5954_v31  ;;  %v1848_v60 = vadd.f32 %v5969_v1, %v6049_v15  ;;  %v6078_v39 = vadd.f32 %v1400_v42, %v1324_v46  ;;  %v1330_v42 = vadd.f32 %v5956_v57, %v6049_v15 }
 0x2ee   : > { %7248 = vst [vmem:[#allocation37_spill] sm:$0xff] %v6026_v41  ;;  %2355 = vmatmul.f32.gmra.mxu0 %v5609_v22  ;;  %2867 = vmatmul.f32.gmra.mxu2 %v5609_v22  ;;  %v1321_v22 = vadd.f32 %v5882_v62, %v5976_v32  ;;  %v6057_v26 = vadd.f32 %v5901_v0, %v1312_v55 }
 0x2ef   : > { %v1921_v24 = vpop.f32.mrf.mxu3  ;;  %v1449_v62 = vmul.f32 %v6045_v47, %v5938_v7 }
 0x2f0   : > { %v1922_v3 = vadd.f32 %v1921_v24, %v1845_v50  ;;  %v6060_v50 = vadd.f32 %v5943_v38, %v1318_v2  ;;  %v6070_v1 = vadd.f32 %v5967_v58, %v1321_v22  ;;  %v1448_v38 = vmul.f32 %v6057_v26, %v5932_v9 }
 0x2f1   : > { %v1406_v17 = vpop.f32.mrf.mxu1  ;;  %v6042_v41 = vpop.f32.mrf.mxu2 }
 0x2f2   : > { %v6072_v24 = vpop.permute.xlu2 %1236  ;;  %v1981_v2 = vmul.f32 %v1922_v3, %v5932_v9  ;;  %v2041_v58 = vmul.f32 %v5935_v49, %v1922_v3  ;;  %v1451_v43 = vmul.f32 %v6070_v1, %v5989_v10  ;;  %v1851_v3 = vadd.f32 %v5994_v4, %v6003_v54 }
 0x2f3   : > { %v6051_v6 = vpop.f32.mrf.mxu0  ;;  %7250 = vst [vmem:[#allocation26_spill] sm:$0xff] %v6072_v24 }
 0x2f4   : > { %2423 = vmatmul.f32.gmra.mxu1 %v5624_v36  ;;  %2935 = vmatmul.f32.gmra.mxu3 %v5624_v36  ;;  %v1450_v36 = vmul.f32 %v6060_v50, %v5962_v28 }
 0x2f6   : > { %2358 = vmatmul.f32.gmra.mxu0 %v5631_v20  ;;  %2870 = vmatmul.f32.gmra.mxu2 %v5631_v20 }
 0x2f7   : > { %v1924_v0 = vpop.f32.mrf.mxu3 }
 0x2f8   : > { %v1925_v44 = vadd.f32 %v1924_v0, %v1848_v60  ;;  %v1453_v0 = vadd.f32 %v1449_v62, %v1448_v38  ;;  %v1327_v62 = vadd.f32 %v5926_v59, %v6020_v34  ;;  %v1333_v38 = vadd.f32 %v5978_v40, %v6003_v54 }
 0x2f9   : > { %v1409_v55 = vpop.f32.mrf.mxu1  ;;  %v6080_v20 = vpop.f32.mrf.mxu2 }
 0x2fa   : > { %v1982_v22 = vmul.f32 %v1925_v44, %v5938_v7  ;;  %v2042_v60 = vmul.f32 %v5941_v14, %v1925_v44  ;;  %v1454_v18 = vadd.f32 %v1453_v0, %v1450_v36  ;;  %v1452_v44 = vmul.f32 %v6078_v39, %v6009_v63 }
 0x2fb   : > { %v6088_v32 = vpop.f32.mrf.mxu0  ;;  %v1336_v36 = vadd.f32 %v5998_v25, %v6072_v24  ;;  %v6111_v59 = vadd.f32 %v6014_v37, %v1327_v62  ;;  %v6113_v40 = vadd.f32 %v1409_v55, %v1333_v38  ;;  %v1854_v25 = vadd.f32 %v6016_v56, %v6072_v24 }
 0x2fc   : > { %v1986_v46 = vadd.f32 %v1982_v22, %v1981_v2  ;;  %v2046_v31 = vadd.f32 %v2042_v60, %v2041_v58  ;;  %2426 = vmatmul.f32.gmra.mxu1 %v5661_v23  ;;  %2938 = vmatmul.f32.gmra.mxu3 %v5661_v23  ;;  %v1455_v57 = vadd.f32 %v1454_v18, %v1451_v43  ;;  %v6119_v43 = vpop.permute.xlu2 %1241 }
 0x2fd   : > { %v6104_v58 = vadd.f32 %v1406_v17, %v1330_v42  ;;  %7251 = vst [vmem:[#allocation27_spill] sm:$0xff] %v6119_v43  ;;  %v1465_v62 = vmul.f32 %v6113_v40, %v5962_v28 }
 0x2fe   : > { %2361 = vmatmul.f32.gmra.mxu0 %v5671_v45  ;;  %2873 = vmatmul.f32.gmra.mxu2 %v5671_v45  ;;  %v1456_v22 = vadd.f32 %v1455_v57, %v1452_v44  ;;  %v1463_v44 = vmul.f32 %v6111_v59, %v5932_v9 }
 0x2ff   : > { %v1927_v2 = vpop.f32.mrf.mxu3  ;;  %v1464_v17 = vmul.f32 %v6104_v58, %v5938_v7 }
 0x300   : > { %v1928_v4 = vadd.f32 %v1927_v2, %v1851_v3  ;;  %v1457_v55 = vrot.slane %v1456_v22, 4 }
 0x301   : > { %v1412_v23 = vpop.f32.mrf.mxu1  ;;  %v6108_v60 = vpop.f32.mrf.mxu2 }
 0x302   : > { %v1983_v0 = vmul.f32 %v1928_v4, %v5962_v28  ;;  %v2043_v45 = vmul.f32 %v5965_v30, %v1928_v4  ;;  %v6125_v37 = vadd.f32 %v1412_v23, %v1336_v36 }
 0x303   : > { %v6117_v18 = vpop.f32.mrf.mxu0 }
 0x304   : > { %v1987_v42 = vadd.f32 %v1986_v46, %v1983_v0  ;;  %v2047_v3 = vadd.f32 %v2046_v31, %v2043_v45  ;;  %2429 = vmatmul.f32.gmra.mxu1 %v5689_v29  ;;  %2941 = vmatmul.f32.gmra.mxu3 %v5689_v29  ;;  %v1339_v31 = vadd.f32 %v6022_v51, %v6119_v43 }
 0x305   : > { %v1468_v46 = vadd.f32 %v1464_v17, %v1463_v44  ;;  %v1466_v38 = vmul.f32 %v6125_v37, %v5989_v10  ;;  %v1458_v29 = vadd.f32 %v1457_v55, %v1456_v22  ;;  %v1857_v17 = vadd.f32 %v6042_v41, %v6119_v43 }
 0x306   : > { %2364 = vmatmul.f32.gmra.mxu0 %v5694_v61  ;;  %2876 = vmatmul.f32.gmra.mxu2 %v5694_v61  ;;  %v1975_v61 = vrot.slane %v6024_v53, 4 }
 0x307   : > { %v1930_v56 = vpop.f32.mrf.mxu3  ;;  %v1469_v36 = vadd.f32 %v1468_v46, %v1465_v62  ;;  %v6153_v62 = vpop.permute.xlu0 %1246 }
 0x308   : > { %v1931_v57 = vadd.f32 %v1930_v56, %v1854_v25  ;;  %v6155_v56 = vpop.permute.xlu1 %1251 }
 0x309   : > { %v1415_v2 = vpop.f32.mrf.mxu1  ;;  %v6139_v4 = vpop.f32.mrf.mxu2  ;;  %v1470_v44 = vadd.f32 %v1469_v36, %v1466_v38 }
 0x30a   : > { %v1984_v23 = vmul.f32 %v1931_v57, %v5989_v10  ;;  %v2044_v0 = vmul.f32 %v5992_v48, %v1931_v57  ;;  %v6143_v45 = vadd.f32 %v1415_v2, %v1339_v31  ;;  %v1459_v31 = vrot.slane %v1458_v29, 2 }
 0x30b   : > { %v6146_v51 = vpop.f32.mrf.mxu0 }
 0x30c   : > { %v1988_v25 = vadd.f32 %v1987_v42, %v1984_v23  ;;  %v2048_v22 = vadd.f32 %v2047_v3, %v2044_v0  ;;  %v1467_v55 = vmul.f32 %v6143_v45, %v6009_v63  ;;  %2432 = vmatmul.f32.gmra.mxu1 %v5706_v16  ;;  %2944 = vmatmul.f32.gmra.mxu3 %v5706_v16 }
 0x30d   : > { %v1342_v42 = vadd.f32 %v6051_v6, %v6153_v62  ;;  %v1976_v3 = vadd.f32 %v1975_v61, %v6024_v53  ;;  %v1460_v23 = vadd.f32 %v1459_v31, %v1458_v29  ;;  %v1860_v53 = vadd.f32 %v6080_v20, %v6153_v62 }
 0x30e   : > { %v1471_v46 = vadd.f32 %v1470_v44, %v1467_v55  ;;  %2367 = vmatmul.f32.gmra.mxu0 %v5711_v11  ;;  %2879 = vmatmul.f32.gmra.mxu2 %v5711_v11 }
 0x30f   : > { %v1933_v41 = vpop.f32.mrf.mxu3  ;;  %v1977_v43 = vrot.slane %v1976_v3, 2  ;;  %v1461_v29 = vrot.slane %v1460_v23, 1 }
 0x310   : > { %v1472_v38 = vrot.slane %v1471_v46, 4  ;;  %v1934_v57 = vadd.f32 %v1933_v41, %v1857_v17  ;;  %v6179_v31 = vpop.permute.xlu1 %1256 }
 0x311   : > { %v1418_v2 = vpop.f32.mrf.mxu1  ;;  %v6163_v36 = vpop.f32.mrf.mxu2  ;;  %7252 = vst [vmem:[#allocation56_spill] sm:$0xff] %v6179_v31  ;;  %v1462_v20 = vadd.f32 %v1461_v29, %v1460_v23 }
 0x312   : > { %v1473_v0 = vadd.f32 %v1472_v38, %v1471_v46  ;;  %v1985_v16 = vmul.f32 %v1934_v57, %v6009_v63  ;;  %v2045_v44 = vmul.f32 %v6012_v13, %v1934_v57  ;;  %v6169_v11 = vadd.f32 %v1418_v2, %v1342_v42 }
 0x313   : > { %v6167_v55 = vpop.f32.mrf.mxu0 }
 0x314   : > { %v1474_v24 = vrot.slane %v1473_v0, 2  ;;  %v1989_v6 = vadd.f32 %v1988_v25, %v1985_v16  ;;  %v6171_v54 = vadd.f32 %v2048_v22, %v2045_v44  ;;  %2435 = vmatmul.f32.gmra.mxu1 %v5720_v27  ;;  %2947 = vmatmul.f32.gmra.mxu3 %v5720_v27  ;;  %v1978_v25 = vadd.f32 %v1977_v43, %v1976_v3 }
 0x316   : > { %v1475_v61 = vadd.f32 %v1474_v24, %v1473_v0  ;;  %v1990_v17 = vrot.slane %v1989_v6, 4  ;;  %2370 = vmatmul.f32.gmra.mxu0 %v5725_v19  ;;  %2882 = vmatmul.f32.gmra.mxu2 %v5725_v19  ;;  %v1979_v0 = vrot.slane %v1978_v25, 1 }
 0x317   : > { %v1936_v46 = vpop.f32.mrf.mxu3 }
 0x318   : > { %v1476_v22 = vrot.slane %v1475_v61, 1  ;;  %v1991_v41 = vadd.f32 %v1990_v17, %v1989_v6  ;;  %v6181_v42 = vadd.f32 %v1936_v46, %v1860_v53  ;;  %v1980_v23 = vadd.f32 %v1979_v0, %v1978_v25  ;;  %v6194_v6 = vpop.permute.xlu1 %1261 }
 0x319   : > { %v1421_v27 = vpop.f32.mrf.mxu1  ;;  %v6183_v38 = vpop.f32.mrf.mxu2  ;;  %7253 = vst [vmem:[#allocation102_spill] sm:$0xff] %v6194_v6 }
 0x31a   : > { %v1477_v57 = vadd.f32 %v1476_v22, %v1475_v61  ;;  %v1992_v24 = vrot.slane %v1991_v41, 2  ;;  %v1351_v22 = vadd.f32 %v6146_v51, %v6194_v6  ;;  %v1478_v51 = vmul.f32 %v6169_v11, %v5932_v9 }
 0x31b   : > { %v6185_v2 = vpop.f32.mrf.mxu0 }
 0x31c   : > { %v6188_v19 = vsel %vm1568_vm0, %v1462_v20, %v1477_v57  ;;  %v1993_v16 = vadd.f32 %v1992_v24, %v1991_v41  ;;  %2438 = vmatmul.f32.gmra.mxu1 %v5737_v35  ;;  %2950 = vmatmul.f32.gmra.mxu3 %v5737_v35  ;;  %v1345_v35 = vadd.f32 %v6088_v32, %v6155_v56 }
 0x31d   : > { %v1863_v32 = vadd.f32 %v6108_v60, %v6155_v56  ;;  %v1869_v60 = vadd.f32 %v6163_v36, %v6194_v6  ;;  %v1509_v36 = vmul.f32 %v5941_v14, %v6045_v47  ;;  %v1996_v47 = vmul.f32 %v6181_v42, %v5932_v9 }
 0x31e   : > { %v1994_v43 = vrot.slane %v1993_v16, 1  ;;  %2373 = vmatmul.f32.gmra.mxu0 %v5742_v52  ;;  %2885 = vmatmul.f32.gmra.mxu2 %v5742_v52  ;;  %v1348_v52 = vadd.f32 %v6117_v18, %v6179_v31  ;;  %v6211_v25 = vadd.f32 %v1421_v27, %v1345_v35  ;;  %v1866_v27 = vadd.f32 %v6139_v4, %v6179_v31 }
 0x31f   : > { %v1939_v3 = vpop.f32.mrf.mxu3 }
 0x320   : > { %v1995_v44 = vadd.f32 %v1994_v43, %v1993_v16  ;;  %v6223_v18 = vpop.permute.xlu1 %1266  ;;  %v6237_v0 = vadd.f32 %v1939_v3, %v1863_v32 }
 0x321   : > { %v1424_v53 = vpop.f32.mrf.mxu1  ;;  %v6196_v29 = vpop.f32.mrf.mxu2  ;;  %7254 = vst [vmem:[#allocation47_spill] sm:$0xff] %v6223_v18  ;;  %v1354_v4 = vadd.f32 %v6167_v55, %v6223_v18 }
 0x322   : > { %v6199_v61 = vsel %vm1568_vm0, %v1980_v23, %v1995_v44  ;;  %v1997_v35 = vmul.f32 %v6237_v0, %v5938_v7 }
 0x323   : > { %v6201_v17 = vpop.f32.mrf.mxu0 }
 0x324   : > { %2441 = vmatmul.f32.gmra.mxu1 %v5757_v12  ;;  %2953 = vmatmul.f32.gmra.mxu3 %v5757_v12  ;;  %v6219_v12 = vadd.f32 %v1424_v53, %v1348_v52 }
 0x326   : > { %2376 = vmatmul.f32.gmra.mxu0 %v5762_v8  ;;  %2888 = vmatmul.f32.gmra.mxu2 %v5762_v8  ;;  %v1479_v8 = vmul.f32 %v6211_v25, %v5938_v7  ;;  %v1480_v16 = vmul.f32 %v6219_v12, %v5962_v28 }
 0x327   : > { %v1942_v46 = vpop.f32.mrf.mxu3 }
 0x328   : > { %v1483_v23 = vadd.f32 %v1479_v8, %v1478_v51  ;;  %v6245_v44 = vadd.f32 %v1942_v46, %v1866_v27  ;;  %v1508_v46 = vmul.f32 %v5935_v49, %v6057_v26  ;;  %v1872_v27 = vadd.f32 %v6183_v38, %v6223_v18  ;;  %v7260_v18 = vld [vmem:[#allocation90_spill] sm:$0xff] }
 0x329   : > { %v1427_v41 = vpop.f32.mrf.mxu1  ;;  %v6215_v20 = vpop.f32.mrf.mxu2 }
 0x32a   : > { %v6229_v24 = vadd.f32 %v1427_v41, %v1351_v22  ;;  %v1510_v22 = vmul.f32 %v5965_v30, %v6060_v50  ;;  %v1998_v32 = vmul.f32 %v6245_v44, %v5962_v28  ;;  %v1513_v26 = vadd.f32 %v1509_v36, %v1508_v46 }
 0x32b   : > { %v6221_v57 = vpop.f32.mrf.mxu0  ;;  %v1511_v50 = vmul.f32 %v5992_v48, %v6070_v1  ;;  %v6285_v1 = vpop.permute.xlu0 %1276 }
 0x32c   : > { %2444 = vmatmul.f32.gmra.mxu1 %v5777_v21  ;;  %2956 = vmatmul.f32.gmra.mxu3 %v5777_v21  ;;  %v1481_v21 = vmul.f32 %v6229_v24, %v5989_v10  ;;  %v1514_v38 = vadd.f32 %v1513_v26, %v1510_v22 }
 0x32e   : > { %2379 = vmatmul.f32.gmra.mxu0 %v5782_v5  ;;  %2891 = vmatmul.f32.gmra.mxu2 %v5782_v5  ;;  %v1484_v5 = vadd.f32 %v1483_v23, %v1480_v16  ;;  %v2001_v16 = vadd.f32 %v1997_v35, %v1996_v47  ;;  %v7256_v23 = vld [vmem:[#allocation39_spill] sm:$0xff] }
 0x32f   : > { %v1945_v43 = vpop.f32.mrf.mxu3 }
 0x330   : > { %v6255_v52 = vadd.f32 %v1945_v43, %v1869_v60  ;;  %v1485_v8 = vadd.f32 %v1484_v5, %v1481_v21  ;;  %v7255_v60 = vld [vmem:[#allocation34_spill] sm:$0xff]  ;;  %v2002_v36 = vadd.f32 %v2001_v16, %v1998_v32 }
 0x331   : > { %v1430_v3 = vpop.f32.mrf.mxu1  ;;  %v6251_v53 = vpop.f32.mrf.mxu2  ;;  %v7257_v16 = vld [vmem:[#allocation74_spill] sm:$0xff] }
 0x332   : > { %v6257_v55 = vadd.f32 %v1430_v3, %v1354_v4  ;;  %v1999_v4 = vmul.f32 %v6255_v52, %v5989_v10  ;;  %v1512_v3 = vmul.f32 %v6012_v13, %v6078_v39  ;;  %v1524_v39 = vmul.f32 %v5941_v14, %v6104_v58 }
 0x333   : > { %v6265_v41 = vpop.f32.mrf.mxu0  ;;  %v1539_v58 = vmul.f32 %v5941_v14, %v6211_v25 }
 0x334   : > { %v1482_v51 = vmul.f32 %v6257_v55, %v6009_v63  ;;  %2447 = vmatmul.f32.gmra.mxu1 %v7255_v60  ;;  %2959 = vmatmul.f32.gmra.mxu3 %v7255_v60 }
 0x336   : > { %v1486_v43 = vadd.f32 %v1485_v8, %v1482_v51  ;;  %2382 = vmatmul.f32.gmra.mxu0 %v7256_v23  ;;  %2894 = vmatmul.f32.gmra.mxu2 %v7256_v23  ;;  %v1515_v8 = vadd.f32 %v1514_v38, %v1511_v50  ;;  %v2003_v51 = vadd.f32 %v2002_v36, %v1999_v4  ;;  %v7258_v38 = vld [vmem:[#allocation45_spill] sm:$0xff] }
 0x337   : > { %v1948_v21 = vpop.f32.mrf.mxu3  ;;  %v1523_v50 = vmul.f32 %v5935_v49, %v6111_v59  ;;  %v1526_v59 = vmul.f32 %v5992_v48, %v6125_v37  ;;  %v1541_v37 = vmul.f32 %v5992_v48, %v6229_v24 }
 0x338   : > { %v1487_v5 = vrot.slane %v1486_v43, 4  ;;  %v6283_v46 = vadd.f32 %v1948_v21, %v1872_v27  ;;  %v1516_v23 = vadd.f32 %v1515_v8, %v1512_v3  ;;  %v1525_v21 = vmul.f32 %v5965_v30, %v6113_v40 }
 0x339   : > { %v6287_v35 = vpop.f32.mrf.mxu1  ;;  %v6289_v47 = vpop.f32.mrf.mxu2 }
 0x33a   : > { %v1488_v60 = vadd.f32 %v1487_v5, %v1486_v43  ;;  %v2000_v22 = vmul.f32 %v6283_v46, %v6009_v63  ;;  %v1517_v36 = vrot.slane %v1516_v23, 4  ;;  %v1528_v5 = vadd.f32 %v1524_v39, %v1523_v50 }
 0x33b   : > { %v6293_v26 = vpop.f32.mrf.mxu0  ;;  %v1527_v39 = vmul.f32 %v6012_v13, %v6143_v45  ;;  %v1542_v45 = vmul.f32 %v6012_v13, %v6257_v55  ;;  %v2058_v55 = vmul.f32 %v5965_v30, %v6245_v44  ;;  %v7264_v44 = vld [vmem:[#allocation22_spill] sm:$0xff] }
 0x33c   : > { %v1489_v32 = vrot.slane %v1488_v60, 2  ;;  %v2004_v27 = vadd.f32 %v2003_v51, %v2000_v22  ;;  %2450 = vmatmul.f32.gmra.mxu1 %v7257_v16  ;;  %2962 = vmatmul.f32.gmra.mxu3 %v7257_v16  ;;  %v1540_v22 = vmul.f32 %v5965_v30, %v6219_v12 }
 0x33e   : > { %v1490_v4 = vadd.f32 %v1489_v32, %v1488_v60  ;;  %v2005_v43 = vrot.slane %v2004_v27, 4  ;;  %2385 = vmatmul.f32.gmra.mxu0 %v7258_v38  ;;  %2897 = vmatmul.f32.gmra.mxu2 %v7258_v38  ;;  %v1538_v60 = vmul.f32 %v5935_v49, %v6169_v11  ;;  %v1529_v38 = vadd.f32 %v1528_v5, %v1525_v21  ;;  %v6323_v11 = vpop.permute.xlu0 %1281 }
 0x33f   : > { %v6307_v3 = vpop.f32.mrf.mxu3  ;;  %7259 = vst [vmem:[#allocation68_spill] sm:$0xff] %v6323_v11 }
 0x340   : > { %v1491_v8 = vrot.slane %v1490_v4, 1  ;;  %v2006_v51 = vadd.f32 %v2005_v43, %v2004_v27  ;;  %v1543_v27 = vadd.f32 %v1539_v58, %v1538_v60  ;;  %v1530_v21 = vadd.f32 %v1529_v38, %v1526_v59  ;;  %v7261_v58 = vld [vmem:[#allocation78_spill] sm:$0xff]  ;;  %v7262_v38 = vld [vmem:[#allocation37_spill] sm:$0xff] }
 0x341   : > { %v1436_v40 = vpop.f32.mrf.mxu1  ;;  %v6315_v32 = vpop.f32.mrf.mxu2 }
 0x342   : > { %v1492_v25 = vadd.f32 %v1491_v8, %v1490_v4  ;;  %v2007_v16 = vrot.slane %v2006_v51, 2  ;;  %v1518_v4 = vadd.f32 %v1517_v36, %v1516_v23  ;;  %v1544_v5 = vadd.f32 %v1543_v27, %v1540_v22 }
 0x343   : > { %v6321_v50 = vpop.f32.mrf.mxu0  ;;  %v1531_v8 = vadd.f32 %v1530_v21, %v1527_v39  ;;  %v2035_v39 = vrot.slane %v7262_v38, 4  ;;  %v1360_v21 = vadd.f32 %v6201_v17, %v6285_v1  ;;  %v7265_v17 = vld [vmem:[#allocation79_spill] sm:$0xff] }
 0x344   : > { %v6327_v12 = vsel %vm1570_vm1, %v6188_v19, %v1492_v25  ;;  %v2008_v43 = vadd.f32 %v2007_v16, %v2006_v51  ;;  %2453 = vmatmul.f32.gmra.mxu1 %v7260_v18  ;;  %2965 = vmatmul.f32.gmra.mxu3 %v7260_v18  ;;  %v1545_v60 = vadd.f32 %v1544_v5, %v1541_v37  ;;  %v1519_v36 = vrot.slane %v1518_v4, 2 }
 0x345   : > { %v2057_v51 = vmul.f32 %v5941_v14, %v6237_v0  ;;  %v2056_v18 = vmul.f32 %v5935_v49, %v6181_v42  ;;  %v1532_v27 = vrot.slane %v1531_v8, 4  ;;  %v7263_v42 = vld [vmem:[#allocation42_spill] sm:$0xff] }
 0x346   : > { %v2009_v24 = vrot.slane %v2008_v43, 1  ;;  %2388 = vmatmul.f32.gmra.mxu0 %v7261_v58  ;;  %2900 = vmatmul.f32.gmra.mxu2 %v7261_v58  ;;  %v1546_v59 = vadd.f32 %v1545_v60, %v1542_v45  ;;  %v6357_v5 = vadd.f32 %v1519_v36, %v1518_v4  ;;  %v2060_v60 = vmul.f32 %v6012_v13, %v6283_v46 }
 0x347   : > { %v6335_v19 = vpop.f32.mrf.mxu3  ;;  %v2061_v37 = vadd.f32 %v2057_v51, %v2056_v18  ;;  %v2036_v4 = vadd.f32 %v2035_v39, %v7262_v38  ;;  %v1533_v51 = vadd.f32 %v1532_v27, %v1531_v8  ;;  %v1437_v18 = vadd.f32 %v1436_v40, %v1360_v21 }
 0x348   : > { %v2010_v23 = vadd.f32 %v2009_v24, %v2008_v43  ;;  %v2059_v43 = vmul.f32 %v5992_v48, %v6255_v52  ;;  %v1547_v45 = vrot.slane %v1546_v59, 4  ;;  %v6362_v24 = vpop.permute.xlu0 %1286  ;;  %v1363_v52 = vadd.f32 %v6221_v57, %v6323_v11 }
 0x349   : > { %v1439_v22 = vpop.f32.mrf.mxu1  ;;  %v6339_v25 = vpop.f32.mrf.mxu2  ;;  %v2062_v58 = vadd.f32 %v2061_v37, %v2058_v55  ;;  %v1366_v55 = vadd.f32 %v6265_v41, %v6362_v24  ;;  %v2037_v38 = vrot.slane %v2036_v4, 2  ;;  %v1534_v8 = vrot.slane %v1533_v51, 2 }
 0x34a   : > { %v6347_v16 = vsel %vm1570_vm1, %v6199_v61, %v2010_v23  ;;  %v1357_v61 = vadd.f32 %v6185_v2, %v7264_v44  ;;  %v2050_v23 = vrot.slane %v6171_v54, 4  ;;  %v1548_v37 = vadd.f32 %v1547_v45, %v1546_v59  ;;  %v6384_v41 = vpop.permute.xlu2 %1291 }
 0x34b   : > { %v6350_v0 = vpop.f32.mrf.mxu0  ;;  %v2063_v36 = vadd.f32 %v2062_v58, %v2059_v43  ;;  %v1440_v31 = vadd.f32 %v1439_v22, %v1363_v52  ;;  %v1875_v39 = vadd.f32 %v6196_v29, %v7264_v44  ;;  %v1878_v40 = vadd.f32 %v6215_v20, %v6285_v1  ;;  %v7266_v22 = vld [vmem:[#allocation53_spill] sm:$0xff] }
 0x34c   : > { %2456 = vmatmul.f32.gmra.mxu1 %v7263_v42  ;;  %2968 = vmatmul.f32.gmra.mxu3 %v7263_v42  ;;  %v1434_v46 = vadd.f32 %v6287_v35, %v1357_v61  ;;  %v2051_v35 = vadd.f32 %v2050_v23, %v6171_v54  ;;  %v1494_v59 = vmul.f32 %v1437_v18, %v5938_v7  ;;  %v1549_v61 = vrot.slane %v1548_v37, 2  ;;  %v7267_v52 = vld [vmem:[#allocation49_spill] sm:$0xff] }
 0x34d   : > { %v1554_v43 = vmul.f32 %v5941_v14, %v1437_v18  ;;  %v1881_v20 = vadd.f32 %v6251_v53, %v6323_v11  ;;  %v1495_v54 = vmul.f32 %v1440_v31, %v5962_v28  ;;  %v1369_v23 = vadd.f32 %v6293_v26, %v6384_v41 }
 0x34e   : > { %2391 = vmatmul.f32.gmra.mxu0 %v7265_v17  ;;  %2903 = vmatmul.f32.gmra.mxu2 %v7265_v17  ;;  %v2064_v17 = vadd.f32 %v2063_v36, %v2060_v60  ;;  %v1493_v45 = vmul.f32 %v1434_v46, %v5932_v9  ;;  %v1553_v29 = vmul.f32 %v5935_v49, %v1434_v46  ;;  %v2052_v11 = vrot.slane %v2051_v35, 2 }
 0x34f   : > { %v1957_v2 = vpop.f32.mrf.mxu3  ;;  %v1555_v60 = vmul.f32 %v5965_v30, %v1440_v31  ;;  %v6401_v36 = vadd.f32 %v2037_v38, %v2036_v4  ;;  %v1952_v18 = vadd.f32 %v6307_v3, %v1875_v39  ;;  %v1955_v53 = vadd.f32 %v6335_v19, %v1878_v40 }
 0x350   : > { %v2065_v58 = vrot.slane %v2064_v17, 4  ;;  %v1498_v46 = vadd.f32 %v1494_v59, %v1493_v45  ;;  %v6409_v44 = vadd.f32 %v1549_v61, %v1548_v37  ;;  %v1958_v26 = vadd.f32 %v1957_v2, %v1881_v20  ;;  %v7268_v61 = vld [vmem:[#allocation52_spill] sm:$0xff] }
 0x351   : > { %v1442_v42 = vpop.f32.mrf.mxu1  ;;  %v6375_v57 = vpop.f32.mrf.mxu2  ;;  %v2012_v59 = vmul.f32 %v1955_v53, %v5938_v7 }
 0x352   : > { %v1443_v21 = vadd.f32 %v1442_v42, %v1366_v55  ;;  %v1884_v55 = vadd.f32 %v6289_v47, %v6362_v24  ;;  %v1558_v42 = vadd.f32 %v1554_v43, %v1553_v29  ;;  %v2066_v3 = vadd.f32 %v2065_v58, %v2064_v17 }
 0x353   : > { %v6382_v27 = vpop.f32.mrf.mxu0  ;;  %v1499_v19 = vadd.f32 %v1498_v46, %v1495_v54  ;;  %v2011_v47 = vmul.f32 %v1952_v18, %v5932_v9  ;;  %v2072_v43 = vmul.f32 %v5941_v14, %v1955_v53  ;;  %v2071_v17 = vmul.f32 %v5935_v49, %v1952_v18  ;;  %v7269_v53 = vld [vmem:[#allocation84_spill] sm:$0xff] }
 0x354   : > { %2459 = vmatmul.f32.gmra.mxu1 %v7266_v22  ;;  %2971 = vmatmul.f32.gmra.mxu3 %v7266_v22  ;;  %v1496_v31 = vmul.f32 %v1443_v21, %v5989_v10  ;;  %v1556_v22 = vmul.f32 %v5992_v48, %v1443_v21  ;;  %v1559_v39 = vadd.f32 %v1558_v42, %v1555_v60  ;;  %v2067_v58 = vrot.slane %v2066_v3, 2 }
 0x355   : > { %v2013_v29 = vmul.f32 %v1958_v26, %v5962_v28  ;;  %v2073_v20 = vmul.f32 %v5965_v30, %v1958_v26  ;;  %v2342_v54 = vadd.f32 %v6321_v50, %v5903_v33  ;;  %v2016_v49 = vadd.f32 %v2012_v59, %v2011_v47 }
 0x356   : > { %2394 = vmatmul.f32.gmra.mxu0 %v7267_v52  ;;  %2906 = vmatmul.f32.gmra.mxu2 %v7267_v52  ;;  %v1535_v52 = vadd.f32 %v1534_v8, %v1533_v51  ;;  %v1500_v51 = vadd.f32 %v1499_v19, %v1496_v31  ;;  %v1560_v37 = vadd.f32 %v1559_v39, %v1556_v22  ;;  %v1551_v50 = vrot.slane %v6409_v44, 1 }
 0x357   : > { %v1960_v6 = vpop.f32.mrf.mxu3  ;;  %v2076_v18 = vadd.f32 %v2072_v43, %v2071_v17  ;;  %v6433_v46 = vadd.f32 %v2052_v11, %v2051_v35  ;;  %v2017_v22 = vadd.f32 %v2016_v49, %v2013_v29  ;;  %v2854_v29 = vadd.f32 %v6339_v25, %v5903_v33 }
 0x358   : > { %v1961_v21 = vadd.f32 %v1960_v6, %v1884_v55  ;;  %v1887_v6 = vadd.f32 %v6315_v32, %v6384_v41  ;;  %v1536_v55 = vrot.slane %v1535_v52, 1 }
 0x359   : > { %v1445_v4 = vpop.f32.mrf.mxu1  ;;  %v6411_v38 = vpop.f32.mrf.mxu2  ;;  %v2077_v26 = vadd.f32 %v2076_v18, %v2073_v20 }
 0x35a   : > { %v1446_v40 = vadd.f32 %v1445_v4, %v1369_v23  ;;  %v2014_v28 = vmul.f32 %v1961_v21, %v5989_v10  ;;  %v2074_v30 = vmul.f32 %v5992_v48, %v1961_v21  ;;  %v1537_v17 = vadd.f32 %v1536_v55, %v1535_v52 }
 0x35b   : > { %v6416_v45 = vpop.f32.mrf.mxu0 }
 0x35c   : > { %v1497_v2 = vmul.f32 %v1446_v40, %v6009_v63  ;;  %v1557_v8 = vmul.f32 %v6012_v13, %v1446_v40  ;;  %2462 = vmatmul.f32.gmra.mxu1 %v7268_v61  ;;  %2974 = vmatmul.f32.gmra.mxu3 %v7268_v61  ;;  %v6438_v40 = vadd.f32 %v2067_v58, %v2066_v3  ;;  %v7271_v61 = vld [vmem:[#allocation96_spill] sm:$0xff] }
 0x35d   : > { %v2018_v48 = vadd.f32 %v2017_v22, %v2014_v28  ;;  %v2078_v43 = vadd.f32 %v2077_v26, %v2074_v30 }
 0x35e   : > { %v1501_v60 = vadd.f32 %v1500_v51, %v1497_v2  ;;  %v1561_v23 = vadd.f32 %v1560_v37, %v1557_v8  ;;  %2397 = vmatmul.f32.gmra.mxu0 %v7269_v53  ;;  %2909 = vmatmul.f32.gmra.mxu2 %v7269_v53  ;;  %v7270_v51 = vrot.slane %v6357_v5, 1  ;;  %v2039_v2 = vrot.slane %v6401_v36, 1 }
 0x35f   : > { %v1963_v31 = vpop.f32.mrf.mxu3 }
 0x360   : > { %v1502_v32 = vrot.slane %v1501_v60, 4  ;;  %v1562_v42 = vrot.slane %v1561_v23, 4  ;;  %v1964_v4 = vadd.f32 %v1963_v31, %v1887_v6  ;;  %v1522_v37 = vadd.f32 %v7270_v51, %v6357_v5  ;;  %v7272_v6 = vld [vmem:[#allocation69_spill] sm:$0xff] }
 0x361   : > { %v2418_v19 = vpop.f32.mrf.mxu1  ;;  %v6436_v39 = vpop.f32.mrf.mxu2  ;;  %v2345_v58 = vadd.f32 %v6350_v0, %v7272_v6 }
 0x362   : > { %v1503_v47 = vadd.f32 %v1502_v32, %v1501_v60  ;;  %v1563_v10 = vadd.f32 %v1562_v42, %v1561_v23  ;;  %v2419_v59 = vadd.f32 %v2418_v19, %v2342_v54  ;;  %v2015_v11 = vmul.f32 %v1964_v4, %v6009_v63  ;;  %v6468_v19 = vld [vmem:[%s3608_s26 + $0x28] sm:$0xff] }
 0x363   : > { %v2075_v35 = vmul.f32 %v6012_v13, %v1964_v4  ;;  %v6442_v21 = vpop.f32.mrf.mxu0  ;;  %v2054_v13 = vrot.slane %v6433_v46, 1  ;;  %v1552_v60 = vadd.f32 %v1551_v50, %v6409_v44  ;;  %v2069_v23 = vrot.slane %v6438_v40, 1 }
 0x364   : > { %v1504_v8 = vrot.slane %v1503_v47, 2  ;;  %v1564_v3 = vrot.slane %v1563_v10, 2  ;;  %2465 = vmatmul.f32.gmra.mxu1 %v7271_v61  ;;  %v2019_v20 = vadd.f32 %v2018_v48, %v2015_v11  ;;  %2977 = vmatmul.f32.gmra.mxu3 %v7271_v61  ;;  %v2857_v42 = vadd.f32 %v6375_v57, %v7272_v6  ;;  %v3369_v57 = vld [vmem:[%s6781_s2 + $0x118] sm:$0xff] }
 0x365   : > { %v2079_v63 = vadd.f32 %v2078_v43, %v2075_v35  ;;  %v2478_v22 = vmul.f32 %v2419_v59, %v5932_v9  ;;  %v7273_v43 = vld [vmem:[#allocation70_spill] sm:$0xff] }
 0x366   : > { %v1505_v5 = vadd.f32 %v1504_v8, %v1503_v47  ;;  %v1565_v54 = vadd.f32 %v1564_v3, %v1563_v10  ;;  %v2020_v53 = vrot.slane %v2019_v20, 4  ;;  %v2538_v47 = vmul.f32 %v6468_v19, %v2419_v59 }
 0x367   : > { %v2080_v52 = vrot.slane %v2079_v63, 4  ;;  %v2930_v33 = vpop.f32.mrf.mxu3  ;;  %v2348_v9 = vadd.f32 %v6382_v27, %v7273_v43  ;;  %v2040_v27 = vadd.f32 %v2039_v2, %v6401_v36 }
 0x368   : > { %v1506_v49 = vrot.slane %v1505_v5, 1  ;;  %v2021_v25 = vadd.f32 %v2020_v53, %v2019_v20  ;;  %v2931_v28 = vadd.f32 %v2930_v33, %v2854_v29  ;;  %v1566_v44 = vrot.slane %v1565_v54, 1  ;;  %v6502_v33 = vld [vmem:[%s3608_s26 + $0x30] sm:$0xff] }
 0x369   : > { %v2081_v18 = vadd.f32 %v2080_v52, %v2079_v63  ;;  %v2421_v0 = vpop.f32.mrf.mxu1  ;;  %v6457_v30 = vpop.f32.mrf.mxu2  ;;  %v6498_v52 = vld [vmem:[%s3608_s26 + $0x8] sm:$0xff] }
 0x36a   : > { %v1507_v55 = vadd.f32 %v1506_v49, %v1505_v5  ;;  %v2422_v32 = vadd.f32 %v2421_v0, %v2345_v58  ;;  %v2022_v31 = vrot.slane %v2021_v25, 2  ;;  %v1567_v51 = vadd.f32 %v1566_v44, %v1565_v54  ;;  %v6491_v54 = vld [vmem:[%s3608_s26] sm:$0xff]  ;;  %v3375_v0 = vld [vmem:[%s6781_s2 + $0x128] sm:$0xff] }
 0x36b   : > { %v2082_v50 = vrot.slane %v2081_v18, 2  ;;  %v6463_v26 = vpop.f32.mrf.mxu0  ;;  %v2055_v58 = vadd.f32 %v2054_v13, %v6433_v46  ;;  %v2070_v5 = vadd.f32 %v2069_v23, %v6438_v40  ;;  %v2990_v36 = vmul.f32 %v6491_v54, %v2931_v28 }
 0x36c   : > { %v1573_v4 = vsel %vm1572_vm2, %v6327_v12, %v1507_v55  ;;  %v2479_v10 = vmul.f32 %v2422_v32, %v5938_v7  ;;  %v2539_v48 = vmul.f32 %v5941_v14, %v2422_v32  ;;  %2468 = vmatmul.f32.gmra.mxu1 %v3369_v57  ;;  %v2023_v35 = vadd.f32 %v2022_v31, %v2021_v25  ;;  %v6511_v25 = vld [vmem:[%s3608_s26 + $0x10] sm:$0xff] }
 0x36d   : > { %v1575_v11 = vsel %vm1574_vm3, %v1573_v4, %v1522_v37  ;;  %v2083_v12 = vadd.f32 %v2082_v50, %v2081_v18  ;;  %2980 = vmatmul.f32.gmra.mxu3 %v3369_v57  ;;  %v3050_v53 = vmul.f32 %v6468_v19, %v2931_v28  ;;  %v2860_v40 = vadd.f32 %v6411_v38, %v7273_v43  ;;  %v6515_v18 = vld [vmem:[%s3608_s26 + $0x38] sm:$0xff] }
 0x36e   : > { %v1577_v59 = vsel %vm1576_vm4, %v1575_v11, %v1537_v17  ;;  %v2483_v8 = vadd.f32 %v2479_v10, %v2478_v22  ;;  %v2543_v7 = vadd.f32 %v2539_v48, %v2538_v47  ;;  %v2024_v3 = vrot.slane %v2023_v35, 1 }
 0x36f   : > { %v1579_v14 = vsel %vm1578_vm5, %v1577_v59, %v1552_v60  ;;  %v2933_v29 = vpop.f32.mrf.mxu3  ;;  %v2084_v20 = vrot.slane %v2083_v12, 1 }
 0x370   : > { %v1581_v61 = vsel %vm1580_vm6, %v1579_v14, %v1567_v51  ;;  %v2025_v37 = vadd.f32 %v2024_v3, %v2023_v35  ;;  %v2934_v17 = vadd.f32 %v2933_v29, %v2857_v42  ;;  %v7274_v42 = vld [vmem:[#allocation82_spill] sm:$0xff]  ;;  %v7275_v29 = vld [vmem:[#allocation83_spill] sm:$0xff] }
 0x371   : > { %1582 = vst [vmem:[%s6483_s8] sm:$0xff] %v1581_v61  ;;  %v2424_v63 = vpop.f32.mrf.mxu1  ;;  %v6486_v6 = vpop.f32.mrf.mxu2  ;;  %v2085_v55 = vadd.f32 %v2084_v20, %v2083_v12  ;;  %v2351_v31 = vadd.f32 %v6416_v45, %v7274_v42  ;;  %v6530_v12 = vld [vmem:[%s3608_s26 + $0x18] sm:$0xff]  ;;  %v6534_v51 = vld [vmem:[%s3608_s26 + $0x40] sm:$0xff]  ;;  %v2863_v14 = vadd.f32 %v6436_v39, %v7274_v42 }
 0x372   : > { %v2425_v2 = vadd.f32 %v2424_v63, %v2348_v9  ;;  %v2088_v60 = vsel %vm1572_vm2, %v6347_v16, %v2025_v37  ;;  %v2991_v49 = vmul.f32 %v6498_v52, %v2934_v17  ;;  %v3051_v46 = vmul.f32 %v6502_v33, %v2934_v17 }
 0x373   : > { %v6505_v13 = vpop.f32.mrf.mxu0  ;;  %v2089_v23 = vsel %vm1574_vm3, %v2088_v60, %v2040_v27  ;;  %v2354_v27 = vadd.f32 %v6442_v21, %v7275_v29  ;;  %v2866_v21 = vadd.f32 %v6457_v30, %v7275_v29  ;;  %v2869_v30 = vadd.f32 %v6486_v6, %v6020_v34 }
 0x374   : > { %v2480_v16 = vmul.f32 %v6511_v25, %v2425_v2  ;;  %v2540_v28 = vmul.f32 %v6515_v18, %v2425_v2  ;;  %2471 = vmatmul.f32.gmra.mxu1 %v3375_v0  ;;  %v2090_v44 = vsel %vm1576_vm4, %v2089_v23, %v2055_v58  ;;  %v2995_v38 = vadd.f32 %v2991_v49, %v2990_v36  ;;  %v6551_v49 = vld [vmem:[%s3608_s26 + $0x48] sm:$0xff] }
 0x375   : > { %v3055_v32 = vadd.f32 %v3051_v46, %v3050_v53  ;;  %2983 = vmatmul.f32.gmra.mxu3 %v3375_v0  ;;  %v2091_v50 = vsel %vm1578_vm5, %v2090_v44, %v2070_v5  ;;  %v6547_v53 = vld [vmem:[%s3608_s26 + $0x20] sm:$0xff]  ;;  %s3246_s26 = sshll.u32 %s3538_s22, 3  ;;  %s3131_s22 = sshll.u32 %s6483_s8, 4  ;;  %s3132_s22 = int_to_ptr.vmem [resolvable:$true] %s3131_s22 }
 0x376   : > { %v2484_v22 = vadd.f32 %v2483_v8, %v2480_v16  ;;  %v2544_v4 = vadd.f32 %v2543_v7, %v2540_v28  ;;  %v2092_v47 = vsel %vm1580_vm6, %v2091_v50, %v2085_v55  ;;  %v3378_v7 = vld [vmem:[%s6781_s2 + $0x138] sm:$0xff]  ;;  %v2357_v16 = vadd.f32 %v6463_v26, %v6020_v34  ;;  %s3130_s13 = scalar_lea.hbm %s6784_s5, %s3246_s26 }
 0x377   : > { %3240 = vst [vmem:[%s6483_s8 + $0x8] sm:$0xff] %v2092_v47  ;;  %v2936_v10 = vpop.f32.mrf.mxu3  ;;  %v2360_v47 = vadd.f32 %v6505_v13, %v6049_v15  ;;  %s3133_s17 = sshll.u32 %s3130_s13, 4  ;;  %s3134_s17 = int_to_ptr.hbm [resolvable:$true] %s3133_s17 }
 0x378   : > { %v2937_v48 = vadd.f32 %v2936_v10, %v2860_v40  ;;  %s3423_s15 = sshra.s32 %s3134_s17, 4  ;;  %s3424_s15 = int_to_ptr.hbm [resolvable:$true] %s3423_s15 }
 0x379   : > { %v2427_v57 = vpop.f32.mrf.mxu1  ;;  %v2871_v43 = vpop.f32.mrf.mxu2  ;;  %s3425_s16 = scalar_lea.hbm %s3424_s15, 32  ;;  %p3430_p0 = scmp.lt.s32.totalorder %s3424_s15, %s6784_s5 }
 0x37a   : > { %v2428_v9 = vadd.f32 %v2427_v57, %v2351_v31  ;;  %v2992_v11 = vmul.f32 %v6511_v25, %v2937_v48  ;;  %v3052_v35 = vmul.f32 %v6515_v18, %v2937_v48  ;;  %v2872_v6 = vadd.f32 %v2871_v43, %v6049_v15  ;;  %p3426_p5 = scmp.ne.s32.totalorder %s3424_s15, %s3425_s16  ;;  %p3431_p1 = scmp.lt.s32.totalorder %s3429_s28, %s3425_s16 }
 0x37b   : > { %v2362_v8 = vpop.f32.mrf.mxu0 }
 0x37c   : > { %v2481_v45 = vmul.f32 %v6530_v12, %v2428_v9  ;;  %v2541_v59 = vmul.f32 %v6534_v51, %v2428_v9  ;;  %2474 = vmatmul.f32.gmra.mxu1 %v3378_v7  ;;  %v2996_v3 = vadd.f32 %v2995_v38, %v2992_v11  ;;  %v3056_v61 = vadd.f32 %v3055_v32, %v3052_v35  ;;  %p3427_p6 = pnand %p3426_p5, %p3565_p9  ;;  %p3432_p2 = por %p3431_p1, %p3430_p0 }
 0x37d   : > { %2986 = vmatmul.f32.gmra.mxu3 %v3378_v7  ;;  %v7276_v7 = vld [vmem:[#allocation40_spill] sm:$0xff] }
 0x37e   : > { %v2485_v37 = vadd.f32 %v2484_v22, %v2481_v45  ;;  %v2545_v20 = vadd.f32 %v2544_v4, %v2541_v59  ;;  %p3428_p13 = pneg %p3427_p6 }
 0x37f   : > { %v2939_v17 = vpop.f32.mrf.mxu3 }
 0x380   : > { %v2940_v63 = vadd.f32 %v2939_v17, %v2863_v14  ;;  %v2363_v14 = vadd.f32 %v2362_v8, %v7276_v7  ;;  %p3433_p3 = pnand %p3432_p2, %p3428_p13 }
 0x381   : > { %v2430_v58 = vpop.f32.mrf.mxu1  ;;  %v2874_v60 = vpop.f32.mrf.mxu2 }
 0x382   : > { %v2431_v5 = vadd.f32 %v2430_v58, %v2354_v27  ;;  %v2993_v36 = vmul.f32 %v6530_v12, %v2940_v63  ;;  %v3053_v2 = vmul.f32 %v6534_v51, %v2940_v63  ;;  %v2875_v8 = vadd.f32 %v2874_v60, %v7276_v7 }
 0x383   : > { %v2365_v55 = vpop.f32.mrf.mxu0 }
 0x384   : > { %v2482_v39 = vmul.f32 %v6547_v53, %v2431_v5  ;;  %v2542_v46 = vmul.f32 %v6551_v49, %v2431_v5  ;;  %v2997_v40 = vadd.f32 %v2996_v3, %v2993_v36  ;;  %v3057_v23 = vadd.f32 %v3056_v61, %v3053_v2 }
 0x386   : > { %v6558_v28 = vadd.f32 %v2485_v37, %v2482_v39  ;;  %v6560_v0 = vadd.f32 %v2545_v20, %v2542_v46  ;;  %v7277_v46 = vld [vmem:[#allocation26_spill] sm:$0xff] }
 0x387   : > { %v2942_v44 = vpop.f32.mrf.mxu3 }
 0x388   : > { %v2943_v38 = vadd.f32 %v2942_v44, %v2866_v21  ;;  %v2366_v21 = vadd.f32 %v2365_v55, %v7277_v46 }
 0x389   : > { %v2433_v32 = vpop.f32.mrf.mxu1  ;;  %v2877_v26 = vpop.f32.mrf.mxu2 }
 0x38a   : > { %v2434_v42 = vadd.f32 %v2433_v32, %v2357_v16  ;;  %v2994_v31 = vmul.f32 %v6547_v53, %v2943_v38  ;;  %v3054_v50 = vmul.f32 %v6551_v49, %v2943_v38 }
 0x38b   : > { %v2368_v10 = vpop.f32.mrf.mxu0 }
 0x38c   : > { %v6566_v22 = vadd.f32 %v2997_v40, %v2994_v31  ;;  %v6568_v4 = vadd.f32 %v3057_v23, %v3054_v50  ;;  %v2493_v35 = vmul.f32 %v6491_v54, %v2434_v42  ;;  %v2553_v45 = vmul.f32 %v6468_v19, %v2434_v42 }
 0x38f   : > { %v2945_v48 = vpop.f32.mrf.mxu3 }
 0x390   : > { %v2946_v57 = vadd.f32 %v2945_v48, %v2869_v30  ;;  %v2878_v48 = vadd.f32 %v2877_v26, %v7277_v46 }
 0x391   : > { %v2436_v9 = vpop.f32.mrf.mxu1  ;;  %v2880_v13 = vpop.f32.mrf.mxu2 }
 0x392   : > { %v2437_v11 = vadd.f32 %v2436_v9, %v2360_v47  ;;  %v3005_v63 = vmul.f32 %v6491_v54, %v2946_v57  ;;  %v3065_v58 = vmul.f32 %v6468_v19, %v2946_v57  ;;  %v2487_v9 = vrot.slane %v6558_v28, 4 }
 0x393   : > { %v2371_v20 = vpop.f32.mrf.mxu0 }
 0x394   : > { %v2494_v59 = vmul.f32 %v6498_v52, %v2437_v11  ;;  %v2554_v34 = vmul.f32 %v6502_v33, %v2437_v11  ;;  %v7278_v11 = vld [vmem:[#allocation27_spill] sm:$0xff] }
 0x396   : > { %v2498_v3 = vadd.f32 %v2494_v59, %v2493_v35  ;;  %v2558_v61 = vadd.f32 %v2554_v34, %v2553_v45  ;;  %v2369_v35 = vadd.f32 %v2368_v10, %v7278_v11  ;;  %v2881_v10 = vadd.f32 %v2880_v13, %v7278_v11 }
 0x397   : > { %v2948_v29 = vpop.f32.mrf.mxu3 }
 0x398   : > { %v2949_v27 = vadd.f32 %v2948_v29, %v2872_v6 }
 0x399   : > { %v2439_v37 = vpop.f32.mrf.mxu1  ;;  %v2883_v44 = vpop.f32.mrf.mxu2 }
 0x39a   : > { %v2440_v17 = vadd.f32 %v2439_v37, %v2363_v14  ;;  %v3006_v5 = vmul.f32 %v6498_v52, %v2949_v27  ;;  %v3066_v36 = vmul.f32 %v6502_v33, %v2949_v27  ;;  %v2488_v14 = vadd.f32 %v2487_v9, %v6558_v28 }
 0x39b   : > { %v6588_v30 = vpop.f32.mrf.mxu0 }
 0x39c   : > { %v2495_v15 = vmul.f32 %v6511_v25, %v2440_v17  ;;  %v2555_v43 = vmul.f32 %v6515_v18, %v2440_v17  ;;  %v3010_v2 = vadd.f32 %v3006_v5, %v3005_v63  ;;  %v3070_v39 = vadd.f32 %v3066_v36, %v3065_v58 }
 0x39d   : > { %v2999_v17 = vrot.slane %v6566_v22, 4  ;;  %v2489_v5 = vrot.slane %v2488_v14, 2  ;;  %v2372_v36 = vadd.f32 %v2371_v20, %v6153_v62 }
 0x39e   : > { %v2499_v40 = vadd.f32 %v2498_v3, %v2495_v15  ;;  %v2559_v23 = vadd.f32 %v2558_v61, %v2555_v43 }
 0x39f   : > { %v2951_v16 = vpop.f32.mrf.mxu3 }
 0x3a0   : > { %v2952_v38 = vadd.f32 %v2951_v16, %v2875_v8 }
 0x3a1   : > { %v2442_v32 = vpop.f32.mrf.mxu1  ;;  %v2886_v61 = vpop.f32.mrf.mxu2 }
 0x3a2   : > { %v2443_v42 = vadd.f32 %v2442_v32, %v2366_v21  ;;  %v3007_v31 = vmul.f32 %v6511_v25, %v2952_v38  ;;  %v3067_v50 = vmul.f32 %v6515_v18, %v2952_v38 }
 0x3a3   : > { %v2377_v28 = vpop.f32.mrf.mxu0 }
 0x3a4   : > { %v2496_v47 = vmul.f32 %v6530_v12, %v2443_v42  ;;  %v2556_v60 = vmul.f32 %v6534_v51, %v2443_v42  ;;  %v3011_v55 = vadd.f32 %v3010_v2, %v3007_v31  ;;  %v3071_v57 = vadd.f32 %v3070_v39, %v3067_v50 }
 0x3a5   : > { %v3000_v39 = vadd.f32 %v2999_v17, %v6566_v22  ;;  %v2884_v42 = vadd.f32 %v2883_v44, %v6153_v62 }
 0x3a6   : > { %v2500_v45 = vadd.f32 %v2499_v40, %v2496_v47  ;;  %v2560_v59 = vadd.f32 %v2559_v23, %v2556_v60  ;;  %v2490_v40 = vadd.f32 %v2489_v5, %v2488_v14  ;;  %v7279_v5 = vld [vmem:[#allocation56_spill] sm:$0xff] }
 0x3a7   : > { %v2954_v34 = vpop.f32.mrf.mxu3  ;;  %v3001_v20 = vrot.slane %v3000_v39, 2 }
 0x3a8   : > { %v2955_v6 = vadd.f32 %v2954_v34, %v2878_v48  ;;  %v2491_v60 = vrot.slane %v2490_v40, 1 }
 0x3a9   : > { %v2445_v7 = vpop.f32.mrf.mxu1  ;;  %v2889_v31 = vpop.f32.mrf.mxu2  ;;  %v3002_v11 = vadd.f32 %v3001_v20, %v3000_v39 }
 0x3aa   : > { %v2446_v3 = vadd.f32 %v2445_v7, %v2369_v35  ;;  %v3008_v29 = vmul.f32 %v6530_v12, %v2955_v6  ;;  %v3068_v27 = vmul.f32 %v6534_v51, %v2955_v6  ;;  %v2492_v34 = vadd.f32 %v2491_v60, %v2490_v40  ;;  %v7281_v60 = vld [vmem:[#allocation47_spill] sm:$0xff] }
 0x3ab   : > { %v3003_v44 = vrot.slane %v3002_v11, 1  ;;  %v2890_v20 = vadd.f32 %v2889_v31, %v7279_v5 }
 0x3ac   : > { %v2497_v26 = vmul.f32 %v6547_v53, %v2446_v3  ;;  %v2557_v37 = vmul.f32 %v6551_v49, %v2446_v3  ;;  %v3012_v63 = vadd.f32 %v3011_v55, %v3008_v29  ;;  %v3072_v58 = vadd.f32 %v3071_v57, %v3068_v27  ;;  %v2380_v57 = vpop.f32.mrf.mxu0 }
 0x3ae   : > { %v2501_v15 = vadd.f32 %v2500_v45, %v2497_v26  ;;  %v6603_v43 = vadd.f32 %v2560_v59, %v2557_v37  ;;  %v3004_v26 = vadd.f32 %v3003_v44, %v3002_v11 }
 0x3af   : > { %v2957_v2 = vpop.f32.mrf.mxu3 }
 0x3b0   : > { %v2502_v8 = vrot.slane %v2501_v15, 4  ;;  %v2958_v46 = vadd.f32 %v2957_v2, %v2881_v10 }
 0x3b1   : > { %v2448_v21 = vpop.f32.mrf.mxu1  ;;  %v2892_v29 = vpop.f32.mrf.mxu2 }
 0x3b2   : > { %v2503_v23 = vadd.f32 %v2502_v8, %v2501_v15  ;;  %v6606_v16 = vadd.f32 %v2448_v21, %v2372_v36  ;;  %v3009_v13 = vmul.f32 %v6547_v53, %v2958_v46  ;;  %v3069_v38 = vmul.f32 %v6551_v49, %v2958_v46  ;;  %v7280_v15 = vld [vmem:[#allocation102_spill] sm:$0xff] }
 0x3b3   : > { %v2378_v36 = vadd.f32 %v2377_v28, %v7279_v5  ;;  %v2381_v8 = vadd.f32 %v2380_v57, %v7280_v15 }
 0x3b4   : > { %v2504_v32 = vrot.slane %v2503_v23, 2  ;;  %v3013_v50 = vadd.f32 %v3012_v63, %v3009_v13  ;;  %v6611_v47 = vadd.f32 %v3072_v58, %v3069_v38  ;;  %v2383_v10 = vpop.f32.mrf.mxu0  ;;  %v2375_v58 = vadd.f32 %v6588_v30, %v6155_v56 }
 0x3b5   : > { %v2508_v30 = vmul.f32 %v6491_v54, %v6606_v16 }
 0x3b6   : > { %v2505_v22 = vadd.f32 %v2504_v32, %v2503_v23  ;;  %v3014_v48 = vrot.slane %v3013_v50, 4  ;;  %v2887_v23 = vadd.f32 %v2886_v61, %v6155_v56 }
 0x3b7   : > { %v2960_v9 = vpop.f32.mrf.mxu3 }
 0x3b8   : > { %v2506_v55 = vrot.slane %v2505_v22, 1  ;;  %v3015_v35 = vadd.f32 %v3014_v48, %v3013_v50  ;;  %v6613_v45 = vadd.f32 %v2960_v9, %v2884_v42  ;;  %v2893_v42 = vadd.f32 %v2892_v29, %v7280_v15 }
 0x3b9   : > { %v2451_v59 = vpop.f32.mrf.mxu1  ;;  %v2895_v46 = vpop.f32.mrf.mxu2 }
 0x3ba   : > { %v2507_v6 = vadd.f32 %v2506_v55, %v2505_v22  ;;  %v3016_v7 = vrot.slane %v3015_v35, 2  ;;  %v2452_v2 = vadd.f32 %v2451_v59, %v2375_v58  ;;  %v2384_v22 = vadd.f32 %v2383_v10, %v7281_v60 }
 0x3bb   : > { %v2896_v29 = vadd.f32 %v2895_v46, %v7281_v60 }
 0x3bc   : > { %v6616_v62 = vsel %vm1568_vm0, %v2492_v34, %v2507_v6  ;;  %v3017_v14 = vadd.f32 %v3016_v7, %v3015_v35  ;;  %v2509_v13 = vmul.f32 %v6498_v52, %v2452_v2  ;;  %v6627_v38 = vpop.f32.mrf.mxu0  ;;  %v3020_v7 = vmul.f32 %v6491_v54, %v6613_v45 }
 0x3be   : > { %v3018_v3 = vrot.slane %v3017_v14, 1  ;;  %v2513_v48 = vadd.f32 %v2509_v13, %v2508_v30 }
 0x3bf   : > { %v2963_v27 = vpop.f32.mrf.mxu3 }
 0x3c0   : > { %v3019_v37 = vadd.f32 %v3018_v3, %v3017_v14  ;;  %v2964_v50 = vadd.f32 %v2963_v27, %v2887_v23 }
 0x3c1   : > { %v2454_v17 = vpop.f32.mrf.mxu1  ;;  %v6639_v35 = vpop.f32.mrf.mxu2 }
 0x3c2   : > { %v6619_v63 = vsel %vm1568_vm0, %v3004_v26, %v3019_v37  ;;  %v2455_v40 = vadd.f32 %v2454_v17, %v2378_v36  ;;  %v3021_v31 = vmul.f32 %v6498_v52, %v2964_v50 }
 0x3c4   : > { %v2510_v28 = vmul.f32 %v6511_v25, %v2455_v40  ;;  %v2389_v14 = vpop.f32.mrf.mxu0  ;;  %v3025_v27 = vadd.f32 %v3021_v31, %v3020_v7  ;;  %v2568_v7 = vmul.f32 %v6468_v19, %v6606_v16 }
 0x3c6   : > { %v2514_v9 = vadd.f32 %v2513_v48, %v2510_v28 }
 0x3c7   : > { %v2966_v39 = vpop.f32.mrf.mxu3 }
 0x3c8   : > { %v6636_v55 = vadd.f32 %v2966_v39, %v2890_v20 }
 0x3c9   : > { %v2457_v21 = vpop.f32.mrf.mxu1 }
 0x3ca   : > { %v2458_v32 = vadd.f32 %v2457_v21, %v2381_v8  ;;  %v3022_v44 = vmul.f32 %v6511_v25, %v6636_v55  ;;  %v2901_v21 = vpop.f32.mrf.mxu2 }
 0x3cc   : > { %v2511_v56 = vmul.f32 %v6530_v12, %v2458_v32  ;;  %v3026_v10 = vadd.f32 %v3025_v27, %v3022_v44  ;;  %v2392_v20 = vpop.f32.mrf.mxu0  ;;  %v2570_v44 = vmul.f32 %v6515_v18, %v2455_v40  ;;  %v2562_v40 = vrot.slane %v6603_v43, 4 }
 0x3ce   : > { %v2515_v34 = vadd.f32 %v2514_v9, %v2511_v56  ;;  %v2569_v9 = vmul.f32 %v6502_v33, %v2452_v2 }
 0x3cf   : > { %v2969_v61 = vpop.f32.mrf.mxu3 }
 0x3d0   : > { %v6641_v59 = vadd.f32 %v2969_v61, %v2893_v42 }
 0x3d1   : > { %v2460_v57 = vpop.f32.mrf.mxu1 }
 0x3d2   : > { %v2461_v11 = vadd.f32 %v2460_v57, %v2384_v22  ;;  %v3023_v26 = vmul.f32 %v6530_v12, %v6641_v59  ;;  %v2547_v57 = vrot.slane %v6560_v0, 4  ;;  %v2904_v31 = vpop.f32.mrf.mxu2 }
 0x3d4   : > { %v2512_v6 = vmul.f32 %v6547_v53, %v2461_v11  ;;  %v3027_v15 = vadd.f32 %v3026_v10, %v3023_v26  ;;  %v2395_v27 = vpop.f32.mrf.mxu0  ;;  %v2548_v26 = vadd.f32 %v2547_v57, %v6560_v0  ;;  %v2572_v10 = vmul.f32 %v6551_v49, %v2461_v11 }
 0x3d5   : > { %v3082_v11 = vmul.f32 %v6515_v18, %v6636_v55 }
 0x3d6   : > { %v2516_v3 = vadd.f32 %v2515_v34, %v2512_v6  ;;  %v2549_v16 = vrot.slane %v2548_v26, 2 }
 0x3d7   : > { %v2972_v17 = vpop.f32.mrf.mxu3 }
 0x3d8   : > { %v2517_v37 = vrot.slane %v2516_v3, 4  ;;  %v6651_v58 = vadd.f32 %v2972_v17, %v2896_v29 }
 0x3d9   : > { %v2463_v5 = vpop.f32.mrf.mxu1 }
 0x3da   : > { %v2518_v36 = vadd.f32 %v2517_v37, %v2516_v3  ;;  %v3024_v8 = vmul.f32 %v6547_v53, %v6651_v58  ;;  %v2571_v37 = vmul.f32 %v6534_v51, %v2458_v32 }
 0x3dc   : > { %v2519_v39 = vrot.slane %v2518_v36, 2  ;;  %v3028_v23 = vadd.f32 %v3027_v15, %v3024_v8  ;;  %v3081_v15 = vmul.f32 %v6502_v33, %v2964_v50  ;;  %v2398_v57 = vpop.f32.mrf.mxu0 }
 0x3de   : > { %v2520_v13 = vadd.f32 %v2519_v39, %v2518_v36  ;;  %v3029_v46 = vrot.slane %v3028_v23, 4  ;;  %v2390_v36 = vadd.f32 %v2389_v14, %v6285_v1  ;;  %v7282_v39 = vld [vmem:[#allocation22_spill] sm:$0xff] }
 0x3df   : > { %v6655_v28 = vpop.f32.mrf.mxu3  ;;  %v2387_v0 = vadd.f32 %v6627_v38, %v7282_v39  ;;  %v3059_v38 = vrot.slane %v6568_v4, 4 }
 0x3e0   : > { %v2521_v30 = vrot.slane %v2520_v13, 1  ;;  %v3030_v42 = vadd.f32 %v3029_v46, %v3028_v23  ;;  %v7283_v23 = vld [vmem:[#allocation68_spill] sm:$0xff] }
 0x3e1   : > { %v2466_v60 = vpop.f32.mrf.mxu1  ;;  %v2393_v32 = vadd.f32 %v2392_v20, %v7283_v23  ;;  %v2464_v50 = vadd.f32 %v2463_v5, %v2387_v0  ;;  %v6688_v20 = vadd.f32 %v2562_v40, %v6603_v43  ;;  %v2902_v5 = vadd.f32 %v2901_v21, %v6285_v1 }
 0x3e2   : > { %v2522_v22 = vadd.f32 %v2521_v30, %v2520_v13  ;;  %v3031_v48 = vrot.slane %v3030_v42, 2  ;;  %v2467_v13 = vadd.f32 %v2466_v60, %v2390_v36  ;;  %v2907_v30 = vpop.f32.mrf.mxu2 }
 0x3e3   : > { %v2523_v43 = vmul.f32 %v6491_v54, %v2464_v50  ;;  %v2908_v40 = vadd.f32 %v2907_v30, %v6362_v24 }
 0x3e4   : > { %v6659_v56 = vsel %vm1570_vm1, %v6616_v62, %v2522_v22  ;;  %v3032_v61 = vadd.f32 %v3031_v48, %v3030_v42  ;;  %v2573_v62 = vadd.f32 %v2569_v9, %v2568_v7  ;;  %v2396_v22 = vadd.f32 %v2395_v27, %v6362_v24 }
 0x3e5   : > { %v2524_v55 = vmul.f32 %v6498_v52, %v2467_v13  ;;  %v2584_v9 = vmul.f32 %v6502_v33, %v2467_v13 }
 0x3e6   : > { %v3033_v34 = vrot.slane %v3032_v61, 1  ;;  %v2574_v2 = vadd.f32 %v2573_v62, %v2570_v44  ;;  %v3083_v44 = vmul.f32 %v6534_v51, %v6641_v59  ;;  %v3084_v62 = vmul.f32 %v6551_v49, %v6651_v58 }
 0x3e7   : > { %v2978_v6 = vpop.f32.mrf.mxu3  ;;  %v2528_v21 = vadd.f32 %v2524_v55, %v2523_v43 }
 0x3e8   : > { %v3034_v3 = vadd.f32 %v3033_v34, %v3032_v61  ;;  %v2575_v8 = vadd.f32 %v2574_v2, %v2571_v37  ;;  %v6684_v61 = vadd.f32 %v2549_v16, %v2548_v26  ;;  %v2905_v26 = vadd.f32 %v2904_v31, %v7283_v23 }
 0x3e9   : > { %v2469_v29 = vpop.f32.mrf.mxu1  ;;  %v2399_v37 = vadd.f32 %v2398_v57, %v6384_v41  ;;  %v2979_v1 = vadd.f32 %v2978_v6, %v2902_v5 }
 0x3ea   : > { %v6670_v17 = vsel %vm1570_vm1, %v6619_v63, %v3034_v3  ;;  %v3080_v63 = vmul.f32 %v6468_v19, %v6613_v45  ;;  %v2576_v14 = vadd.f32 %v2575_v8, %v2572_v10  ;;  %v2470_v48 = vadd.f32 %v2469_v29, %v2393_v32  ;;  %v2910_v6 = vpop.f32.mrf.mxu2 }
 0x3eb   : > { %v2899_v45 = vadd.f32 %v6639_v35, %v7282_v39  ;;  %v2583_v29 = vmul.f32 %v6468_v19, %v2464_v50  ;;  %v3036_v13 = vmul.f32 %v6498_v52, %v2979_v1  ;;  %v2911_v52 = vadd.f32 %v2910_v6, %v6384_v41 }
 0x3ec   : > { %v3085_v60 = vadd.f32 %v3081_v15, %v3080_v63  ;;  %v2577_v3 = vrot.slane %v2576_v14, 4  ;;  %v2525_v27 = vmul.f32 %v6511_v25, %v2470_v48  ;;  %v2585_v35 = vmul.f32 %v6515_v18, %v2470_v48 }
 0x3ed   : > { %v2588_v2 = vadd.f32 %v2584_v9, %v2583_v29  ;;  %v2976_v15 = vadd.f32 %v6655_v28, %v2899_v45  ;;  %v3096_v63 = vmul.f32 %v6502_v33, %v2979_v1  ;;  %v3074_v48 = vrot.slane %v6611_v47, 4 }
 0x3ee   : > { %v3086_v7 = vadd.f32 %v3085_v60, %v3082_v11  ;;  %v2578_v39 = vadd.f32 %v2577_v3, %v2576_v14  ;;  %v2529_v0 = vadd.f32 %v2528_v21, %v2525_v27  ;;  %v3060_v41 = vadd.f32 %v3059_v38, %v6568_v4 }
 0x3ef   : > { %v2589_v58 = vadd.f32 %v2588_v2, %v2585_v35  ;;  %v3035_v28 = vmul.f32 %v6491_v54, %v2976_v15  ;;  %v2564_v54 = vrot.slane %v6688_v20, 2  ;;  %v3075_v43 = vadd.f32 %v3074_v48, %v6611_v47 }
 0x3f0   : > { %v2981_v46 = vpop.f32.mrf.mxu3  ;;  %v3087_v16 = vadd.f32 %v3086_v7, %v3083_v44  ;;  %v2579_v5 = vrot.slane %v2578_v39, 2  ;;  %v2551_v47 = vrot.slane %v6684_v61, 1 }
 0x3f1   : > { %v2472_v42 = vpop.f32.mrf.mxu1  ;;  %v2982_v8 = vadd.f32 %v2981_v46, %v2905_v26  ;;  %v3095_v46 = vmul.f32 %v6468_v19, %v2976_v15  ;;  %v3040_v45 = vadd.f32 %v3036_v13, %v3035_v28 }
 0x3f2   : > { %v2473_v34 = vadd.f32 %v2472_v42, %v2396_v22  ;;  %v3088_v32 = vadd.f32 %v3087_v16, %v3084_v62  ;;  %v2565_v62 = vadd.f32 %v2564_v54, %v6688_v20  ;;  %v2580_v2 = vadd.f32 %v2579_v5, %v2578_v39 }
 0x3f3   : > { %v3037_v14 = vmul.f32 %v6511_v25, %v2982_v8  ;;  %v3097_v30 = vmul.f32 %v6515_v18, %v2982_v8  ;;  %v3100_v57 = vadd.f32 %v3096_v63, %v3095_v46  ;;  %v3076_v16 = vrot.slane %v3075_v43, 2 }
 0x3f4   : > { %v2526_v59 = vmul.f32 %v6530_v12, %v2473_v34  ;;  %v2586_v10 = vmul.f32 %v6534_v51, %v2473_v34  ;;  %v3089_v34 = vrot.slane %v3088_v32, 4  ;;  %v2566_v8 = vrot.slane %v2565_v62, 1 }
 0x3f5   : > { %v3041_v18 = vadd.f32 %v3040_v45, %v3037_v14  ;;  %v3101_v44 = vadd.f32 %v3100_v57, %v3097_v30  ;;  %v3077_v6 = vadd.f32 %v3076_v16, %v3075_v43 }
 0x3f6   : > { %v2530_v42 = vadd.f32 %v2529_v0, %v2526_v59  ;;  %v2590_v22 = vadd.f32 %v2589_v58, %v2586_v10 }
 0x3f7   : > { %v3078_v48 = vrot.slane %v3077_v6, 1 }
 0x3f8   : > { %v2984_v36 = vpop.f32.mrf.mxu3 }
 0x3f9   : > { %v2475_v31 = vpop.f32.mrf.mxu1  ;;  %v2985_v11 = vadd.f32 %v2984_v36, %v2908_v40  ;;  %v3061_v36 = vrot.slane %v3060_v41, 2 }
 0x3fa   : > { %v2476_v23 = vadd.f32 %v2475_v31, %v2399_v37  ;;  %v3090_v37 = vadd.f32 %v3089_v34, %v3088_v32  ;;  %v2581_v31 = vrot.slane %v2580_v2, 1  ;;  %v2552_v32 = vadd.f32 %v2551_v47, %v6684_v61 }
 0x3fb   : > { %v3038_v55 = vmul.f32 %v6530_v12, %v2985_v11  ;;  %v3098_v9 = vmul.f32 %v6534_v51, %v2985_v11  ;;  %v3062_v58 = vadd.f32 %v3061_v36, %v3060_v41  ;;  %v2567_v11 = vadd.f32 %v2566_v8, %v2565_v62 }
 0x3fc   : > { %v2527_v50 = vmul.f32 %v6547_v53, %v2476_v23  ;;  %v2587_v24 = vmul.f32 %v6551_v49, %v2476_v23 }
 0x3fd   : > { %v3042_v27 = vadd.f32 %v3041_v18, %v3038_v55  ;;  %v3102_v51 = vadd.f32 %v3101_v44, %v3098_v9  ;;  %v3063_v14 = vrot.slane %v3062_v58, 1  ;;  %v3079_v9 = vadd.f32 %v3078_v48, %v3077_v6 }
 0x3fe   : > { %v2531_v33 = vadd.f32 %v2530_v42, %v2527_v50  ;;  %v2591_v60 = vadd.f32 %v2590_v22, %v2587_v24  ;;  %v2582_v50 = vadd.f32 %v2581_v31, %v2580_v2 }
 0x3ff   : > { %v3064_v55 = vadd.f32 %v3063_v14, %v3062_v58 }
 0x400   : > { %v2532_v19 = vrot.slane %v2531_v33, 4  ;;  %v2592_v7 = vrot.slane %v2591_v60, 4  ;;  %v2987_v25 = vpop.f32.mrf.mxu3 }
 0x401   : > { %v2988_v3 = vadd.f32 %v2987_v25, %v2911_v52 }
 0x402   : > { %v2533_v29 = vadd.f32 %v2532_v19, %v2531_v33  ;;  %v2593_v12 = vadd.f32 %v2592_v7, %v2591_v60 }
 0x403   : > { %v3039_v35 = vmul.f32 %v6547_v53, %v2988_v3  ;;  %v3099_v26 = vmul.f32 %v6551_v49, %v2988_v3  ;;  %v3091_v53 = vrot.slane %v3090_v37, 2 }
 0x404   : > { %v2534_v1 = vrot.slane %v2533_v29, 2  ;;  %v2594_v21 = vrot.slane %v2593_v12, 2 }
 0x405   : > { %v3043_v59 = vadd.f32 %v3042_v27, %v3039_v35  ;;  %v3103_v10 = vadd.f32 %v3102_v51, %v3099_v26  ;;  %v3092_v42 = vadd.f32 %v3091_v53, %v3090_v37 }
 0x406   : > { %v2535_v4 = vadd.f32 %v2534_v1, %v2533_v29  ;;  %v2595_v38 = vadd.f32 %v2594_v21, %v2593_v12 }
 0x407   : > { %v3044_v40 = vrot.slane %v3043_v59, 4  ;;  %v3104_v15 = vrot.slane %v3103_v10, 4 }
 0x408   : > { %v2536_v49 = vrot.slane %v2535_v4, 1  ;;  %v2596_v39 = vrot.slane %v2595_v38, 1 }
 0x409   : > { %v3045_v20 = vadd.f32 %v3044_v40, %v3043_v59  ;;  %v3105_v0 = vadd.f32 %v3104_v15, %v3103_v10 }
 0x40a   : > { %v2537_v23 = vadd.f32 %v2536_v49, %v2535_v4  ;;  %v2597_v30 = vadd.f32 %v2596_v39, %v2595_v38 }
 0x40b   : > { %v3046_v13 = vrot.slane %v3045_v20, 2  ;;  %v3106_v63 = vrot.slane %v3105_v0, 2 }
 0x40c   : > { %v2600_v22 = vsel %vm1572_vm2, %v6659_v56, %v2537_v23  ;;  %v3093_v56 = vrot.slane %v3092_v42, 1 }
 0x40d   : > { %v2601_v24 = vsel %vm1574_vm3, %v2600_v22, %v2552_v32  ;;  %v3047_v28 = vadd.f32 %v3046_v13, %v3045_v20  ;;  %v3107_v46 = vadd.f32 %v3106_v63, %v3105_v0 }
 0x40e   : > { %v2602_v61 = vsel %vm1576_vm4, %v2601_v24, %v2567_v11  ;;  %v3094_v34 = vadd.f32 %v3093_v56, %v3092_v42 }
 0x40f   : > { %v2603_v52 = vsel %vm1578_vm5, %v2602_v61, %v2582_v50  ;;  %v3048_v33 = vrot.slane %v3047_v28, 1  ;;  %v3108_v57 = vrot.slane %v3107_v46, 1 }
 0x410   : > { %v2604_v60 = vsel %vm1580_vm6, %v2603_v52, %v2597_v30 }
 0x411   : > { %3242 = vst [vmem:[%s6483_s8 + $0x10] sm:$0xff] %v2604_v60  ;;  %v3049_v45 = vadd.f32 %v3048_v33, %v3047_v28  ;;  %v3109_v7 = vadd.f32 %v3108_v57, %v3107_v46 }
 0x413   : > { %v3112_v54 = vsel %vm1572_vm2, %v6670_v17, %v3049_v45 }
 0x414   : > { %v3113_v19 = vsel %vm1574_vm3, %v3112_v54, %v3064_v55 }
 0x415   : > { %v3114_v25 = vsel %vm1576_vm4, %v3113_v19, %v3079_v9 }
 0x416   : > { %v3115_v5 = vsel %vm1578_vm5, %v3114_v25, %v3094_v34 }
 0x417   : > { %v3116_v18 = vsel %vm1580_vm6, %v3115_v5, %v3109_v7 }
 0x418   : > { %3244 = vst [vmem:[%s6483_s8 + $0x18] sm:$0xff] %v3116_v18 }
 0x419   : > { %3436 = shalt.err (!%p3433_p3)
}
 0x41a   : > { %s3484_s27 = smov 128   ;;  %s3485_s8 = smov 256  }
 0x41b   : > { %s3486_s10 = smov 8  }
 0x41c   : > { %3253 = dma.vmem_to_hbm [thread:$0]  (%p3565_p9), %s3132_s22, 512, %s3134_s17, %s3120_s14, %s3484_s27, %s3485_s8, %s3486_s10  }
 0x41d PF: > { %s3148_s25 = sand.u32 1, %s3463_s18   ;;  %p3256_p4 = pnand %p3227_p11, %p3569_p10 }
 0x41e   : > { %s3149_s11 = scalar_lea.sflag [#allocation5], %s3148_s25 }
 0x41f   : > { %p3257_p7 = pneg %p3256_p4 }
 0x421   : > { %3458 = dma.done.wait (%p3257_p7), %s3149_s11, 512  }
 0x422   : > { %3460 = vsyncadd (%p3257_p7), %s3149_s11, 4294966784  ;;  %s7284_s26 = sld [smem:[#allocation9_spill]]  ;;  %p18_p8 = scmp.ge.s32.totalorder %s3542_s24, 4  }
 0x423   : > { %s7285_s18 = smov %s3467_s19  ;;  %s7286_s19 = smov %s3471_s20 }
 0x424   : > { %s7288_s21 = smov %s3542_s24  ;;  %20 = sbr.rel (!%p18_p8) target bundleno = 7 (0x7), region = 141 }
 0x428   : > { %s7287_s20 = smov %s7284_s26 }
 0x429   :  { %3155 = vsyncpa [#allocation4], 1 }
 0x42a   :  { %3157 = vsyncpa [#allocation4 + $0x1], 1 }
 0x42b   :  { %3158 = vsyncpa [#allocation5], 1 }
 0x42c   :  { %3160 = vsyncpa [#allocation5 + $0x1], 1 }

</bundles_post_ra>
